<compile_context>
chip_gen: v7x
topology: tpu7x:2x2x1
jax: 0.10.0
libtpu: 0.0.40
codegen_flags: <defaults>
</compile_context>

<pallas_src>
import numpy as np
import jax
import jax.numpy as jnp
from jax import lax
from jax.experimental import pallas as pl
from jax.experimental.pallas import tpu as pltpu

_VMEM = pl.BlockSpec(memory_space=pltpu.MemorySpace.VMEM)
_LANE = 128
_H1 = _W1 = 14      # spatial size after conv1 (28x28, stride 2)
_H2 = _W2 = 7       # spatial size after block1_2 (stride 2)


def _round_up(n, m):
    return ((n + m - 1) // m) * m


# ----------------------------------------------------------------------------
# Packed weight-slab layout: name -> (row_offset, n_rows, n_cols).
# All conv weights are "stacked-tap" matrices (Cout, 9*Cin + 1) with the folded-BN
# bias in the last column; the *_c1c entries also carry the 1x1 shortcut rows.
# ----------------------------------------------------------------------------
def _wslab_layout():
    entries = [
        ("conv1",    8, 10),    # 1->8 k3 s2 conv vs im2col'ed input (+bias col)
        ("b11_c1",   8, 73),
        ("b11_c2",   8, 73),
        ("b12_c1c", 32, 73),    # rows 0-15: 8->16 conv1; rows 16-31: 1x1 s2 shortcut
        ("b12_c2",  16, 145),
        ("b21_c1",  16, 145),
        ("b21_c2",  16, 145),
        ("b22_c1c", 16, 145),   # rows 0-7: 16->8 conv1; rows 8-15: 1x1 shortcut
        ("b22_c2",   8, 73),
        ("att1",     4, 9),     # Linear(8,4) weight (avg-pool 1/49 folded) + bias col
        ("att2",     8, 5),     # Linear(4,8) weight + bias col
        ("fc1_b",    1, 32),    # fc1 bias as a row
        ("fc2_w",   10, 32),
        ("fc2_b",    1, 10),    # fc2 bias as a row
    ]
    table, off = {}, 0
    for name, r, c in entries:
        table[name] = (off, r, c)
        off += r
    return table, off, max(c for _, _, c in entries)


# ----------------------------------------------------------------------------
# The single fused kernel
# ----------------------------------------------------------------------------
def _make_kernel(batch, m14p, m7p):
    table, _, _ = _wslab_layout()
    f32 = jnp.float32
    dot = lambda a, b: jnp.dot(a, b, preferred_element_type=f32)
    # Contract last dims of both operands (A @ B^T) without materializing a transpose.
    dot_t = lambda a, b: lax.dot_general(a, b, (((1,), (1,)), ((), ())),
                                         preferred_element_type=f32)
    relu = lambda v: jnp.maximum(v, 0.0)

    def conv3x3(a, w, msk, width, mpad):
        """Stacked-tap 3x3 conv (padding=1) on transposed activations a: (Cin, mpad).

        Builds A_stacked (9*Cin + 1, mpad) via 9 static lane rolls + boundary masks
        plus a 'valid columns' row (for the folded-BN bias), then ONE MXU matmul.
        Padding lanes come out exactly 0.
        """
        taps = []
        t = 0
        for dy in (-1, 0, 1):
            for dx in (-1, 0, 1):
                s = dy * width + dx
                rolled = a if s == 0 else pltpu.roll(a, (-s) % mpad, axis=1)
                taps.append(rolled * msk[t:t + 1, :])
                t += 1
        taps.append(msk[4:5, :])          # center-tap mask == 1 on valid cols, 0 on padding
        return dot(w, jnp.concatenate(taps, axis=0))

    def kernel(x0_ref, w_ref, m14_ref, c7_ref, ds_ref, wfc1_ref, out_ref):
        def W(name):
            off, r, c = table[name]
            return w_ref[off:off + r, 0:c]

        m14 = m14_ref[...]                      # (9, m14p)   tap masks, 14x14 stage
        m7 = c7_ref[0:9, :]                     # (9, m7p)    tap masks, 7x7 stage
        bcast = c7_ref[9:9 + batch, :]          # (B, m7p)    per-image column indicator
        ds = ds_ref[...]                        # (m14p, m7p) stride-2 column selection

        # conv1 (1->8, k3, s2, p1) + folded BN + ReLU; input pre-im2col'ed to (10, m14p).
        a = relu(dot(W("conv1"), x0_ref[...]))                       # (8, m14p)

        # ---- block1_1 (8->8, stride 1, identity shortcut) ----
        z = relu(conv3x3(a, W("b11_c1"), m14, _W1, m14p))
        z = conv3x3(z, W("b11_c2"), m14, _W1, m14p)
        a = relu(z + a)

        # ---- block1_2 (8->16, stride 2, 1x1-conv shortcut) ----
        # conv1 and the shortcut share one 32-row stacked matmul and ONE ds matmul.
        comb = dot(conv3x3(a, W("b12_c1c"), m14, _W1, m14p), ds)     # (32, m7p)
        z = relu(comb[0:16, :])
        res = comb[16:32, :]
        z = conv3x3(z, W("b12_c2"), m7, _W2, m7p)
        a = relu(z + res)                                            # (16, m7p)

        # ---- block2_1 (16->16, stride 1, identity shortcut) ----
        z = relu(conv3x3(a, W("b21_c1"), m7, _W2, m7p))
        z = conv3x3(z, W("b21_c2"), m7, _W2, m7p)
        a = relu(z + a)

        # ---- block2_2 (16->8, stride 1, 1x1-conv shortcut folded into conv1) ----
        comb = conv3x3(a, W("b22_c1c"), m7, _W2, m7p)                # (16, m7p)
        z = relu(comb[0:8, :])
        res = comb[8:16, :]
        z = conv3x3(z, W("b22_c2"), m7, _W2, m7p)
        a = relu(z + res)                                            # (8, m7p)

        # ---- squeeze-excite: avg-pool (1/49 folded into att1) -> MLP -> sigmoid ----
        pooled = dot_t(a, bcast)                                     # (8, B) per-image sums
        att1 = W("att1")
        att2 = W("att2")
        h = relu(dot(att1[:, 0:8], pooled) + att1[:, 8:9])           # (4, B)
        gate = jax.nn.sigmoid(dot(att2[:, 0:4], h) + att2[:, 4:5])   # (8, B)
        a = a * dot(gate, bcast)                                     # (8, m7p)

        # ---- fc1: torch's channel-major flatten is folded into the lane-tiled fc1
        # weight, so it becomes 8 broadcast multiplies + one per-image reduction. ----
        v = wfc1_ref[0] * a[0:1, :]
        for c in range(1, 8):
            v = v + wfc1_ref[c] * a[c:c + 1, :]                      # (32, m7p)
        hfc = relu(dot_t(bcast, v) + W("fc1_b"))                     # (B, 32)
        # Dropout(p=0.2) is identity at inference.
        out_ref[...] = dot_t(hfc, W("fc2_w")) + W("fc2_b")           # (B, 10)

    return kernel


# ----------------------------------------------------------------------------
# One-time parameter preprocessing (BN fold, tap stacking, constant matrices)
# ----------------------------------------------------------------------------
def prepare_inputs(params, batch, eps=1e-5):
    m14 = batch * _H1 * _W1
    m7 = batch * _H2 * _W2
    m14p = _round_up(m14, _LANE)
    m7p = _round_up(m7, _LANE)
    table, nrows, ncols = _wslab_layout()

    def fold(conv, bn):
        w = np.asarray(conv["w"], np.float32)
        b = np.asarray(conv["b"], np.float32)
        gamma = np.asarray(bn["gamma"], np.float32)
        beta = np.asarray(bn["beta"], np.float32)
        mean = np.asarray(bn["mean"], np.float32)
        var = np.asarray(bn["var"], np.float32)
        scale = gamma / np.sqrt(var + eps)
        return w * scale[:, None, None, None], (b - mean) * scale + beta

    def stack3(wf, bf):
        # (Cout, Cin, 3, 3) + (Cout,) -> (Cout, 9*Cin + 1); column t*Cin+ci, t = ky*3+kx.
        cout, cin = wf.shape[0], wf.shape[1]
        w = np.transpose(wf, (0, 2, 3, 1)).reshape(cout, 9 * cin)
        return np.concatenate([w, bf.reshape(cout, 1)], axis=1)

    def conv_masks(h, w, mpad):
        m = np.zeros((9, mpad), np.float32)
        t = 0
        for dy in (-1, 0, 1):
            for dx in (-1, 0, 1):
                for bb in range(batch):
                    for y in range(h):
                        for x in range(w):
                            if 0 <= y + dy < h and 0 <= x + dx < w:
                                m[t, bb * h * w + y * w + x] = 1.0
                t += 1
        return m

    wslab = np.zeros((nrows, ncols), np.float32)

    def put(name, block):
        off, r, c = table[name]
        assert block.shape == (r, c), (name, block.shape, (r, c))
        wslab[off:off + r, 0:c] = block

    # conv1 + bn1 (stride-2 conv applied to the pre-im2col'ed input)
    put("conv1", stack3(*fold(params["conv1"], params["bn1"])))

    # block1_1
    blk = params["block1_1"]
    put("b11_c1", stack3(*fold(blk["conv1"], blk["bn1"])))
    put("b11_c2", stack3(*fold(blk["conv2"], blk["bn2"])))

    # block1_2: conv1 + 1x1 stride-2 shortcut folded into one 32-row stacked matmul
    blk = params["block1_2"]
    c1 = stack3(*fold(blk["conv1"], blk["bn1"]))                        # (16, 73)
    sc_w, sc_b = fold({"w": blk["shortcut"]["w"], "b": blk["shortcut"]["b"]},
                      blk["shortcut"]["bn"])
    sc = np.zeros((16, 73), np.float32)
    sc[:, 4 * 8:5 * 8] = sc_w.reshape(16, 8)     # center tap == identity spatial read
    sc[:, 72] = sc_b
    put("b12_c1c", np.concatenate([c1, sc], axis=0))
    put("b12_c2", stack3(*fold(blk["conv2"], blk["bn2"])))

    # block2_1
    blk = params["block2_1"]
    put("b21_c1", stack3(*fold(blk["conv1"], blk["bn1"])))
    put("b21_c2", stack3(*fold(blk["conv2"], blk["bn2"])))

    # block2_2: conv1 + 1x1 shortcut folded
    blk = params["block2_2"]
    c1 = stack3(*fold(blk["conv1"], blk["bn1"]))                        # (8, 145)
    sc_w, sc_b = fold({"w": blk["shortcut"]["w"], "b": blk["shortcut"]["b"]},
                      blk["shortcut"]["bn"])
    sc = np.zeros((8, 145), np.float32)
    sc[:, 4 * 16:5 * 16] = sc_w.reshape(8, 16)
    sc[:, 144] = sc_b
    put("b22_c1c", np.concatenate([c1, sc], axis=0))
    put("b22_c2", stack3(*fold(blk["conv2"], blk["bn2"])))

    # SE attention MLP (avg-pool's 1/49 folded into lin1 weight) + fc biases / fc2.
    att = params["fc_attention"]
    a1 = np.zeros((4, 9), np.float32)
    a1[:, 0:8] = np.asarray(att["lin1"]["w"], np.float32) / float(_H2 * _W2)
    a1[:, 8] = np.asarray(att["lin1"]["b"], np.float32)
    put("att1", a1)
    a2 = np.zeros((8, 5), np.float32)
    a2[:, 0:4] = np.asarray(att["lin2"]["w"], np.float32)
    a2[:, 4] = np.asarray(att["lin2"]["b"], np.float32)
    put("att2", a2)
    put("fc1_b", np.asarray(params["fc1"]["b"], np.float32).reshape(1, 32))
    put("fc2_w", np.asarray(params["fc2"]["w"], np.float32))
    put("fc2_b", np.asarray(params["fc2"]["b"], np.float32).reshape(1, 10))

    # Constants: tap masks, per-image column indicators, stride-2 selection matrix.
    msk14 = conv_masks(_H1, _W1, m14p)                                  # (9, m14p)
    msk7 = conv_masks(_H2, _W2, m7p)                                    # (9, m7p)
    bcast = np.zeros((batch, m7p), np.float32)
    for bb in range(batch):
        bcast[bb, bb * _H2 * _W2:(bb + 1) * _H2 * _W2] = 1.0
    c7 = np.concatenate([msk7, bcast], axis=0)                          # (9 + B, m7p)

    ds = np.zeros((m14p, m7p), np.float32)
    for bb in range(batch):
        for y in range(_H2):
            for x in range(_W2):
                ds[bb * _H1 * _W1 + (2 * y) * _W1 + 2 * x,
                   bb * _H2 * _W2 + y * _W2 + x] = 1.0

    # fc1 weight tiled per channel over the lane axis (torch channel-major flatten fold).
    fc1_w = np.asarray(params["fc1"]["w"], np.float32)                  # (32, 392)
    hw = _H2 * _W2
    wfc1 = np.zeros((8, 32, m7p), np.float32)
    for c in range(8):
        for bb in range(batch):
            wfc1[c, :, bb * hw:(bb + 1) * hw] = fc1_w[:, c * hw:(c + 1) * hw]

    arrays = (wslab, msk14, c7, ds, wfc1)
    return tuple(jnp.asarray(x) for x in arrays)


# ----------------------------------------------------------------------------
# Forward-pass builder (exactly one pallas_call per forward)
# ----------------------------------------------------------------------------
def make_forward(batch):
    m14 = batch * _H1 * _W1
    m14p = _round_up(m14, _LANE)
    m7p = _round_up(batch * _H2 * _W2, _LANE)
    kernel = _make_kernel(batch, m14p, m7p)

    pallas_fn = pl.pallas_call(
        kernel,
        out_shape=jax.ShapeDtypeStruct((batch, 10), jnp.float32),
        in_specs=[_VMEM] * 6,
        out_specs=_VMEM,
    )

    def forward(prepped, x_nchw):
        # Only the raw network input needs wrapper-side prep (im2col for the stride-2
        # conv1; one small XLA fusion on data that must be read from HBM anyway).
        # TODO(synk): fold the stride-2 im2col itself into the kernel (needs a gather
        # layout pltpu.roll cannot express without large selection constants).
        x = x_nchw.astype(jnp.float32).reshape(batch, 28, 28)
        xp = jnp.pad(x, ((0, 0), (1, 1), (1, 1)))                        # (B, 30, 30)
        taps = [xp[:, ky:ky + 2 * _H1:2, kx:kx + 2 * _W1:2]
                for ky in range(3) for kx in range(3)]                   # 9 x (B,14,14)
        x0 = jnp.stack(taps, axis=0).reshape(9, m14)
        x0 = jnp.concatenate([x0, jnp.ones((1, m14), jnp.float32)], axis=0)
        x0 = jnp.pad(x0, ((0, 0), (0, m14p - m14)))                      # (10, m14p)
        return pallas_fn(x0, *prepped)                                   # (B, 10)

    return forward


# ----------------------------------------------------------------------------
# Deterministic parameter initialization (same shapes as the torch module)
# ----------------------------------------------------------------------------
def init_params(key):
    keys = iter(jax.random.split(key, 64))

    def conv(cout, cin, k):
        return {
            "w": jax.random.normal(next(keys), (cout, cin, k, k), jnp.float32) * 0.1,
            "b": jax.random.normal(next(keys), (cout,), jnp.float32) * 0.01,
        }

    def bn(c):  # PyTorch BatchNorm2d defaults (eval-mode running stats)
        return {
            "gamma": jnp.ones((c,), jnp.float32),
            "beta": jnp.zeros((c,), jnp.float32),
            "mean": jnp.zeros((c,), jnp.float32),
            "var": jnp.ones((c,), jnp.float32),
        }

    def linear(cout, cin):
        return {
            "w": jax.random.normal(next(keys), (cout, cin), jnp.float32) * 0.1,
            "b": jax.random.normal(next(keys), (cout,), jnp.float32) * 0.01,
        }

    def block(cin, cout, stride):
        p = {
            "conv1": conv(cout, cin, 3), "bn1": bn(cout),
            "conv2": conv(cout, cout, 3), "bn2": bn(cout),
        }
        if cin != cout or stride != 1:
            sc = conv(cout, cin, 1)
            p["shortcut"] = {"w": sc["w"], "b": sc["b"], "bn": bn(cout)}
        return p

    return {
        "conv1": conv(8, 1, 3), "bn1": bn(8),
        "block1_1": block(8, 8, 1),
        "block1_2": block(8, 16, 2),
        "block2_1": block(16, 16, 1),
        "block2_2": block(16, 8, 1),
        "fc_attention": {"lin1": linear(4, 8), "lin2": linear(8, 4)},
        "fc1": linear(32, 8 * 7 * 7),
        "fc2": linear(10, 32),
    }


if __name__ == "__main__":
    key = jax.random.PRNGKey(0)
    pkey, xkey = jax.random.split(key)
    params = init_params(pkey)

    batch = 2
    # MNIST-shaped input: fc1 requires 28x28 spatial input (-> 8 channels of 7x7).
    x = jax.random.normal(xkey, (batch, 1, 28, 28), jnp.float32)

    prepped = prepare_inputs(params, batch)
    fwd = jax.jit(make_forward(batch))

    logits = fwd(prepped, x)
    logits = jax.block_until_ready(logits)
    assert logits.shape == (batch, 10), logits.shape
    assert bool(jnp.all(jnp.isfinite(logits)))
    print("KERNEL_OK")
</pallas_src>

<mosaic_0001>
module attributes {stable_mosaic.version = 11 : i64} {
  func.func @kernel(%arg0: memref<10x512xf32, #tpu.memory_space<vmem>>, %arg1: memref<152x145xf32, #tpu.memory_space<vmem>>, %arg2: memref<9x512xf32, #tpu.memory_space<vmem>>, %arg3: memref<11x128xf32, #tpu.memory_space<vmem>>, %arg4: memref<512x128xf32, #tpu.memory_space<vmem>>, %arg5: memref<8x32x128xf32, #tpu.memory_space<vmem>>, %arg6: memref<2x10xf32, #tpu.memory_space<vmem>>) attributes {dimension_semantics = [], scalar_prefetch = 0 : i64, scratch_operands = 0 : i64, tpu.core_type = #tpu.core_type<tc>} {
    %c0 = arith.constant 0 : index
    %c0_0 = arith.constant 0 : index
    %0 = vector.load %arg2[%c0, %c0_0] : memref<9x512xf32, #tpu.memory_space<vmem>>, vector<9x512xf32>
    %c0_1 = arith.constant 0 : index
    %c0_2 = arith.constant 0 : index
    %1 = vector.load %arg3[%c0_1, %c0_2] : memref<11x128xf32, #tpu.memory_space<vmem>>, vector<9x128xf32>
    %c9 = arith.constant 9 : index
    %c0_3 = arith.constant 0 : index
    %2 = vector.load %arg3[%c9, %c0_3] : memref<11x128xf32, #tpu.memory_space<vmem>>, vector<2x128xf32>
    %c0_4 = arith.constant 0 : index
    %c0_5 = arith.constant 0 : index
    %3 = vector.load %arg4[%c0_4, %c0_5] : memref<512x128xf32, #tpu.memory_space<vmem>>, vector<512x128xf32>
    %c0_6 = arith.constant 0 : index
    %c0_7 = arith.constant 0 : index
    %4 = vector.load %arg1[%c0_6, %c0_7] : memref<152x145xf32, #tpu.memory_space<vmem>>, vector<8x10xf32>
    %c0_8 = arith.constant 0 : index
    %c0_9 = arith.constant 0 : index
    %5 = vector.load %arg0[%c0_8, %c0_9] : memref<10x512xf32, #tpu.memory_space<vmem>>, vector<10x512xf32>
    %cst = arith.constant dense<0.000000e+00> : vector<8x512xf32>
    %6 = tpu.matmul %4, %5, %cst {dimension_numbers = #tpu.dot_dimension_numbers<[1], [0], [0], [1], [0, 0, 1, 1], [], []>} : vector<8x10xf32>, vector<10x512xf32>, vector<8x512xf32> -> vector<8x512xf32>
    %cst_10 = arith.constant 0.000000e+00 : f32
    %7 = vector.broadcast %cst_10 : f32 to vector<8x512xf32>
    %8 = arith.maximumf %6, %7 : vector<8x512xf32>
    %c8 = arith.constant 8 : index
    %c0_11 = arith.constant 0 : index
    %9 = vector.load %arg1[%c8, %c0_11] : memref<152x145xf32, #tpu.memory_space<vmem>>, vector<8x73xf32>
    %c15_i32 = arith.constant 15 : i32
    %10 = tpu.dynamic_rotate %8 by %c15_i32 dim 1 : vector<8x512xf32>, i32 -> vector<8x512xf32>
    %11 = vector.extract_strided_slice %0 {offsets = [0, 0], sizes = [1, 512], strides = [1, 1]} : vector<9x512xf32> to vector<1x512xf32>
    %12 = vector.broadcast %11 : vector<1x512xf32> to vector<8x512xf32>
    %13 = arith.mulf %10, %12 : vector<8x512xf32>
    %c14_i32 = arith.constant 14 : i32
    %14 = tpu.dynamic_rotate %8 by %c14_i32 dim 1 : vector<8x512xf32>, i32 -> vector<8x512xf32>
    %15 = vector.extract_strided_slice %0 {offsets = [1, 0], sizes = [1, 512], strides = [1, 1]} : vector<9x512xf32> to vector<1x512xf32>
    %16 = vector.broadcast %15 : vector<1x512xf32> to vector<8x512xf32>
    %17 = arith.mulf %14, %16 : vector<8x512xf32>
    %c13_i32 = arith.constant 13 : i32
    %18 = tpu.dynamic_rotate %8 by %c13_i32 dim 1 : vector<8x512xf32>, i32 -> vector<8x512xf32>
    %19 = vector.extract_strided_slice %0 {offsets = [2, 0], sizes = [1, 512], strides = [1, 1]} : vector<9x512xf32> to vector<1x512xf32>
    %20 = vector.broadcast %19 : vector<1x512xf32> to vector<8x512xf32>
    %21 = arith.mulf %18, %20 : vector<8x512xf32>
    %c1_i32 = arith.constant 1 : i32
    %22 = tpu.dynamic_rotate %8 by %c1_i32 dim 1 : vector<8x512xf32>, i32 -> vector<8x512xf32>
    %23 = vector.extract_strided_slice %0 {offsets = [3, 0], sizes = [1, 512], strides = [1, 1]} : vector<9x512xf32> to vector<1x512xf32>
    %24 = vector.broadcast %23 : vector<1x512xf32> to vector<8x512xf32>
    %25 = arith.mulf %22, %24 : vector<8x512xf32>
    %26 = vector.extract_strided_slice %0 {offsets = [4, 0], sizes = [1, 512], strides = [1, 1]} : vector<9x512xf32> to vector<1x512xf32>
    %27 = vector.broadcast %26 : vector<1x512xf32> to vector<8x512xf32>
    %28 = arith.mulf %8, %27 : vector<8x512xf32>
    %c511_i32 = arith.constant 511 : i32
    %29 = tpu.dynamic_rotate %8 by %c511_i32 dim 1 : vector<8x512xf32>, i32 -> vector<8x512xf32>
    %30 = vector.extract_strided_slice %0 {offsets = [5, 0], sizes = [1, 512], strides = [1, 1]} : vector<9x512xf32> to vector<1x512xf32>
    %31 = vector.broadcast %30 : vector<1x512xf32> to vector<8x512xf32>
    %32 = arith.mulf %29, %31 : vector<8x512xf32>
    %c499_i32 = arith.constant 499 : i32
    %33 = tpu.dynamic_rotate %8 by %c499_i32 dim 1 : vector<8x512xf32>, i32 -> vector<8x512xf32>
    %34 = vector.extract_strided_slice %0 {offsets = [6, 0], sizes = [1, 512], strides = [1, 1]} : vector<9x512xf32> to vector<1x512xf32>
    %35 = vector.broadcast %34 : vector<1x512xf32> to vector<8x512xf32>
    %36 = arith.mulf %33, %35 : vector<8x512xf32>
    %c498_i32 = arith.constant 498 : i32
    %37 = tpu.dynamic_rotate %8 by %c498_i32 dim 1 : vector<8x512xf32>, i32 -> vector<8x512xf32>
    %38 = vector.extract_strided_slice %0 {offsets = [7, 0], sizes = [1, 512], strides = [1, 1]} : vector<9x512xf32> to vector<1x512xf32>
    %39 = vector.broadcast %38 : vector<1x512xf32> to vector<8x512xf32>
    %40 = arith.mulf %37, %39 : vector<8x512xf32>
    %c497_i32 = arith.constant 497 : i32
    %41 = tpu.dynamic_rotate %8 by %c497_i32 dim 1 : vector<8x512xf32>, i32 -> vector<8x512xf32>
    %42 = vector.extract_strided_slice %0 {offsets = [8, 0], sizes = [1, 512], strides = [1, 1]} : vector<9x512xf32> to vector<1x512xf32>
    %43 = vector.broadcast %42 : vector<1x512xf32> to vector<8x512xf32>
    %44 = arith.mulf %41, %43 : vector<8x512xf32>
    %45 = vector.extract_strided_slice %0 {offsets = [4, 0], sizes = [1, 512], strides = [1, 1]} : vector<9x512xf32> to vector<1x512xf32>
    %46 = tpu.concatenate %13, %17, %21, %25, %28, %32, %36, %40, %44, %45 in 0 : vector<8x512xf32>, vector<8x512xf32>, vector<8x512xf32>, vector<8x512xf32>, vector<8x512xf32>, vector<8x512xf32>, vector<8x512xf32>, vector<8x512xf32>, vector<8x512xf32>, vector<1x512xf32> -> vector<73x512xf32>
    %cst_12 = arith.constant dense<0.000000e+00> : vector<8x512xf32>
    %47 = tpu.matmul %9, %46, %cst_12 {dimension_numbers = #tpu.dot_dimension_numbers<[1], [0], [0], [1], [0, 0, 1, 1], [], []>} : vector<8x73xf32>, vector<73x512xf32>, vector<8x512xf32> -> vector<8x512xf32>
    %cst_13 = arith.constant 0.000000e+00 : f32
    %48 = vector.broadcast %cst_13 : f32 to vector<8x512xf32>
    %49 = arith.maximumf %47, %48 : vector<8x512xf32>
    %c16 = arith.constant 16 : index
    %c0_14 = arith.constant 0 : index
    %50 = vector.load %arg1[%c16, %c0_14] : memref<152x145xf32, #tpu.memory_space<vmem>>, vector<8x73xf32>
    %c15_i32_15 = arith.constant 15 : i32
    %51 = tpu.dynamic_rotate %49 by %c15_i32_15 dim 1 : vector<8x512xf32>, i32 -> vector<8x512xf32>
    %52 = vector.extract_strided_slice %0 {offsets = [0, 0], sizes = [1, 512], strides = [1, 1]} : vector<9x512xf32> to vector<1x512xf32>
    %53 = vector.broadcast %52 : vector<1x512xf32> to vector<8x512xf32>
    %54 = arith.mulf %51, %53 : vector<8x512xf32>
    %c14_i32_16 = arith.constant 14 : i32
    %55 = tpu.dynamic_rotate %49 by %c14_i32_16 dim 1 : vector<8x512xf32>, i32 -> vector<8x512xf32>
    %56 = vector.extract_strided_slice %0 {offsets = [1, 0], sizes = [1, 512], strides = [1, 1]} : vector<9x512xf32> to vector<1x512xf32>
    %57 = vector.broadcast %56 : vector<1x512xf32> to vector<8x512xf32>
    %58 = arith.mulf %55, %57 : vector<8x512xf32>
    %c13_i32_17 = arith.constant 13 : i32
    %59 = tpu.dynamic_rotate %49 by %c13_i32_17 dim 1 : vector<8x512xf32>, i32 -> vector<8x512xf32>
    %60 = vector.extract_strided_slice %0 {offsets = [2, 0], sizes = [1, 512], strides = [1, 1]} : vector<9x512xf32> to vector<1x512xf32>
    %61 = vector.broadcast %60 : vector<1x512xf32> to vector<8x512xf32>
    %62 = arith.mulf %59, %61 : vector<8x512xf32>
    %c1_i32_18 = arith.constant 1 : i32
    %63 = tpu.dynamic_rotate %49 by %c1_i32_18 dim 1 : vector<8x512xf32>, i32 -> vector<8x512xf32>
    %64 = vector.extract_strided_slice %0 {offsets = [3, 0], sizes = [1, 512], strides = [1, 1]} : vector<9x512xf32> to vector<1x512xf32>
    %65 = vector.broadcast %64 : vector<1x512xf32> to vector<8x512xf32>
    %66 = arith.mulf %63, %65 : vector<8x512xf32>
    %67 = vector.extract_strided_slice %0 {offsets = [4, 0], sizes = [1, 512], strides = [1, 1]} : vector<9x512xf32> to vector<1x512xf32>
    %68 = vector.broadcast %67 : vector<1x512xf32> to vector<8x512xf32>
    %69 = arith.mulf %49, %68 : vector<8x512xf32>
    %c511_i32_19 = arith.constant 511 : i32
    %70 = tpu.dynamic_rotate %49 by %c511_i32_19 dim 1 : vector<8x512xf32>, i32 -> vector<8x512xf32>
    %71 = vector.extract_strided_slice %0 {offsets = [5, 0], sizes = [1, 512], strides = [1, 1]} : vector<9x512xf32> to vector<1x512xf32>
    %72 = vector.broadcast %71 : vector<1x512xf32> to vector<8x512xf32>
    %73 = arith.mulf %70, %72 : vector<8x512xf32>
    %c499_i32_20 = arith.constant 499 : i32
    %74 = tpu.dynamic_rotate %49 by %c499_i32_20 dim 1 : vector<8x512xf32>, i32 -> vector<8x512xf32>
    %75 = vector.extract_strided_slice %0 {offsets = [6, 0], sizes = [1, 512], strides = [1, 1]} : vector<9x512xf32> to vector<1x512xf32>
    %76 = vector.broadcast %75 : vector<1x512xf32> to vector<8x512xf32>
    %77 = arith.mulf %74, %76 : vector<8x512xf32>
    %c498_i32_21 = arith.constant 498 : i32
    %78 = tpu.dynamic_rotate %49 by %c498_i32_21 dim 1 : vector<8x512xf32>, i32 -> vector<8x512xf32>
    %79 = vector.extract_strided_slice %0 {offsets = [7, 0], sizes = [1, 512], strides = [1, 1]} : vector<9x512xf32> to vector<1x512xf32>
    %80 = vector.broadcast %79 : vector<1x512xf32> to vector<8x512xf32>
    %81 = arith.mulf %78, %80 : vector<8x512xf32>
    %c497_i32_22 = arith.constant 497 : i32
    %82 = tpu.dynamic_rotate %49 by %c497_i32_22 dim 1 : vector<8x512xf32>, i32 -> vector<8x512xf32>
    %83 = vector.extract_strided_slice %0 {offsets = [8, 0], sizes = [1, 512], strides = [1, 1]} : vector<9x512xf32> to vector<1x512xf32>
    %84 = vector.broadcast %83 : vector<1x512xf32> to vector<8x512xf32>
    %85 = arith.mulf %82, %84 : vector<8x512xf32>
    %86 = vector.extract_strided_slice %0 {offsets = [4, 0], sizes = [1, 512], strides = [1, 1]} : vector<9x512xf32> to vector<1x512xf32>
    %87 = tpu.concatenate %54, %58, %62, %66, %69, %73, %77, %81, %85, %86 in 0 : vector<8x512xf32>, vector<8x512xf32>, vector<8x512xf32>, vector<8x512xf32>, vector<8x512xf32>, vector<8x512xf32>, vector<8x512xf32>, vector<8x512xf32>, vector<8x512xf32>, vector<1x512xf32> -> vector<73x512xf32>
    %cst_23 = arith.constant dense<0.000000e+00> : vector<8x512xf32>
    %88 = tpu.matmul %50, %87, %cst_23 {dimension_numbers = #tpu.dot_dimension_numbers<[1], [0], [0], [1], [0, 0, 1, 1], [], []>} : vector<8x73xf32>, vector<73x512xf32>, vector<8x512xf32> -> vector<8x512xf32>
    %89 = arith.addf %88, %8 : vector<8x512xf32>
    %cst_24 = arith.constant 0.000000e+00 : f32
    %90 = vector.broadcast %cst_24 : f32 to vector<8x512xf32>
    %91 = arith.maximumf %89, %90 : vector<8x512xf32>
    %c24 = arith.constant 24 : index
    %c0_25 = arith.constant 0 : index
    %92 = vector.load %arg1[%c24, %c0_25] : memref<152x145xf32, #tpu.memory_space<vmem>>, vector<32x73xf32>
    %c15_i32_26 = arith.constant 15 : i32
    %93 = tpu.dynamic_rotate %91 by %c15_i32_26 dim 1 : vector<8x512xf32>, i32 -> vector<8x512xf32>
    %94 = vector.extract_strided_slice %0 {offsets = [0, 0], sizes = [1, 512], strides = [1, 1]} : vector<9x512xf32> to vector<1x512xf32>
    %95 = vector.broadcast %94 : vector<1x512xf32> to vector<8x512xf32>
    %96 = arith.mulf %93, %95 : vector<8x512xf32>
    %c14_i32_27 = arith.constant 14 : i32
    %97 = tpu.dynamic_rotate %91 by %c14_i32_27 dim 1 : vector<8x512xf32>, i32 -> vector<8x512xf32>
    %98 = vector.extract_strided_slice %0 {offsets = [1, 0], sizes = [1, 512], strides = [1, 1]} : vector<9x512xf32> to vector<1x512xf32>
    %99 = vector.broadcast %98 : vector<1x512xf32> to vector<8x512xf32>
    %100 = arith.mulf %97, %99 : vector<8x512xf32>
    %c13_i32_28 = arith.constant 13 : i32
    %101 = tpu.dynamic_rotate %91 by %c13_i32_28 dim 1 : vector<8x512xf32>, i32 -> vector<8x512xf32>
    %102 = vector.extract_strided_slice %0 {offsets = [2, 0], sizes = [1, 512], strides = [1, 1]} : vector<9x512xf32> to vector<1x512xf32>
    %103 = vector.broadcast %102 : vector<1x512xf32> to vector<8x512xf32>
    %104 = arith.mulf %101, %103 : vector<8x512xf32>
    %c1_i32_29 = arith.constant 1 : i32
    %105 = tpu.dynamic_rotate %91 by %c1_i32_29 dim 1 : vector<8x512xf32>, i32 -> vector<8x512xf32>
    %106 = vector.extract_strided_slice %0 {offsets = [3, 0], sizes = [1, 512], strides = [1, 1]} : vector<9x512xf32> to vector<1x512xf32>
    %107 = vector.broadcast %106 : vector<1x512xf32> to vector<8x512xf32>
    %108 = arith.mulf %105, %107 : vector<8x512xf32>
    %109 = vector.extract_strided_slice %0 {offsets = [4, 0], sizes = [1, 512], strides = [1, 1]} : vector<9x512xf32> to vector<1x512xf32>
    %110 = vector.broadcast %109 : vector<1x512xf32> to vector<8x512xf32>
    %111 = arith.mulf %91, %110 : vector<8x512xf32>
    %c511_i32_30 = arith.constant 511 : i32
    %112 = tpu.dynamic_rotate %91 by %c511_i32_30 dim 1 : vector<8x512xf32>, i32 -> vector<8x512xf32>
    %113 = vector.extract_strided_slice %0 {offsets = [5, 0], sizes = [1, 512], strides = [1, 1]} : vector<9x512xf32> to vector<1x512xf32>
    %114 = vector.broadcast %113 : vector<1x512xf32> to vector<8x512xf32>
    %115 = arith.mulf %112, %114 : vector<8x512xf32>
    %c499_i32_31 = arith.constant 499 : i32
    %116 = tpu.dynamic_rotate %91 by %c499_i32_31 dim 1 : vector<8x512xf32>, i32 -> vector<8x512xf32>
    %117 = vector.extract_strided_slice %0 {offsets = [6, 0], sizes = [1, 512], strides = [1, 1]} : vector<9x512xf32> to vector<1x512xf32>
    %118 = vector.broadcast %117 : vector<1x512xf32> to vector<8x512xf32>
    %119 = arith.mulf %116, %118 : vector<8x512xf32>
    %c498_i32_32 = arith.constant 498 : i32
    %120 = tpu.dynamic_rotate %91 by %c498_i32_32 dim 1 : vector<8x512xf32>, i32 -> vector<8x512xf32>
    %121 = vector.extract_strided_slice %0 {offsets = [7, 0], sizes = [1, 512], strides = [1, 1]} : vector<9x512xf32> to vector<1x512xf32>
    %122 = vector.broadcast %121 : vector<1x512xf32> to vector<8x512xf32>
    %123 = arith.mulf %120, %122 : vector<8x512xf32>
    %c497_i32_33 = arith.constant 497 : i32
    %124 = tpu.dynamic_rotate %91 by %c497_i32_33 dim 1 : vector<8x512xf32>, i32 -> vector<8x512xf32>
    %125 = vector.extract_strided_slice %0 {offsets = [8, 0], sizes = [1, 512], strides = [1, 1]} : vector<9x512xf32> to vector<1x512xf32>
    %126 = vector.broadcast %125 : vector<1x512xf32> to vector<8x512xf32>
    %127 = arith.mulf %124, %126 : vector<8x512xf32>
    %128 = vector.extract_strided_slice %0 {offsets = [4, 0], sizes = [1, 512], strides = [1, 1]} : vector<9x512xf32> to vector<1x512xf32>
    %129 = tpu.concatenate %96, %100, %104, %108, %111, %115, %119, %123, %127, %128 in 0 : vector<8x512xf32>, vector<8x512xf32>, vector<8x512xf32>, vector<8x512xf32>, vector<8x512xf32>, vector<8x512xf32>, vector<8x512xf32>, vector<8x512xf32>, vector<8x512xf32>, vector<1x512xf32> -> vector<73x512xf32>
    %cst_34 = arith.constant dense<0.000000e+00> : vector<32x512xf32>
    %130 = tpu.matmul %92, %129, %cst_34 {dimension_numbers = #tpu.dot_dimension_numbers<[1], [0], [0], [1], [0, 0, 1, 1], [], []>} : vector<32x73xf32>, vector<73x512xf32>, vector<32x512xf32> -> vector<32x512xf32>
    %cst_35 = arith.constant dense<0.000000e+00> : vector<32x128xf32>
    %131 = tpu.matmul %130, %3, %cst_35 {dimension_numbers = #tpu.dot_dimension_numbers<[1], [0], [0], [1], [0, 0, 1, 1], [], []>} : vector<32x512xf32>, vector<512x128xf32>, vector<32x128xf32> -> vector<32x128xf32>
    %132 = vector.extract_strided_slice %131 {offsets = [0, 0], sizes = [16, 128], strides = [1, 1]} : vector<32x128xf32> to vector<16x128xf32>
    %cst_36 = arith.constant 0.000000e+00 : f32
    %133 = vector.broadcast %cst_36 : f32 to vector<16x128xf32>
    %134 = arith.maximumf %132, %133 : vector<16x128xf32>
    %135 = vector.extract_strided_slice %131 {offsets = [16, 0], sizes = [16, 128], strides = [1, 1]} : vector<32x128xf32> to vector<16x128xf32>
    %c56 = arith.constant 56 : index
    %c0_37 = arith.constant 0 : index
    %136 = vector.load %arg1[%c56, %c0_37] : memref<152x145xf32, #tpu.memory_space<vmem>>, vector<16x145xf32>
    %c8_i32 = arith.constant 8 : i32
    %137 = tpu.dynamic_rotate %134 by %c8_i32 dim 1 : vector<16x128xf32>, i32 -> vector<16x128xf32>
    %138 = vector.extract_strided_slice %1 {offsets = [0, 0], sizes = [1, 128], strides = [1, 1]} : vector<9x128xf32> to vector<1x128xf32>
    %139 = vector.broadcast %138 : vector<1x128xf32> to vector<16x128xf32>
    %140 = arith.mulf %137, %139 : vector<16x128xf32>
    %c7_i32 = arith.constant 7 : i32
    %141 = tpu.dynamic_rotate %134 by %c7_i32 dim 1 : vector<16x128xf32>, i32 -> vector<16x128xf32>
    %142 = vector.extract_strided_slice %1 {offsets = [1, 0], sizes = [1, 128], strides = [1, 1]} : vector<9x128xf32> to vector<1x128xf32>
    %143 = vector.broadcast %142 : vector<1x128xf32> to vector<16x128xf32>
    %144 = arith.mulf %141, %143 : vector<16x128xf32>
    %c6_i32 = arith.constant 6 : i32
    %145 = tpu.dynamic_rotate %134 by %c6_i32 dim 1 : vector<16x128xf32>, i32 -> vector<16x128xf32>
    %146 = vector.extract_strided_slice %1 {offsets = [2, 0], sizes = [1, 128], strides = [1, 1]} : vector<9x128xf32> to vector<1x128xf32>
    %147 = vector.broadcast %146 : vector<1x128xf32> to vector<16x128xf32>
    %148 = arith.mulf %145, %147 : vector<16x128xf32>
    %c1_i32_38 = arith.constant 1 : i32
    %149 = tpu.dynamic_rotate %134 by %c1_i32_38 dim 1 : vector<16x128xf32>, i32 -> vector<16x128xf32>
    %150 = vector.extract_strided_slice %1 {offsets = [3, 0], sizes = [1, 128], strides = [1, 1]} : vector<9x128xf32> to vector<1x128xf32>
    %151 = vector.broadcast %150 : vector<1x128xf32> to vector<16x128xf32>
    %152 = arith.mulf %149, %151 : vector<16x128xf32>
    %153 = vector.extract_strided_slice %1 {offsets = [4, 0], sizes = [1, 128], strides = [1, 1]} : vector<9x128xf32> to vector<1x128xf32>
    %154 = vector.broadcast %153 : vector<1x128xf32> to vector<16x128xf32>
    %155 = arith.mulf %134, %154 : vector<16x128xf32>
    %c127_i32 = arith.constant 127 : i32
    %156 = tpu.dynamic_rotate %134 by %c127_i32 dim 1 : vector<16x128xf32>, i32 -> vector<16x128xf32>
    %157 = vector.extract_strided_slice %1 {offsets = [5, 0], sizes = [1, 128], strides = [1, 1]} : vector<9x128xf32> to vector<1x128xf32>
    %158 = vector.broadcast %157 : vector<1x128xf32> to vector<16x128xf32>
    %159 = arith.mulf %156, %158 : vector<16x128xf32>
    %c122_i32 = arith.constant 122 : i32
    %160 = tpu.dynamic_rotate %134 by %c122_i32 dim 1 : vector<16x128xf32>, i32 -> vector<16x128xf32>
    %161 = vector.extract_strided_slice %1 {offsets = [6, 0], sizes = [1, 128], strides = [1, 1]} : vector<9x128xf32> to vector<1x128xf32>
    %162 = vector.broadcast %161 : vector<1x128xf32> to vector<16x128xf32>
    %163 = arith.mulf %160, %162 : vector<16x128xf32>
    %c121_i32 = arith.constant 121 : i32
    %164 = tpu.dynamic_rotate %134 by %c121_i32 dim 1 : vector<16x128xf32>, i32 -> vector<16x128xf32>
    %165 = vector.extract_strided_slice %1 {offsets = [7, 0], sizes = [1, 128], strides = [1, 1]} : vector<9x128xf32> to vector<1x128xf32>
    %166 = vector.broadcast %165 : vector<1x128xf32> to vector<16x128xf32>
    %167 = arith.mulf %164, %166 : vector<16x128xf32>
    %c120_i32 = arith.constant 120 : i32
    %168 = tpu.dynamic_rotate %134 by %c120_i32 dim 1 : vector<16x128xf32>, i32 -> vector<16x128xf32>
    %169 = vector.extract_strided_slice %1 {offsets = [8, 0], sizes = [1, 128], strides = [1, 1]} : vector<9x128xf32> to vector<1x128xf32>
    %170 = vector.broadcast %169 : vector<1x128xf32> to vector<16x128xf32>
    %171 = arith.mulf %168, %170 : vector<16x128xf32>
    %172 = vector.extract_strided_slice %1 {offsets = [4, 0], sizes = [1, 128], strides = [1, 1]} : vector<9x128xf32> to vector<1x128xf32>
    %173 = tpu.concatenate %140, %144, %148, %152, %155, %159, %163, %167, %171, %172 in 0 : vector<16x128xf32>, vector<16x128xf32>, vector<16x128xf32>, vector<16x128xf32>, vector<16x128xf32>, vector<16x128xf32>, vector<16x128xf32>, vector<16x128xf32>, vector<16x128xf32>, vector<1x128xf32> -> vector<145x128xf32>
    %cst_39 = arith.constant dense<0.000000e+00> : vector<16x128xf32>
    %174 = tpu.matmul %136, %173, %cst_39 {dimension_numbers = #tpu.dot_dimension_numbers<[1], [0], [0], [1], [0, 0, 1, 1], [], []>} : vector<16x145xf32>, vector<145x128xf32>, vector<16x128xf32> -> vector<16x128xf32>
    %175 = arith.addf %174, %135 : vector<16x128xf32>
    %cst_40 = arith.constant 0.000000e+00 : f32
    %176 = vector.broadcast %cst_40 : f32 to vector<16x128xf32>
    %177 = arith.maximumf %175, %176 : vector<16x128xf32>
    %c72 = arith.constant 72 : index
    %c0_41 = arith.constant 0 : index
    %178 = vector.load %arg1[%c72, %c0_41] : memref<152x145xf32, #tpu.memory_space<vmem>>, vector<16x145xf32>
    %c8_i32_42 = arith.constant 8 : i32
    %179 = tpu.dynamic_rotate %177 by %c8_i32_42 dim 1 : vector<16x128xf32>, i32 -> vector<16x128xf32>
    %180 = vector.extract_strided_slice %1 {offsets = [0, 0], sizes = [1, 128], strides = [1, 1]} : vector<9x128xf32> to vector<1x128xf32>
    %181 = vector.broadcast %180 : vector<1x128xf32> to vector<16x128xf32>
    %182 = arith.mulf %179, %181 : vector<16x128xf32>
    %c7_i32_43 = arith.constant 7 : i32
    %183 = tpu.dynamic_rotate %177 by %c7_i32_43 dim 1 : vector<16x128xf32>, i32 -> vector<16x128xf32>
    %184 = vector.extract_strided_slice %1 {offsets = [1, 0], sizes = [1, 128], strides = [1, 1]} : vector<9x128xf32> to vector<1x128xf32>
    %185 = vector.broadcast %184 : vector<1x128xf32> to vector<16x128xf32>
    %186 = arith.mulf %183, %185 : vector<16x128xf32>
    %c6_i32_44 = arith.constant 6 : i32
    %187 = tpu.dynamic_rotate %177 by %c6_i32_44 dim 1 : vector<16x128xf32>, i32 -> vector<16x128xf32>
    %188 = vector.extract_strided_slice %1 {offsets = [2, 0], sizes = [1, 128], strides = [1, 1]} : vector<9x128xf32> to vector<1x128xf32>
    %189 = vector.broadcast %188 : vector<1x128xf32> to vector<16x128xf32>
    %190 = arith.mulf %187, %189 : vector<16x128xf32>
    %c1_i32_45 = arith.constant 1 : i32
    %191 = tpu.dynamic_rotate %177 by %c1_i32_45 dim 1 : vector<16x128xf32>, i32 -> vector<16x128xf32>
    %192 = vector.extract_strided_slice %1 {offsets = [3, 0], sizes = [1, 128], strides = [1, 1]} : vector<9x128xf32> to vector<1x128xf32>
    %193 = vector.broadcast %192 : vector<1x128xf32> to vector<16x128xf32>
    %194 = arith.mulf %191, %193 : vector<16x128xf32>
    %195 = vector.extract_strided_slice %1 {offsets = [4, 0], sizes = [1, 128], strides = [1, 1]} : vector<9x128xf32> to vector<1x128xf32>
    %196 = vector.broadcast %195 : vector<1x128xf32> to vector<16x128xf32>
    %197 = arith.mulf %177, %196 : vector<16x128xf32>
    %c127_i32_46 = arith.constant 127 : i32
    %198 = tpu.dynamic_rotate %177 by %c127_i32_46 dim 1 : vector<16x128xf32>, i32 -> vector<16x128xf32>
    %199 = vector.extract_strided_slice %1 {offsets = [5, 0], sizes = [1, 128], strides = [1, 1]} : vector<9x128xf32> to vector<1x128xf32>
    %200 = vector.broadcast %199 : vector<1x128xf32> to vector<16x128xf32>
    %201 = arith.mulf %198, %200 : vector<16x128xf32>
    %c122_i32_47 = arith.constant 122 : i32
    %202 = tpu.dynamic_rotate %177 by %c122_i32_47 dim 1 : vector<16x128xf32>, i32 -> vector<16x128xf32>
    %203 = vector.extract_strided_slice %1 {offsets = [6, 0], sizes = [1, 128], strides = [1, 1]} : vector<9x128xf32> to vector<1x128xf32>
    %204 = vector.broadcast %203 : vector<1x128xf32> to vector<16x128xf32>
    %205 = arith.mulf %202, %204 : vector<16x128xf32>
    %c121_i32_48 = arith.constant 121 : i32
    %206 = tpu.dynamic_rotate %177 by %c121_i32_48 dim 1 : vector<16x128xf32>, i32 -> vector<16x128xf32>
    %207 = vector.extract_strided_slice %1 {offsets = [7, 0], sizes = [1, 128], strides = [1, 1]} : vector<9x128xf32> to vector<1x128xf32>
    %208 = vector.broadcast %207 : vector<1x128xf32> to vector<16x128xf32>
    %209 = arith.mulf %206, %208 : vector<16x128xf32>
    %c120_i32_49 = arith.constant 120 : i32
    %210 = tpu.dynamic_rotate %177 by %c120_i32_49 dim 1 : vector<16x128xf32>, i32 -> vector<16x128xf32>
    %211 = vector.extract_strided_slice %1 {offsets = [8, 0], sizes = [1, 128], strides = [1, 1]} : vector<9x128xf32> to vector<1x128xf32>
    %212 = vector.broadcast %211 : vector<1x128xf32> to vector<16x128xf32>
    %213 = arith.mulf %210, %212 : vector<16x128xf32>
    %214 = vector.extract_strided_slice %1 {offsets = [4, 0], sizes = [1, 128], strides = [1, 1]} : vector<9x128xf32> to vector<1x128xf32>
    %215 = tpu.concatenate %182, %186, %190, %194, %197, %201, %205, %209, %213, %214 in 0 : vector<16x128xf32>, vector<16x128xf32>, vector<16x128xf32>, vector<16x128xf32>, vector<16x128xf32>, vector<16x128xf32>, vector<16x128xf32>, vector<16x128xf32>, vector<16x128xf32>, vector<1x128xf32> -> vector<145x128xf32>
    %cst_50 = arith.constant dense<0.000000e+00> : vector<16x128xf32>
    %216 = tpu.matmul %178, %215, %cst_50 {dimension_numbers = #tpu.dot_dimension_numbers<[1], [0], [0], [1], [0, 0, 1, 1], [], []>} : vector<16x145xf32>, vector<145x128xf32>, vector<16x128xf32> -> vector<16x128xf32>
    %cst_51 = arith.constant 0.000000e+00 : f32
    %217 = vector.broadcast %cst_51 : f32 to vector<16x128xf32>
    %218 = arith.maximumf %216, %217 : vector<16x128xf32>
    %c88 = arith.constant 88 : index
    %c0_52 = arith.constant 0 : index
    %219 = vector.load %arg1[%c88, %c0_52] : memref<152x145xf32, #tpu.memory_space<vmem>>, vector<16x145xf32>
    %c8_i32_53 = arith.constant 8 : i32
    %220 = tpu.dynamic_rotate %218 by %c8_i32_53 dim 1 : vector<16x128xf32>, i32 -> vector<16x128xf32>
    %221 = vector.extract_strided_slice %1 {offsets = [0, 0], sizes = [1, 128], strides = [1, 1]} : vector<9x128xf32> to vector<1x128xf32>
    %222 = vector.broadcast %221 : vector<1x128xf32> to vector<16x128xf32>
    %223 = arith.mulf %220, %222 : vector<16x128xf32>
    %c7_i32_54 = arith.constant 7 : i32
    %224 = tpu.dynamic_rotate %218 by %c7_i32_54 dim 1 : vector<16x128xf32>, i32 -> vector<16x128xf32>
    %225 = vector.extract_strided_slice %1 {offsets = [1, 0], sizes = [1, 128], strides = [1, 1]} : vector<9x128xf32> to vector<1x128xf32>
    %226 = vector.broadcast %225 : vector<1x128xf32> to vector<16x128xf32>
    %227 = arith.mulf %224, %226 : vector<16x128xf32>
    %c6_i32_55 = arith.constant 6 : i32
    %228 = tpu.dynamic_rotate %218 by %c6_i32_55 dim 1 : vector<16x128xf32>, i32 -> vector<16x128xf32>
    %229 = vector.extract_strided_slice %1 {offsets = [2, 0], sizes = [1, 128], strides = [1, 1]} : vector<9x128xf32> to vector<1x128xf32>
    %230 = vector.broadcast %229 : vector<1x128xf32> to vector<16x128xf32>
    %231 = arith.mulf %228, %230 : vector<16x128xf32>
    %c1_i32_56 = arith.constant 1 : i32
    %232 = tpu.dynamic_rotate %218 by %c1_i32_56 dim 1 : vector<16x128xf32>, i32 -> vector<16x128xf32>
    %233 = vector.extract_strided_slice %1 {offsets = [3, 0], sizes = [1, 128], strides = [1, 1]} : vector<9x128xf32> to vector<1x128xf32>
    %234 = vector.broadcast %233 : vector<1x128xf32> to vector<16x128xf32>
    %235 = arith.mulf %232, %234 : vector<16x128xf32>
    %236 = vector.extract_strided_slice %1 {offsets = [4, 0], sizes = [1, 128], strides = [1, 1]} : vector<9x128xf32> to vector<1x128xf32>
    %237 = vector.broadcast %236 : vector<1x128xf32> to vector<16x128xf32>
    %238 = arith.mulf %218, %237 : vector<16x128xf32>
    %c127_i32_57 = arith.constant 127 : i32
    %239 = tpu.dynamic_rotate %218 by %c127_i32_57 dim 1 : vector<16x128xf32>, i32 -> vector<16x128xf32>
    %240 = vector.extract_strided_slice %1 {offsets = [5, 0], sizes = [1, 128], strides = [1, 1]} : vector<9x128xf32> to vector<1x128xf32>
    %241 = vector.broadcast %240 : vector<1x128xf32> to vector<16x128xf32>
    %242 = arith.mulf %239, %241 : vector<16x128xf32>
    %c122_i32_58 = arith.constant 122 : i32
    %243 = tpu.dynamic_rotate %218 by %c122_i32_58 dim 1 : vector<16x128xf32>, i32 -> vector<16x128xf32>
    %244 = vector.extract_strided_slice %1 {offsets = [6, 0], sizes = [1, 128], strides = [1, 1]} : vector<9x128xf32> to vector<1x128xf32>
    %245 = vector.broadcast %244 : vector<1x128xf32> to vector<16x128xf32>
    %246 = arith.mulf %243, %245 : vector<16x128xf32>
    %c121_i32_59 = arith.constant 121 : i32
    %247 = tpu.dynamic_rotate %218 by %c121_i32_59 dim 1 : vector<16x128xf32>, i32 -> vector<16x128xf32>
    %248 = vector.extract_strided_slice %1 {offsets = [7, 0], sizes = [1, 128], strides = [1, 1]} : vector<9x128xf32> to vector<1x128xf32>
    %249 = vector.broadcast %248 : vector<1x128xf32> to vector<16x128xf32>
    %250 = arith.mulf %247, %249 : vector<16x128xf32>
    %c120_i32_60 = arith.constant 120 : i32
    %251 = tpu.dynamic_rotate %218 by %c120_i32_60 dim 1 : vector<16x128xf32>, i32 -> vector<16x128xf32>
    %252 = vector.extract_strided_slice %1 {offsets = [8, 0], sizes = [1, 128], strides = [1, 1]} : vector<9x128xf32> to vector<1x128xf32>
    %253 = vector.broadcast %252 : vector<1x128xf32> to vector<16x128xf32>
    %254 = arith.mulf %251, %253 : vector<16x128xf32>
    %255 = vector.extract_strided_slice %1 {offsets = [4, 0], sizes = [1, 128], strides = [1, 1]} : vector<9x128xf32> to vector<1x128xf32>
    %256 = tpu.concatenate %223, %227, %231, %235, %238, %242, %246, %250, %254, %255 in 0 : vector<16x128xf32>, vector<16x128xf32>, vector<16x128xf32>, vector<16x128xf32>, vector<16x128xf32>, vector<16x128xf32>, vector<16x128xf32>, vector<16x128xf32>, vector<16x128xf32>, vector<1x128xf32> -> vector<145x128xf32>
    %cst_61 = arith.constant dense<0.000000e+00> : vector<16x128xf32>
    %257 = tpu.matmul %219, %256, %cst_61 {dimension_numbers = #tpu.dot_dimension_numbers<[1], [0], [0], [1], [0, 0, 1, 1], [], []>} : vector<16x145xf32>, vector<145x128xf32>, vector<16x128xf32> -> vector<16x128xf32>
    %258 = arith.addf %257, %177 : vector<16x128xf32>
    %cst_62 = arith.constant 0.000000e+00 : f32
    %259 = vector.broadcast %cst_62 : f32 to vector<16x128xf32>
    %260 = arith.maximumf %258, %259 : vector<16x128xf32>
    %c104 = arith.constant 104 : index
    %c0_63 = arith.constant 0 : index
    %261 = vector.load %arg1[%c104, %c0_63] : memref<152x145xf32, #tpu.memory_space<vmem>>, vector<16x145xf32>
    %c8_i32_64 = arith.constant 8 : i32
    %262 = tpu.dynamic_rotate %260 by %c8_i32_64 dim 1 : vector<16x128xf32>, i32 -> vector<16x128xf32>
    %263 = vector.extract_strided_slice %1 {offsets = [0, 0], sizes = [1, 128], strides = [1, 1]} : vector<9x128xf32> to vector<1x128xf32>
    %264 = vector.broadcast %263 : vector<1x128xf32> to vector<16x128xf32>
    %265 = arith.mulf %262, %264 : vector<16x128xf32>
    %c7_i32_65 = arith.constant 7 : i32
    %266 = tpu.dynamic_rotate %260 by %c7_i32_65 dim 1 : vector<16x128xf32>, i32 -> vector<16x128xf32>
    %267 = vector.extract_strided_slice %1 {offsets = [1, 0], sizes = [1, 128], strides = [1, 1]} : vector<9x128xf32> to vector<1x128xf32>
    %268 = vector.broadcast %267 : vector<1x128xf32> to vector<16x128xf32>
    %269 = arith.mulf %266, %268 : vector<16x128xf32>
    %c6_i32_66 = arith.constant 6 : i32
    %270 = tpu.dynamic_rotate %260 by %c6_i32_66 dim 1 : vector<16x128xf32>, i32 -> vector<16x128xf32>
    %271 = vector.extract_strided_slice %1 {offsets = [2, 0], sizes = [1, 128], strides = [1, 1]} : vector<9x128xf32> to vector<1x128xf32>
    %272 = vector.broadcast %271 : vector<1x128xf32> to vector<16x128xf32>
    %273 = arith.mulf %270, %272 : vector<16x128xf32>
    %c1_i32_67 = arith.constant 1 : i32
    %274 = tpu.dynamic_rotate %260 by %c1_i32_67 dim 1 : vector<16x128xf32>, i32 -> vector<16x128xf32>
    %275 = vector.extract_strided_slice %1 {offsets = [3, 0], sizes = [1, 128], strides = [1, 1]} : vector<9x128xf32> to vector<1x128xf32>
    %276 = vector.broadcast %275 : vector<1x128xf32> to vector<16x128xf32>
    %277 = arith.mulf %274, %276 : vector<16x128xf32>
    %278 = vector.extract_strided_slice %1 {offsets = [4, 0], sizes = [1, 128], strides = [1, 1]} : vector<9x128xf32> to vector<1x128xf32>
    %279 = vector.broadcast %278 : vector<1x128xf32> to vector<16x128xf32>
    %280 = arith.mulf %260, %279 : vector<16x128xf32>
    %c127_i32_68 = arith.constant 127 : i32
    %281 = tpu.dynamic_rotate %260 by %c127_i32_68 dim 1 : vector<16x128xf32>, i32 -> vector<16x128xf32>
    %282 = vector.extract_strided_slice %1 {offsets = [5, 0], sizes = [1, 128], strides = [1, 1]} : vector<9x128xf32> to vector<1x128xf32>
    %283 = vector.broadcast %282 : vector<1x128xf32> to vector<16x128xf32>
    %284 = arith.mulf %281, %283 : vector<16x128xf32>
    %c122_i32_69 = arith.constant 122 : i32
    %285 = tpu.dynamic_rotate %260 by %c122_i32_69 dim 1 : vector<16x128xf32>, i32 -> vector<16x128xf32>
    %286 = vector.extract_strided_slice %1 {offsets = [6, 0], sizes = [1, 128], strides = [1, 1]} : vector<9x128xf32> to vector<1x128xf32>
    %287 = vector.broadcast %286 : vector<1x128xf32> to vector<16x128xf32>
    %288 = arith.mulf %285, %287 : vector<16x128xf32>
    %c121_i32_70 = arith.constant 121 : i32
    %289 = tpu.dynamic_rotate %260 by %c121_i32_70 dim 1 : vector<16x128xf32>, i32 -> vector<16x128xf32>
    %290 = vector.extract_strided_slice %1 {offsets = [7, 0], sizes = [1, 128], strides = [1, 1]} : vector<9x128xf32> to vector<1x128xf32>
    %291 = vector.broadcast %290 : vector<1x128xf32> to vector<16x128xf32>
    %292 = arith.mulf %289, %291 : vector<16x128xf32>
    %c120_i32_71 = arith.constant 120 : i32
    %293 = tpu.dynamic_rotate %260 by %c120_i32_71 dim 1 : vector<16x128xf32>, i32 -> vector<16x128xf32>
    %294 = vector.extract_strided_slice %1 {offsets = [8, 0], sizes = [1, 128], strides = [1, 1]} : vector<9x128xf32> to vector<1x128xf32>
    %295 = vector.broadcast %294 : vector<1x128xf32> to vector<16x128xf32>
    %296 = arith.mulf %293, %295 : vector<16x128xf32>
    %297 = vector.extract_strided_slice %1 {offsets = [4, 0], sizes = [1, 128], strides = [1, 1]} : vector<9x128xf32> to vector<1x128xf32>
    %298 = tpu.concatenate %265, %269, %273, %277, %280, %284, %288, %292, %296, %297 in 0 : vector<16x128xf32>, vector<16x128xf32>, vector<16x128xf32>, vector<16x128xf32>, vector<16x128xf32>, vector<16x128xf32>, vector<16x128xf32>, vector<16x128xf32>, vector<16x128xf32>, vector<1x128xf32> -> vector<145x128xf32>
    %cst_72 = arith.constant dense<0.000000e+00> : vector<16x128xf32>
    %299 = tpu.matmul %261, %298, %cst_72 {dimension_numbers = #tpu.dot_dimension_numbers<[1], [0], [0], [1], [0, 0, 1, 1], [], []>} : vector<16x145xf32>, vector<145x128xf32>, vector<16x128xf32> -> vector<16x128xf32>
    %300 = vector.extract_strided_slice %299 {offsets = [0, 0], sizes = [8, 128], strides = [1, 1]} : vector<16x128xf32> to vector<8x128xf32>
    %cst_73 = arith.constant 0.000000e+00 : f32
    %301 = vector.broadcast %cst_73 : f32 to vector<8x128xf32>
    %302 = arith.maximumf %300, %301 : vector<8x128xf32>
    %303 = vector.extract_strided_slice %299 {offsets = [8, 0], sizes = [8, 128], strides = [1, 1]} : vector<16x128xf32> to vector<8x128xf32>
    %c120 = arith.constant 120 : index
    %c0_74 = arith.constant 0 : index
    %304 = vector.load %arg1[%c120, %c0_74] : memref<152x145xf32, #tpu.memory_space<vmem>>, vector<8x73xf32>
    %c8_i32_75 = arith.constant 8 : i32
    %305 = tpu.dynamic_rotate %302 by %c8_i32_75 dim 1 : vector<8x128xf32>, i32 -> vector<8x128xf32>
    %306 = vector.extract_strided_slice %1 {offsets = [0, 0], sizes = [1, 128], strides = [1, 1]} : vector<9x128xf32> to vector<1x128xf32>
    %307 = vector.broadcast %306 : vector<1x128xf32> to vector<8x128xf32>
    %308 = arith.mulf %305, %307 : vector<8x128xf32>
    %c7_i32_76 = arith.constant 7 : i32
    %309 = tpu.dynamic_rotate %302 by %c7_i32_76 dim 1 : vector<8x128xf32>, i32 -> vector<8x128xf32>
    %310 = vector.extract_strided_slice %1 {offsets = [1, 0], sizes = [1, 128], strides = [1, 1]} : vector<9x128xf32> to vector<1x128xf32>
    %311 = vector.broadcast %310 : vector<1x128xf32> to vector<8x128xf32>
    %312 = arith.mulf %309, %311 : vector<8x128xf32>
    %c6_i32_77 = arith.constant 6 : i32
    %313 = tpu.dynamic_rotate %302 by %c6_i32_77 dim 1 : vector<8x128xf32>, i32 -> vector<8x128xf32>
    %314 = vector.extract_strided_slice %1 {offsets = [2, 0], sizes = [1, 128], strides = [1, 1]} : vector<9x128xf32> to vector<1x128xf32>
    %315 = vector.broadcast %314 : vector<1x128xf32> to vector<8x128xf32>
    %316 = arith.mulf %313, %315 : vector<8x128xf32>
    %c1_i32_78 = arith.constant 1 : i32
    %317 = tpu.dynamic_rotate %302 by %c1_i32_78 dim 1 : vector<8x128xf32>, i32 -> vector<8x128xf32>
    %318 = vector.extract_strided_slice %1 {offsets = [3, 0], sizes = [1, 128], strides = [1, 1]} : vector<9x128xf32> to vector<1x128xf32>
    %319 = vector.broadcast %318 : vector<1x128xf32> to vector<8x128xf32>
    %320 = arith.mulf %317, %319 : vector<8x128xf32>
    %321 = vector.extract_strided_slice %1 {offsets = [4, 0], sizes = [1, 128], strides = [1, 1]} : vector<9x128xf32> to vector<1x128xf32>
    %322 = vector.broadcast %321 : vector<1x128xf32> to vector<8x128xf32>
    %323 = arith.mulf %302, %322 : vector<8x128xf32>
    %c127_i32_79 = arith.constant 127 : i32
    %324 = tpu.dynamic_rotate %302 by %c127_i32_79 dim 1 : vector<8x128xf32>, i32 -> vector<8x128xf32>
    %325 = vector.extract_strided_slice %1 {offsets = [5, 0], sizes = [1, 128], strides = [1, 1]} : vector<9x128xf32> to vector<1x128xf32>
    %326 = vector.broadcast %325 : vector<1x128xf32> to vector<8x128xf32>
    %327 = arith.mulf %324, %326 : vector<8x128xf32>
    %c122_i32_80 = arith.constant 122 : i32
    %328 = tpu.dynamic_rotate %302 by %c122_i32_80 dim 1 : vector<8x128xf32>, i32 -> vector<8x128xf32>
    %329 = vector.extract_strided_slice %1 {offsets = [6, 0], sizes = [1, 128], strides = [1, 1]} : vector<9x128xf32> to vector<1x128xf32>
    %330 = vector.broadcast %329 : vector<1x128xf32> to vector<8x128xf32>
    %331 = arith.mulf %328, %330 : vector<8x128xf32>
    %c121_i32_81 = arith.constant 121 : i32
    %332 = tpu.dynamic_rotate %302 by %c121_i32_81 dim 1 : vector<8x128xf32>, i32 -> vector<8x128xf32>
    %333 = vector.extract_strided_slice %1 {offsets = [7, 0], sizes = [1, 128], strides = [1, 1]} : vector<9x128xf32> to vector<1x128xf32>
    %334 = vector.broadcast %333 : vector<1x128xf32> to vector<8x128xf32>
    %335 = arith.mulf %332, %334 : vector<8x128xf32>
    %c120_i32_82 = arith.constant 120 : i32
    %336 = tpu.dynamic_rotate %302 by %c120_i32_82 dim 1 : vector<8x128xf32>, i32 -> vector<8x128xf32>
    %337 = vector.extract_strided_slice %1 {offsets = [8, 0], sizes = [1, 128], strides = [1, 1]} : vector<9x128xf32> to vector<1x128xf32>
    %338 = vector.broadcast %337 : vector<1x128xf32> to vector<8x128xf32>
    %339 = arith.mulf %336, %338 : vector<8x128xf32>
    %340 = vector.extract_strided_slice %1 {offsets = [4, 0], sizes = [1, 128], strides = [1, 1]} : vector<9x128xf32> to vector<1x128xf32>
    %341 = tpu.concatenate %308, %312, %316, %320, %323, %327, %331, %335, %339, %340 in 0 : vector<8x128xf32>, vector<8x128xf32>, vector<8x128xf32>, vector<8x128xf32>, vector<8x128xf32>, vector<8x128xf32>, vector<8x128xf32>, vector<8x128xf32>, vector<8x128xf32>, vector<1x128xf32> -> vector<73x128xf32>
    %cst_83 = arith.constant dense<0.000000e+00> : vector<8x128xf32>
    %342 = tpu.matmul %304, %341, %cst_83 {dimension_numbers = #tpu.dot_dimension_numbers<[1], [0], [0], [1], [0, 0, 1, 1], [], []>} : vector<8x73xf32>, vector<73x128xf32>, vector<8x128xf32> -> vector<8x128xf32>
    %343 = arith.addf %342, %303 : vector<8x128xf32>
    %cst_84 = arith.constant 0.000000e+00 : f32
    %344 = vector.broadcast %cst_84 : f32 to vector<8x128xf32>
    %345 = arith.maximumf %343, %344 : vector<8x128xf32>
    %cst_85 = arith.constant dense<0.000000e+00> : vector<8x2xf32>
    %346 = tpu.matmul %345, %2, %cst_85 {dimension_numbers = #tpu.dot_dimension_numbers<[1], [1], [0], [0], [0, 0, 1, 0], [], []>} : vector<8x128xf32>, vector<2x128xf32>, vector<8x2xf32> -> vector<8x2xf32>
    %c128 = arith.constant 128 : index
    %c0_86 = arith.constant 0 : index
    %347 = vector.load %arg1[%c128, %c0_86] : memref<152x145xf32, #tpu.memory_space<vmem>>, vector<4x9xf32>
    %c132 = arith.constant 132 : index
    %c0_87 = arith.constant 0 : index
    %348 = vector.load %arg1[%c132, %c0_87] : memref<152x145xf32, #tpu.memory_space<vmem>>, vector<8x5xf32>
    %349 = vector.extract_strided_slice %347 {offsets = [0, 0], sizes = [4, 8], strides = [1, 1]} : vector<4x9xf32> to vector<4x8xf32>
    %cst_88 = arith.constant dense<0.000000e+00> : vector<4x2xf32>
    %350 = tpu.matmul %349, %346, %cst_88 {dimension_numbers = #tpu.dot_dimension_numbers<[1], [0], [0], [1], [0, 0, 1, 1], [], []>} : vector<4x8xf32>, vector<8x2xf32>, vector<4x2xf32> -> vector<4x2xf32>
    %351 = vector.extract_strided_slice %347 {offsets = [0, 8], sizes = [4, 1], strides = [1, 1]} : vector<4x9xf32> to vector<4x1xf32>
    %352 = vector.broadcast %351 : vector<4x1xf32> to vector<4x2xf32>
    %353 = arith.addf %350, %352 : vector<4x2xf32>
    %cst_89 = arith.constant 0.000000e+00 : f32
    %354 = vector.broadcast %cst_89 : f32 to vector<4x2xf32>
    %355 = arith.maximumf %353, %354 : vector<4x2xf32>
    %356 = vector.extract_strided_slice %348 {offsets = [0, 0], sizes = [8, 4], strides = [1, 1]} : vector<8x5xf32> to vector<8x4xf32>
    %cst_90 = arith.constant dense<0.000000e+00> : vector<8x2xf32>
    %357 = tpu.matmul %356, %355, %cst_90 {dimension_numbers = #tpu.dot_dimension_numbers<[1], [0], [0], [1], [0, 0, 1, 1], [], []>} : vector<8x4xf32>, vector<4x2xf32>, vector<8x2xf32> -> vector<8x2xf32>
    %358 = vector.extract_strided_slice %348 {offsets = [0, 4], sizes = [8, 1], strides = [1, 1]} : vector<8x5xf32> to vector<8x1xf32>
    %359 = vector.broadcast %358 : vector<8x1xf32> to vector<8x2xf32>
    %360 = arith.addf %357, %359 : vector<8x2xf32>
    %361 = arith.negf %360 : vector<8x2xf32>
    %362 = math.exp %361 : vector<8x2xf32>
    %cst_91 = arith.constant 1.000000e+00 : f32
    %363 = vector.broadcast %cst_91 : f32 to vector<8x2xf32>
    %364 = arith.addf %363, %362 : vector<8x2xf32>
    %365 = arith.divf %363, %364 : vector<8x2xf32>
    %cst_92 = arith.constant dense<0.000000e+00> : vector<8x128xf32>
    %366 = tpu.matmul %365, %2, %cst_92 {dimension_numbers = #tpu.dot_dimension_numbers<[1], [0], [0], [1], [0, 0, 1, 1], [], []>} : vector<8x2xf32>, vector<2x128xf32>, vector<8x128xf32> -> vector<8x128xf32>
    %367 = arith.mulf %345, %366 : vector<8x128xf32>
    %c0_93 = arith.constant 0 : index
    %c0_94 = arith.constant 0 : index
    %c0_95 = arith.constant 0 : index
    %368 = vector.load %arg5[%c0_93, %c0_94, %c0_95] : memref<8x32x128xf32, #tpu.memory_space<vmem>>, vector<1x32x128xf32>
    %369 = vector.shape_cast %368 : vector<1x32x128xf32> to vector<32x128xf32>
    %370 = vector.extract_strided_slice %367 {offsets = [0, 0], sizes = [1, 128], strides = [1, 1]} : vector<8x128xf32> to vector<1x128xf32>
    %371 = vector.broadcast %370 : vector<1x128xf32> to vector<32x128xf32>
    %372 = arith.mulf %369, %371 : vector<32x128xf32>
    %c1 = arith.constant 1 : index
    %c0_96 = arith.constant 0 : index
    %c0_97 = arith.constant 0 : index
    %373 = vector.load %arg5[%c1, %c0_96, %c0_97] : memref<8x32x128xf32, #tpu.memory_space<vmem>>, vector<1x32x128xf32>
    %374 = vector.shape_cast %373 : vector<1x32x128xf32> to vector<32x128xf32>
    %375 = vector.extract_strided_slice %367 {offsets = [1, 0], sizes = [1, 128], strides = [1, 1]} : vector<8x128xf32> to vector<1x128xf32>
    %376 = vector.broadcast %375 : vector<1x128xf32> to vector<32x128xf32>
    %377 = arith.mulf %374, %376 : vector<32x128xf32>
    %378 = arith.addf %372, %377 : vector<32x128xf32>
    %c2 = arith.constant 2 : index
    %c0_98 = arith.constant 0 : index
    %c0_99 = arith.constant 0 : index
    %379 = vector.load %arg5[%c2, %c0_98, %c0_99] : memref<8x32x128xf32, #tpu.memory_space<vmem>>, vector<1x32x128xf32>
    %380 = vector.shape_cast %379 : vector<1x32x128xf32> to vector<32x128xf32>
    %381 = vector.extract_strided_slice %367 {offsets = [2, 0], sizes = [1, 128], strides = [1, 1]} : vector<8x128xf32> to vector<1x128xf32>
    %382 = vector.broadcast %381 : vector<1x128xf32> to vector<32x128xf32>
    %383 = arith.mulf %380, %382 : vector<32x128xf32>
    %384 = arith.addf %378, %383 : vector<32x128xf32>
    %c3 = arith.constant 3 : index
    %c0_100 = arith.constant 0 : index
    %c0_101 = arith.constant 0 : index
    %385 = vector.load %arg5[%c3, %c0_100, %c0_101] : memref<8x32x128xf32, #tpu.memory_space<vmem>>, vector<1x32x128xf32>
    %386 = vector.shape_cast %385 : vector<1x32x128xf32> to vector<32x128xf32>
    %387 = vector.extract_strided_slice %367 {offsets = [3, 0], sizes = [1, 128], strides = [1, 1]} : vector<8x128xf32> to vector<1x128xf32>
    %388 = vector.broadcast %387 : vector<1x128xf32> to vector<32x128xf32>
    %389 = arith.mulf %386, %388 : vector<32x128xf32>
    %390 = arith.addf %384, %389 : vector<32x128xf32>
    %c4 = arith.constant 4 : index
    %c0_102 = arith.constant 0 : index
    %c0_103 = arith.constant 0 : index
    %391 = vector.load %arg5[%c4, %c0_102, %c0_103] : memref<8x32x128xf32, #tpu.memory_space<vmem>>, vector<1x32x128xf32>
    %392 = vector.shape_cast %391 : vector<1x32x128xf32> to vector<32x128xf32>
    %393 = vector.extract_strided_slice %367 {offsets = [4, 0], sizes = [1, 128], strides = [1, 1]} : vector<8x128xf32> to vector<1x128xf32>
    %394 = vector.broadcast %393 : vector<1x128xf32> to vector<32x128xf32>
    %395 = arith.mulf %392, %394 : vector<32x128xf32>
    %396 = arith.addf %390, %395 : vector<32x128xf32>
    %c5 = arith.constant 5 : index
    %c0_104 = arith.constant 0 : index
    %c0_105 = arith.constant 0 : index
    %397 = vector.load %arg5[%c5, %c0_104, %c0_105] : memref<8x32x128xf32, #tpu.memory_space<vmem>>, vector<1x32x128xf32>
    %398 = vector.shape_cast %397 : vector<1x32x128xf32> to vector<32x128xf32>
    %399 = vector.extract_strided_slice %367 {offsets = [5, 0], sizes = [1, 128], strides = [1, 1]} : vector<8x128xf32> to vector<1x128xf32>
    %400 = vector.broadcast %399 : vector<1x128xf32> to vector<32x128xf32>
    %401 = arith.mulf %398, %400 : vector<32x128xf32>
    %402 = arith.addf %396, %401 : vector<32x128xf32>
    %c6 = arith.constant 6 : index
    %c0_106 = arith.constant 0 : index
    %c0_107 = arith.constant 0 : index
    %403 = vector.load %arg5[%c6, %c0_106, %c0_107] : memref<8x32x128xf32, #tpu.memory_space<vmem>>, vector<1x32x128xf32>
    %404 = vector.shape_cast %403 : vector<1x32x128xf32> to vector<32x128xf32>
    %405 = vector.extract_strided_slice %367 {offsets = [6, 0], sizes = [1, 128], strides = [1, 1]} : vector<8x128xf32> to vector<1x128xf32>
    %406 = vector.broadcast %405 : vector<1x128xf32> to vector<32x128xf32>
    %407 = arith.mulf %404, %406 : vector<32x128xf32>
    %408 = arith.addf %402, %407 : vector<32x128xf32>
    %c7 = arith.constant 7 : index
    %c0_108 = arith.constant 0 : index
    %c0_109 = arith.constant 0 : index
    %409 = vector.load %arg5[%c7, %c0_108, %c0_109] : memref<8x32x128xf32, #tpu.memory_space<vmem>>, vector<1x32x128xf32>
    %410 = vector.shape_cast %409 : vector<1x32x128xf32> to vector<32x128xf32>
    %411 = vector.extract_strided_slice %367 {offsets = [7, 0], sizes = [1, 128], strides = [1, 1]} : vector<8x128xf32> to vector<1x128xf32>
    %412 = vector.broadcast %411 : vector<1x128xf32> to vector<32x128xf32>
    %413 = arith.mulf %410, %412 : vector<32x128xf32>
    %414 = arith.addf %408, %413 : vector<32x128xf32>
    %cst_110 = arith.constant dense<0.000000e+00> : vector<2x32xf32>
    %415 = tpu.matmul %2, %414, %cst_110 {dimension_numbers = #tpu.dot_dimension_numbers<[1], [1], [0], [0], [0, 0, 1, 0], [], []>} : vector<2x128xf32>, vector<32x128xf32>, vector<2x32xf32> -> vector<2x32xf32>
    %c140 = arith.constant 140 : index
    %c0_111 = arith.constant 0 : index
    %416 = vector.load %arg1[%c140, %c0_111] : memref<152x145xf32, #tpu.memory_space<vmem>>, vector<1x32xf32>
    %417 = vector.broadcast %416 : vector<1x32xf32> to vector<2x32xf32>
    %418 = arith.addf %415, %417 : vector<2x32xf32>
    %cst_112 = arith.constant 0.000000e+00 : f32
    %419 = vector.broadcast %cst_112 : f32 to vector<2x32xf32>
    %420 = arith.maximumf %418, %419 : vector<2x32xf32>
    %c141 = arith.constant 141 : index
    %c0_113 = arith.constant 0 : index
    %421 = vector.load %arg1[%c141, %c0_113] : memref<152x145xf32, #tpu.memory_space<vmem>>, vector<10x32xf32>
    %cst_114 = arith.constant dense<0.000000e+00> : vector<2x10xf32>
    %422 = tpu.matmul %420, %421, %cst_114 {dimension_numbers = #tpu.dot_dimension_numbers<[1], [1], [0], [0], [0, 0, 1, 0], [], []>} : vector<2x32xf32>, vector<10x32xf32>, vector<2x10xf32> -> vector<2x10xf32>
    %c151 = arith.constant 151 : index
    %c0_115 = arith.constant 0 : index
    %423 = vector.load %arg1[%c151, %c0_115] : memref<152x145xf32, #tpu.memory_space<vmem>>, vector<1x10xf32>
    %424 = vector.broadcast %423 : vector<1x10xf32> to vector<2x10xf32>
    %425 = arith.addf %422, %424 : vector<2x10xf32>
    %c0_116 = arith.constant 0 : index
    %c0_117 = arith.constant 0 : index
    %426 = vector.load %arg6[%c0_116, %c0_117] : memref<2x10xf32, #tpu.memory_space<vmem>>, vector<2x10xf32>
    tpu.vector_store %arg6[%c0_116, %c0_117], %425 {strides = array<i32>} : memref<2x10xf32, #tpu.memory_space<vmem>>, vector<2x10xf32>,
    return
  }
}

</mosaic_0001>

<bundles_post_ra>
// kernel: forward.1
= control target key start
LH: loop header
LB: loop body
LE: loop exit
PB: predicated region body
PF: predicated region fallthrough
CT: control target
= control target key end

     0   :  { %vm112_vm0 = vcmask 1041408   ;;  %vm3485_vm1 = vmmov 1   ;;  %v5277_v7 = vmov 0.0   ;;  %vm108_vm3 = vcmask 80896   ;;  %s5270_s0 = inlined_call_operand.vmem [shape: f32[10,512], index: 0, kind: input, shape index: {}]   ;;  %s5271_s1 = inlined_call_operand.vmem [shape: f32[152,145], index: 1, kind: input, shape index: {}]   ;;  %s5272_s2 = inlined_call_operand.vmem [shape: f32[9,512], index: 2, kind: input, shape index: {}]   ;;  %s5273_s3 = inlined_call_operand.vmem [shape: f32[11,128], index: 3, kind: input, shape index: {}]   ;;  %s5274_s4 = inlined_call_operand.vmem [shape: f32[512,128], index: 4, kind: input, shape index: {}]   ;;  %s5275_s5 = inlined_call_operand.vmem [shape: f32[8,32,128], index: 5, kind: input, shape index: {}]   ;;  %s5276_s6 = inlined_call_operand.hbm [shape: f32[2,10], index: 6, kind: output, shape index: {}]  }
   0x1   :  { %v101_v0 = vld [vmem:[%s5270_s0 + $0x8] sm:$0xff]  ;;  %vm3549_vm2 = vmpackc.low %vm112_vm0, %vm3485_vm1  ;;  %v100_v4 = vld [vmem:[%s5270_s0] sm:$0xff]  ;;  %189 = vmatprep.mubr.f32.mxu1 %v5277_v7  ;;  %643 = vmatprep.mubr.f32.mxu0 %v5277_v7 }
   0x2   :  { %v105_v1 = vld [vmem:[%s5270_s0 + $0x28] sm:$0x3]  ;;  %v104_v5 = vld [vmem:[%s5270_s0 + $0x20] sm:$0x3]  ;;  %v103_v8 = vld [vmem:[%s5270_s0 + $0x18] sm:$0xff] }
   0x3   :  { %v3089_v2 = vpack.c.bf16 %v105_v1, %v101_v0  ;;  %v3092_v6 = vpack.c.bf16 %v104_v5, %v100_v4  ;;  %v107_v9 = vld [vmem:[%s5270_s0 + $0x38] sm:$0x3]  ;;  %v102_v10 = vld [vmem:[%s5270_s0 + $0x10] sm:$0xff]  ;;  %v99_v12 = vld [vmem:[%s5271_s1] sm:$0xff] }
   0x4   :  { %v106_v11 = vld [vmem:[%s5270_s0 + $0x30] sm:$0x3]  ;;  %v3095_v13 = vpack.c.bf16 %v107_v9, %v103_v8 }
   0x5   :  { %3091 = vmatprep.subr.msk.bf16.mxu1 %vm3549_vm2, %v3089_v2  ;;  %v3098_v14 = vpack.c.bf16 %v106_v11, %v102_v10 }
   0x6   :  { %3094 = vmatpush1.bf16.msk.msra.mxu1 %vm3549_vm2, %v3092_v6 }
   0x7   :  { %11 = vsyncpa [#allocation3], 0  ;;  %3097 = vmatprep.subr.msk.bf16.mxu1 %vm3549_vm2, %v3095_v13  ;;  %s3487_s0 = smov 15   ;;  %s3488_s15 = smov 14   ;;  %v280_v33 = vlaneseq  ;;  %v3698_v43 = vld [vmem:[%s5272_s2 + $0x8] sm:$0xff]  ;;  %v3703_v44 = vld [vmem:[%s5272_s2] sm:$0xff] }
   0x8   :  { %s3489_s16 = smov 13   ;;  %s3490_s17 = smov 1   ;;  %v3717_v49 = vld [vmem:[%s5272_s2 + $0x10] sm:$0xff]  ;;  %v3722_v50 = vld [vmem:[%s5272_s2 + $0x18] sm:$0xff]  ;;  %vm570_vm12 = vcmask 1040384   ;;  %vm566_vm14 = vcmask 596992  }
   0x9   :  { %2829 = vmatmul.mubr.msk.f32.vlgmr.msra.gmra.mrb[0].mxu1 %vm108_vm3, %v99_v12  ;;  %s3491_s18 = smov 127   ;;  %s3492_s19 = smov 115   ;;  %v3678_v36 = vshrl.u32 %v280_v33, 7  ;;  %v3680_v37 = vand.u32 127, %v280_v33  ;;  %vm4039_vm13 = vmpackc.low %vm570_vm12, %vm3485_vm1  ;;  %vm1597_vm15 = vcmask 138240   ;;  %vm3502_vm1 = vmmov 0  }
   0xa   :  { %3100 = vmatpush1.bf16.msk.msra.mxu1 %vm3549_vm2, %v3098_v14  ;;  %260 = vmatprep.mubr.f32.mxu1 %v5277_v7  ;;  %s3493_s20 = smov 114   ;;  %s3494_s21 = smov 113   ;;  %vm2271_vm2 = vcmask 64512  }
   0xb   :  { %v3687_v40 = vsub.s32 0, %v3678_v36  ;;  %v3690_v41 = vsub.s32 1, %v3678_v36  ;;  %v3693_v42 = vsub.s32 4, %v3678_v36  ;;  %vm315_vm4 = vcmp.lt.s32.totalorder %v3680_v37, 14  ;;  %s3496_s11 = smov 8   ;;  %s3497_s12 = smov 7  }
   0xc   :  { %v3709_v46 = vsub.s32 2, %v3678_v36  ;;  %v3712_v47 = vsub.s32 3, %v3678_v36  ;;  %vm282_vm5 = vcmp.lt.s32.totalorder %v3680_v37, 15  ;;  %vm348_vm6 = vcmp.lt.s32.totalorder %v3680_v37, 13  ;;  %s3498_s13 = smov 6   ;;  %s3500_s14 = smov 121  }
   0xd   :  { %2832 = vmatmul.mubr.msk.f32.vlgmr.msra.gmra.mrb[2].mxu1 %vm108_vm3, %v99_v12  ;;  %5336 = vst [vmem:[#allocation9_spill] sm:$0xff] %v3687_v40  ;;  %5337 = vst [vmem:[#allocation10_spill] sm:$0xff] %v3690_v41  ;;  %v3727_v51 = vrot.slane %v3698_v43, %v3687_v40  ;;  %v3731_v52 = vrot.slane %v3698_v43, %v3690_v41  ;;  %v3738_v54 = vrot.slane %v3698_v43, %v3693_v42  ;;  %s3501_s22 = smov 120   ;;  %vm2353_vm3 = vcmask 1043456   ;;  %s3505_s29 = smov [#allocation2]  }
   0xe   :  { %714 = vmatprep.mubr.f32.mxu1 %v5277_v7  ;;  %5338 = vst [vmem:[#allocation11_spill] sm:$0xff] %v3693_v42  ;;  %5339 = vst [vmem:[#allocation12_spill] sm:$0xff] %v3709_v46  ;;  %v3742_v55 = vrot.slane %v3703_v44, %v3693_v42  ;;  %vm381_vm7 = vcmp.lt.s32.totalorder %v3680_v37, 1  ;;  %v3748_v57 = vrot.slane %v3717_v49, %v3693_v42  ;;  %v3763_v61 = vsub.s32 5, %v3678_v36  ;;  %s2819_s30 = sshll.u32 %s3505_s29, 4  ;;  %s2820_s30 = int_to_ptr.vmem [resolvable:$true] %s2819_s30 }
   0xf   :  { %5340 = vst [vmem:[#allocation13_spill] sm:$0xff] %v3712_v47  ;;  %5341 = vst [vmem:[#allocation14_spill] sm:$0xff] %v3727_v51  ;;  %v3752_v58 = vrot.slane %v3722_v50, %v3693_v42  ;;  %v3756_v59 = vrot.slane %v3698_v43, %v3709_v46  ;;  %v3760_v60 = vrot.slane %v3698_v43, %v3712_v47  ;;  %vm434_vm8 = vcmp.lt.s32.totalorder %v3680_v37, 127  ;;  %s3461_s7 = scalar_lea.vmem %s2820_s30, 32  ;;  %p3466_p1 = scmp.lt.s32.totalorder %s2820_s30, %s2820_s30 }
  0x10   :  { %5342 = vst [vmem:[#allocation15_spill] sm:$0xff] %v3731_v52  ;;  %5344 = vst [vmem:[#allocation17_spill] sm:$0xff] %v3763_v61  ;;  %v3769_v0 = vrot.slane %v3722_v50, %v3687_v40  ;;  %v3773_v1 = vrot.slane %v3717_v49, %v3690_v41  ;;  %v3783_v5 = vrot.slane %v3722_v50, %v3690_v41  ;;  %vm500_vm9 = vcmp.lt.s32.totalorder %v3680_v37, 114  ;;  %p3462_p0 = scmp.ne.s32.totalorder %s2820_s30, %s3461_s7  ;;  %p3467_p2 = scmp.lt.s32.totalorder %s3461_s7, %s3461_s7 }
  0x11   :  { %5343 = vst [vmem:[#allocation16_spill] sm:$0xff] %v3760_v60  ;;  %v3787_v6 = vrot.slane %v3703_v44, %v3687_v40  ;;  %v3791_v8 = vrot.slane %v3703_v44, %v3690_v41  ;;  %v3795_v9 = vrot.slane %v3717_v49, %v3687_v40  ;;  %v3905_v41 = vsub.s32 7, %v3678_v36 }
  0x12   :  { %5345 = vst [vmem:[#allocation18_spill] sm:$0xff] %v3773_v1  ;;  %vm467_vm10 = vcmp.lt.s32.totalorder %v3680_v37, 115  ;;  %vm533_vm11 = vcmp.lt.s32.totalorder %v3680_v37, 113  ;;  %p3468_p3 = por %p3467_p2, %p3466_p1 }
  0x13   :  { %5347 = vst [vmem:[#allocation20_spill] sm:$0xff] %v3905_v41 }
  0x14   :  { %p3469_p4 = pnand %p3468_p3, %p3462_p0 }
  0xdc   :  { %v191_v15 = vpop.f32.mrb[0].mxu1 }
  0xdd   :  { %v3586_v16 = vmax.f32 %v191_v15, 0.0  ;;  %v193_v17 = vpop.f32.mrb[1].mxu1 }
  0xde   :  { %v3588_v18 = vmax.f32 %v193_v17, 0.0 }
  0xdf   :  { %5332 = vst [vmem:[#allocation5_spill] sm:$0xff] %v3586_v16  ;;  %272 = vrot.lane.b32.xlu0 %v3586_v16, %s3487_s0 }
  0xe0   :  { %5333 = vst [vmem:[#allocation6_spill] sm:$0xff] %v3588_v18  ;;  %309 = vrot.lane.b32.xlu1 %v3588_v18, %s3488_s15  ;;  %v262_v19 = vpop.f32.mrb[2].mxu1 }
  0xe1   :  { %v264_v20 = vpop.f32.mrb[3].mxu1  ;;  %v3618_v21 = vmax.f32 %v262_v19, 0.0 }
  0xe2   :  { %v3624_v22 = vmax.f32 %v264_v20, 0.0  ;;  %v3811_v20 = vmul.f32 %v3742_v55, %v3586_v16 }
  0xe3   :  { %307 = vrot.lane.b32.xlu0 %v3586_v16, %s3488_s15  ;;  %5334 = vst [vmem:[#allocation7_spill] sm:$0xff] %v3618_v21 }
  0xe4   :  { %342 = vrot.lane.b32.xlu1 %v3588_v18, %s3489_s16  ;;  %5335 = vst [vmem:[#allocation8_spill] sm:$0xff] %v3624_v22  ;;  %v425_v40 = vmul.f32 %v3752_v58, %v3624_v22 }
  0xe7   :  { %340 = vrot.lane.b32.xlu0 %v3586_v16, %s3489_s16 }
  0xe8   :  { %375 = vrot.lane.b32.xlu1 %v3588_v18, %s3490_s17 }
  0xeb   :  { %373 = vrot.lane.b32.xlu0 %v3586_v16, %s3490_s17 }
  0xec   :  { %428 = vrot.lane.b32.xlu1 %v3588_v18, %s3491_s18 }
  0xef   :  { %426 = vrot.lane.b32.xlu0 %v3586_v16, %s3491_s18 }
  0xf0   :  { %461 = vrot.lane.b32.xlu1 %v3588_v18, %s3492_s19 }
  0xf3   :  { %459 = vrot.lane.b32.xlu0 %v3586_v16, %s3492_s19 }
  0xf4   :  { %494 = vrot.lane.b32.xlu1 %v3588_v18, %s3493_s20 }
  0xf7   :  { %492 = vrot.lane.b32.xlu0 %v3586_v16, %s3493_s20 }
  0xf8   :  { %527 = vrot.lane.b32.xlu1 %v3588_v18, %s3494_s21 }
  0xfb   :  { %525 = vrot.lane.b32.xlu0 %v3586_v16, %s3494_s21 }
  0xfc   :  { %276 = vrot.lane.b32.xlu1 %v3618_v21, %s3487_s0 }
  0xff   :  { %274 = vrot.lane.b32.xlu0 %v3588_v18, %s3487_s0 }
 0x100   :  { %278 = vrot.lane.b32.xlu1 %v3624_v22, %s3487_s0 }
 0x103   :  { %311 = vrot.lane.b32.xlu0 %v3618_v21, %s3488_s15 }
 0x104   :  { %313 = vrot.lane.b32.xlu1 %v3624_v22, %s3488_s15 }
 0x107   :  { %344 = vrot.lane.b32.xlu0 %v3618_v21, %s3489_s16 }
 0x108   :  { %346 = vrot.lane.b32.xlu1 %v3624_v22, %s3489_s16 }
 0x10b   :  { %377 = vrot.lane.b32.xlu0 %v3618_v21, %s3490_s17 }
 0x10c   :  { %379 = vrot.lane.b32.xlu1 %v3624_v22, %s3490_s17 }
 0x10f   :  { %430 = vrot.lane.b32.xlu0 %v3618_v21, %s3491_s18 }
 0x110   :  { %432 = vrot.lane.b32.xlu1 %v3624_v22, %s3491_s18 }
 0x113   :  { %463 = vrot.lane.b32.xlu0 %v3618_v21, %s3492_s19 }
 0x114   :  { %465 = vrot.lane.b32.xlu1 %v3624_v22, %s3492_s19 }
 0x117   :  { %496 = vrot.lane.b32.xlu0 %v3618_v21, %s3493_s20 }
 0x118   :  { %498 = vrot.lane.b32.xlu1 %v3624_v22, %s3493_s20 }
 0x11b   :  { %529 = vrot.lane.b32.xlu0 %v3618_v21, %s3494_s21 }
 0x11c   :  { %531 = vrot.lane.b32.xlu1 %v3624_v22, %s3494_s21 }
 0x151   :  { %v273_v23 = vpop.permute.xlu0 %272 }
 0x152   :  { %v310_v24 = vpop.permute.xlu1 %309 }
 0x155   :  { %v3658_v25 = vpop.permute.xlu0 %307 }
 0x156   :  { %v3660_v26 = vpop.permute.xlu1 %342  ;;  %v318_v53 = vsel %vm315_vm4, %v3658_v25, %v310_v24 }
 0x157   :  { %v337_v3 = vmul.f32 %v3731_v52, %v318_v53 }
 0x159   :  { %v3662_v27 = vpop.permute.xlu0 %340 }
 0x15a   :  { %v3664_v28 = vpop.permute.xlu1 %375  ;;  %v351_v14 = vsel %vm348_vm6, %v3662_v27, %v3660_v26 }
 0x15d   :  { %v3666_v29 = vpop.permute.xlu0 %373 }
 0x15e   :  { %v3668_v30 = vpop.permute.xlu1 %428  ;;  %v384_v4 = vsel %vm381_vm7, %v3666_v29, %v3664_v28 }
 0x161   :  { %v3670_v31 = vpop.permute.xlu0 %426 }
 0x162   :  { %v3672_v32 = vpop.permute.xlu1 %461 }
 0x165   :  { %v3674_v34 = vpop.permute.xlu0 %459 }
 0x166   :  { %v3676_v35 = vpop.permute.xlu1 %494 }
 0x169   :  { %v3682_v38 = vpop.permute.xlu0 %492 }
 0x16a   :  { %v3684_v39 = vpop.permute.xlu1 %527 }
 0x16d   :  { %v3705_v45 = vpop.permute.xlu0 %525 }
 0x16e   :  { %v277_v48 = vpop.permute.xlu1 %276 }
 0x171   :  { %v275_v56 = vpop.permute.xlu0 %274 }
 0x172   :  { %v279_v62 = vpop.permute.xlu1 %278  ;;  %v285_v63 = vsel %vm282_vm5, %v273_v23, %v275_v56  ;;  %v284_v15 = vsel %vm282_vm5, %v275_v56, %v277_v48 }
 0x173   :  { %v304_v2 = vmul.f32 %v3727_v51, %v285_v63  ;;  %v283_v10 = vsel %vm282_vm5, %v277_v48, %v279_v62  ;;  %v286_v11 = vsel %vm282_vm5, %v279_v62, %v273_v23  ;;  %v403_v23 = vmul.f32 %v3760_v60, %v384_v4 }
 0x174   :  { %v306_v48 = vmul.f32 %v3769_v0, %v283_v10  ;;  %v303_v56 = vmul.f32 %v3787_v6, %v286_v11  ;;  %v305_v4 = vmul.f32 %v3795_v9, %v284_v15  ;;  %v3836_v10 = vrot.slane %v3717_v49, %v3709_v46 }
 0x175   :  { %v312_v12 = vpop.permute.xlu0 %311  ;;  %v3101_v13 = vpack.c.bf16 %v337_v3, %v304_v2  ;;  %v370_v2 = vmul.f32 %v3756_v59, %v351_v14  ;;  %v3827_v3 = vrot.slane %v3703_v44, %v3763_v61  ;;  %v3840_v14 = vmul.f32 %v3748_v57, %v3618_v21 }
 0x176   :  { %v317_v17 = vsel %vm315_vm4, %v310_v24, %v312_v12  ;;  %v314_v19 = vpop.permute.xlu1 %313  ;;  %v3844_v15 = vrot.slane %v3703_v44, %v3709_v46 }
 0x177   :  { %v338_v33 = vmul.f32 %v3773_v1, %v317_v17  ;;  %v316_v53 = vsel %vm315_vm4, %v312_v12, %v314_v19  ;;  %v319_v62 = vsel %vm315_vm4, %v314_v19, %v3658_v25  ;;  %3102 = vmatprep.subr.bf16.mxu0 %v3101_v13  ;;  %v3832_v25 = vmul.f32 %v3738_v54, %v3588_v18 }
 0x178   :  { %v339_v24 = vmul.f32 %v3783_v5, %v316_v53  ;;  %v336_v63 = vmul.f32 %v3791_v8, %v319_v62  ;;  %v3848_v53 = vrot.slane %v3717_v49, %v3712_v47  ;;  %v3105_v62 = vpack.c.bf16 %v403_v23, %v370_v2 }
 0x179   :  { %v345_v12 = vpop.permute.xlu0 %344  ;;  %v3125_v19 = vpack.c.bf16 %v338_v33, %v305_v4  ;;  %v3857_v33 = vrot.slane %v3703_v44, %v3712_v47  ;;  %v3873_v4 = vrot.slane %v3698_v43, %v3763_v61 }
 0x17a   :  { %v347_v11 = vpop.permute.xlu1 %346  ;;  %v3103_v13 = vpack.c.bf16 %v336_v63, %v303_v56  ;;  %v3123_v17 = vpack.c.bf16 %v339_v24, %v306_v48  ;;  %v3853_v56 = vrot.slane %v3722_v50, %v3709_v46  ;;  %v3861_v48 = vrot.slane %v3722_v50, %v3712_v47 }
 0x17b   :  { %v3864_v24 = vsub.s32 6, %v3678_v36  ;;  %v349_v23 = vsel %vm348_vm6, %v345_v12, %v347_v11  ;;  %v352_v63 = vsel %vm348_vm6, %v347_v11, %v3662_v27  ;;  %v3883_v47 = vrot.slane %v3717_v49, %v3763_v61 }
 0x17c   :  { %3104 = vmatpush1.bf16.msra.mxu0 %v3103_v13  ;;  %3124 = vmatprep.subr.bf16.mxu1 %v3123_v17  ;;  %v350_v13 = vsel %vm348_vm6, %v3660_v26, %v345_v12  ;;  %v3887_v27 = vrot.slane %v3722_v50, %v3763_v61  ;;  %v437_v11 = vsel %vm434_vm8, %v3670_v31, %v3668_v30 }
 0x17d   :  { %5346 = vst [vmem:[#allocation19_spill] sm:$0xff] %v3864_v24  ;;  %v378_v2 = vpop.permute.xlu0 %377  ;;  %3106 = vmatprep.subr.bf16.mxu0 %v3105_v62  ;;  %3126 = vmatpush1.bf16.msra.mxu1 %v3125_v19  ;;  %v369_v19 = vmul.f32 %v3844_v15, %v352_v63  ;;  %v372_v62 = vmul.f32 %v3853_v56, %v349_v23 }
 0x17e   :  { %v383_v17 = vsel %vm381_vm7, %v3664_v28, %v378_v2  ;;  %v380_v7 = vpop.permute.xlu1 %379 }
 0x17f   :  { %v404_v26 = vmul.f32 %v3848_v53, %v383_v17  ;;  %v382_v12 = vsel %vm381_vm7, %v378_v2, %v380_v7  ;;  %v385_v28 = vsel %vm381_vm7, %v380_v7, %v3666_v29  ;;  %v371_v17 = vmul.f32 %v3836_v10, %v350_v13 }
 0x180   :  { %v402_v61 = vmul.f32 %v3857_v33, %v385_v28  ;;  %v405_v46 = vmul.f32 %v3861_v48, %v382_v12  ;;  %v455_v7 = vmul.f32 %v3827_v3, %v437_v11  ;;  %v3923_v11 = vrot.slane %v3703_v44, %v3864_v24 }
 0x181   :  { %v431_v2 = vpop.permute.xlu0 %430  ;;  %v3129_v28 = vpack.c.bf16 %v404_v26, %v371_v17 }
 0x182   :  { %v436_v29 = vsel %vm434_vm8, %v3668_v30, %v431_v2  ;;  %v433_v23 = vpop.permute.xlu1 %432  ;;  %v3107_v63 = vpack.c.bf16 %v402_v61, %v369_v19  ;;  %v3127_v12 = vpack.c.bf16 %v405_v46, %v372_v62  ;;  %v3929_v61 = vrot.slane %v3703_v44, %v3905_v41 }
 0x183   :  { %v456_v42 = vmul.f32 %v3873_v4, %v436_v29  ;;  %v435_v36 = vsel %vm434_vm8, %v431_v2, %v433_v23  ;;  %v438_v13 = vsel %vm434_vm8, %v433_v23, %v3670_v31  ;;  %v3934_v31 = vrot.slane %v3698_v43, %v3864_v24 }
 0x184   :  { %v457_v30 = vmul.f32 %v3883_v47, %v435_v36  ;;  %v458_v46 = vmul.f32 %v3887_v27, %v438_v13  ;;  %3108 = vmatpush1.bf16.msra.mxu0 %v3107_v63  ;;  %3128 = vmatprep.subr.bf16.mxu1 %v3127_v12  ;;  %v503_v62 = vsel %vm500_vm9, %v3682_v38, %v3676_v35 }
 0x185   :  { %v464_v26 = vpop.permute.xlu0 %463  ;;  %3130 = vmatpush1.bf16.msra.mxu1 %v3129_v28  ;;  %v3109_v19 = vpack.c.bf16 %v456_v42, %v3832_v25  ;;  %v3111_v29 = vpack.c.bf16 %v455_v7, %v3811_v20  ;;  %v470_v63 = vsel %vm467_vm10, %v3674_v34, %v3672_v32  ;;  %v3949_v12 = vrot.slane %v3717_v49, %v3864_v24 }
 0x186   :  { %v3133_v17 = vpack.c.bf16 %v457_v30, %v3840_v14  ;;  %v466_v2 = vpop.permute.xlu1 %465  ;;  %v3131_v23 = vpack.c.bf16 %v458_v46, %v425_v40  ;;  %v3953_v42 = vrot.slane %v3722_v50, %v3864_v24  ;;  %v3957_v25 = vrot.slane %v3698_v43, %v3905_v41 }
 0x187   :  { %3110 = vmatprep.subr.bf16.mxu0 %v3109_v19  ;;  %v469_v40 = vsel %vm467_vm10, %v3672_v32, %v464_v26  ;;  %v3964_v20 = vrot.slane %v3717_v49, %v3905_v41  ;;  %v3968_v14 = vrot.slane %v3722_v50, %v3905_v41  ;;  %v521_v7 = vmul.f32 %v3929_v61, %v503_v62 }
 0x188   :  { %5348 = vst [vmem:[#allocation21_spill] sm:$0xff] %v3953_v42  ;;  %3112 = vmatpush1.bf16.msra.mxu0 %v3111_v29  ;;  %3132 = vmatprep.subr.bf16.mxu1 %v3131_v23  ;;  %v3972_v28 = vrot.slane %v3703_v44, 4  ;;  %v468_v36 = vsel %vm467_vm10, %v464_v26, %v466_v2  ;;  %v471_v32 = vsel %vm467_vm10, %v466_v2, %v3674_v34  ;;  %v3988_v26 = vrot.slane %v3698_v43, 4  ;;  %v3993_v34 = vld [vmem:[%s5272_s2 + $0x20] ss:$0 sm:$0xff] }
 0x189   :  { %5349 = vst [vmem:[#allocation22_spill] sm:$0xff] %v3964_v20  ;;  %5350 = vst [vmem:[#allocation23_spill] sm:$0xff] %v3968_v14  ;;  %v497_v13 = vpop.permute.xlu0 %496  ;;  %3134 = vmatpush1.bf16.msra.mxu1 %v3133_v17  ;;  %v488_v30 = vmul.f32 %v3923_v11, %v470_v63  ;;  %v536_v46 = vsel %vm533_vm11, %v3705_v45, %v3684_v39  ;;  %v489_v62 = vmul.f32 %v3934_v31, %v469_v40  ;;  %v4009_v40 = vld [vmem:[%s5272_s2 + $0x28] ss:$0 sm:$0xff] }
 0x18a   :  { %5351 = vst [vmem:[#allocation24_spill] sm:$0xff] %v3972_v28  ;;  %v502_v44 = vsel %vm500_vm9, %v3676_v35, %v497_v13  ;;  %v499_v19 = vpop.permute.xlu1 %498  ;;  %5352 = vst [vmem:[#allocation25_spill] sm:$0xff] %v3988_v26  ;;  %v490_v29 = vmul.f32 %v3949_v12, %v468_v36  ;;  %v491_v43 = vmul.f32 %v3953_v42, %v471_v32  ;;  %v4022_v36 = vrot.slane %v3717_v49, 4 }
 0x18b   :  { %5353 = vst [vmem:[#allocation26_spill] sm:$0xff] %v3993_v34  ;;  %v522_v17 = vmul.f32 %v3957_v25, %v502_v44  ;;  %v501_v2 = vsel %vm500_vm9, %v497_v13, %v499_v19  ;;  %v504_v35 = vsel %vm500_vm9, %v499_v19, %v3682_v38  ;;  %5354 = vst [vmem:[#allocation27_spill] sm:$0xff] %v4009_v40  ;;  %v4014_v13 = vld [vmem:[%s5272_s2 + $0x30] ss:$0 sm:$0xff]  ;;  %v4019_v38 = vld [vmem:[%s5272_s2 + $0x38] ss:$0 sm:$0xff] }
 0x18c   :  { %v523_v23 = vmul.f32 %v3964_v20, %v501_v2  ;;  %v524_v63 = vmul.f32 %v3968_v14, %v504_v35  ;;  %5355 = vst [vmem:[#allocation28_spill] sm:$0xff] %v4014_v13  ;;  %5356 = vst [vmem:[#allocation29_spill] sm:$0xff] %v4019_v38  ;;  %v4025_v32 = vrot.slane %v3722_v50, 4  ;;  %v3115_v2 = vpack.c.bf16 %v521_v7, %v488_v30  ;;  %s3499_s2 = smov 122  }
 0x18d   :  { %v530_v44 = vpop.permute.xlu0 %529  ;;  %5357 = vst [vmem:[#allocation30_spill] sm:$0xff] %v4022_v36  ;;  %v3113_v19 = vpack.c.bf16 %v522_v17, %v489_v62  ;;  %v554_v35 = vmul.f32 %v3993_v34, %v536_v46  ;;  %v5359_v7 = vmov 0 }
 0x18e   :  { %5358 = vst [vmem:[#allocation31_spill] sm:$0xff] %v4025_v32  ;;  %v3137_v41 = vpack.c.bf16 %v523_v23, %v490_v29  ;;  %v535_v24 = vsel %vm533_vm11, %v3684_v39, %v530_v44  ;;  %v532_v22 = vpop.permute.xlu1 %531  ;;  %v3135_v21 = vpack.c.bf16 %v524_v63, %v491_v43  ;;  %v5360_v7 = vsel %vm4039_vm13, 4294967295, %v5359_v7 }
 0x18f   :  { %v555_v18 = vmul.f32 %v4009_v40, %v535_v24  ;;  %v534_v49 = vsel %vm533_vm11, %v530_v44, %v532_v22  ;;  %v537_v50 = vsel %vm533_vm11, %v532_v22, %v3705_v45  ;;  %3114 = vmatprep.subr.bf16.mxu0 %v3113_v19  ;;  %5361 = vst [vmem:[#allocation32_spill] sm:$0xff] %v5360_v7 }
 0x190   :  { %v556_v39 = vmul.f32 %v4014_v13, %v534_v49  ;;  %v557_v30 = vmul.f32 %v4019_v38, %v537_v50  ;;  %3116 = vmatpush1.bf16.msra.mxu0 %v3115_v2  ;;  %3136 = vmatprep.subr.bf16.mxu1 %v3135_v21  ;;  %v3120_v46 = vpack.c.bf16 %v3972_v28, %v554_v35  ;;  %v5362_v21 = vmov 0.0  }
 0x191   :  { %v3117_v24 = vpack.c.bf16 %v3988_v26, %v555_v18  ;;  %3138 = vmatpush1.bf16.msra.mxu1 %v3137_v41  ;;  %v271_v18 = vld [vmem:[%s5271_s1 + $0x10] sm:$0xff] }
 0x192   :  { %v3139_v22 = vpack.c.bf16 %v4025_v32, %v557_v30  ;;  %v3142_v45 = vpack.c.bf16 %v4022_v36, %v556_v39 }
 0x193   :  { %3119 = vmatprep.subr.msk.bf16.mxu0 %vm4039_vm13, %v3117_v24 }
 0x194   :  { %3122 = vmatpush1.bf16.msk.msra.mxu0 %vm4039_vm13, %v3120_v46  ;;  %3141 = vmatprep.subr.msk.bf16.mxu1 %vm4039_vm13, %v3139_v22 }
 0x195   :  { %3144 = vmatpush1.bf16.msk.msra.mxu1 %vm4039_vm13, %v3142_v45 }
 0x197   :  { %2839 = vmatmul.mubr.msk.f32.vlgmr.msra.gmra.mrb[0].mxu0 %vm566_vm14, %v271_v18 }
 0x198   :  { %2842 = vmatmul.mubr.msk.f32.vlgmr.msra.gmra.mrb[4].mxu1 %vm566_vm14, %v271_v18  ;;  %925 = vmatprep.mubr.f32.mxu0 %v5362_v21 }
 0x199   :  { %996 = vmatprep.mubr.f32.mxu1 %v5362_v21 }
 0x26a   :  { %v645_v41 = vpop.f32.mrb[0].mxu0 }
 0x26b   :  { %v4064_v62 = vmax.f32 %v645_v41, 0.0  ;;  %v647_v17 = vpop.f32.mrb[1].mxu0  ;;  %v716_v29 = vpop.f32.mrb[4].mxu1 }
 0x26c   :  { %v4066_v43 = vmax.f32 %v647_v17, 0.0  ;;  %v718_v23 = vpop.f32.mrb[5].mxu1  ;;  %v4096_v63 = vmax.f32 %v716_v29, 0.0 }
 0x26d   :  { %726 = vrot.lane.b32.xlu0 %v4064_v62, %s3487_s0  ;;  %v4100_v44 = vmax.f32 %v718_v23, 0.0 }
 0x26e   :  { %728 = vrot.lane.b32.xlu1 %v4066_v43, %s3487_s0 }
 0x271   :  { %742 = vrot.lane.b32.xlu0 %v4064_v62, %s3488_s15 }
 0x272   :  { %744 = vrot.lane.b32.xlu1 %v4066_v43, %s3488_s15 }
 0x275   :  { %758 = vrot.lane.b32.xlu0 %v4064_v62, %s3489_s16 }
 0x276   :  { %760 = vrot.lane.b32.xlu1 %v4066_v43, %s3489_s16 }
 0x279   :  { %774 = vrot.lane.b32.xlu0 %v4064_v62, %s3490_s17 }
 0x27a   :  { %776 = vrot.lane.b32.xlu1 %v4066_v43, %s3490_s17 }
 0x27d   :  { %794 = vrot.lane.b32.xlu0 %v4064_v62, %s3491_s18 }
 0x27e   :  { %796 = vrot.lane.b32.xlu1 %v4066_v43, %s3491_s18 }
 0x281   :  { %810 = vrot.lane.b32.xlu0 %v4064_v62, %s3492_s19 }
 0x282   :  { %812 = vrot.lane.b32.xlu1 %v4066_v43, %s3492_s19 }
 0x285   :  { %826 = vrot.lane.b32.xlu0 %v4064_v62, %s3493_s20 }
 0x286   :  { %828 = vrot.lane.b32.xlu1 %v4066_v43, %s3493_s20 }
 0x289   :  { %842 = vrot.lane.b32.xlu0 %v4064_v62, %s3494_s21 }
 0x28a   :  { %844 = vrot.lane.b32.xlu1 %v4066_v43, %s3494_s21 }
 0x28d   :  { %730 = vrot.lane.b32.xlu0 %v4096_v63, %s3487_s0 }
 0x28e   :  { %732 = vrot.lane.b32.xlu1 %v4100_v44, %s3487_s0 }
 0x291   :  { %746 = vrot.lane.b32.xlu0 %v4096_v63, %s3488_s15 }
 0x292   :  { %748 = vrot.lane.b32.xlu1 %v4100_v44, %s3488_s15 }
 0x295   :  { %762 = vrot.lane.b32.xlu0 %v4096_v63, %s3489_s16 }
 0x296   :  { %764 = vrot.lane.b32.xlu1 %v4100_v44, %s3489_s16 }
 0x299   :  { %778 = vrot.lane.b32.xlu0 %v4096_v63, %s3490_s17 }
 0x29a   :  { %780 = vrot.lane.b32.xlu1 %v4100_v44, %s3490_s17 }
 0x29d   :  { %798 = vrot.lane.b32.xlu0 %v4096_v63, %s3491_s18 }
 0x29e   :  { %800 = vrot.lane.b32.xlu1 %v4100_v44, %s3491_s18 }
 0x2a1   :  { %814 = vrot.lane.b32.xlu0 %v4096_v63, %s3492_s19 }
 0x2a2   :  { %816 = vrot.lane.b32.xlu1 %v4100_v44, %s3492_s19 }
 0x2a5   :  { %830 = vrot.lane.b32.xlu0 %v4096_v63, %s3493_s20 }
 0x2a6   :  { %832 = vrot.lane.b32.xlu1 %v4100_v44, %s3493_s20 }
 0x2a9   :  { %846 = vrot.lane.b32.xlu0 %v4096_v63, %s3494_s21 }
 0x2aa   :  { %848 = vrot.lane.b32.xlu1 %v4100_v44, %s3494_s21 }
 0x2df   :  { %v727_v19 = vpop.permute.xlu0 %726 }
 0x2e0   :  { %v729_v2 = vpop.permute.xlu1 %728 }
 0x2e1   :  { %v736_v35 = vsel %vm282_vm5, %v727_v19, %v729_v2 }
 0x2e2   :  { %v739_v30 = vmul.f32 %v736_v35, %v3727_v51 }
 0x2e3   :  { %v743_v49 = vpop.permute.xlu0 %742 }
 0x2e4   :  { %v745_v50 = vpop.permute.xlu1 %744 }
 0x2e5   :  { %v752_v39 = vsel %vm315_vm4, %v743_v49, %v745_v50 }
 0x2e6   :  { %v755_v24 = vmul.f32 %v752_v39, %v3731_v52 }
 0x2e7   :  { %v759_v46 = vpop.permute.xlu0 %758 }
 0x2e8   :  { %v761_v22 = vpop.permute.xlu1 %760  ;;  %v3145_v45 = vpack.c.bf16 %v755_v24, %v739_v30 }
 0x2e9   :  { %v768_v32 = vsel %vm348_vm6, %v759_v46, %v761_v22 }
 0x2ea   :  { %3146 = vmatprep.subr.bf16.mxu0 %v3145_v45 }
 0x2eb   :  { %v775_v18 = vpop.permute.xlu0 %774 }
 0x2ec   :  { %v777_v41 = vpop.permute.xlu1 %776 }
 0x2ed   :  { %v784_v24 = vsel %vm381_vm7, %v775_v18, %v777_v41 }
 0x2ee   :  { %v787_v13 = vmul.f32 %v784_v24, %v3760_v60 }
 0x2ef   :  { %v4142_v17 = vpop.permute.xlu0 %794 }
 0x2f0   :  { %v797_v29 = vpop.permute.xlu1 %796 }
 0x2f3   :  { %v4144_v23 = vpop.permute.xlu0 %810 }
 0x2f4   :  { %v4146_v16 = vpop.permute.xlu1 %812 }
 0x2f7   :  { %v4148_v21 = vpop.permute.xlu0 %826 }
 0x2f8   :  { %v4150_v7 = vpop.permute.xlu1 %828 }
 0x2fb   :  { %v4152_v35 = vpop.permute.xlu0 %842 }
 0x2fc   :  { %v4154_v39 = vpop.permute.xlu1 %844 }
 0x2ff   :  { %v731_v52 = vpop.permute.xlu0 %730 }
 0x300   :  { %v733_v30 = vpop.permute.xlu1 %732  ;;  %v735_v28 = vsel %vm282_vm5, %v729_v2, %v731_v52 }
 0x301   :  { %v734_v45 = vsel %vm282_vm5, %v731_v52, %v733_v30  ;;  %v737_v51 = vsel %vm282_vm5, %v733_v30, %v727_v19  ;;  %v740_v24 = vmul.f32 %v735_v28, %v3795_v9 }
 0x302   :  { %v738_v30 = vmul.f32 %v737_v51, %v3787_v6  ;;  %v741_v14 = vmul.f32 %v734_v45, %v3769_v0 }
 0x303   :  { %v747_v36 = vpop.permute.xlu0 %746 }
 0x304   :  { %v751_v26 = vsel %vm315_vm4, %v745_v50, %v747_v36  ;;  %v749_v38 = vpop.permute.xlu1 %748  ;;  %v771_v50 = vmul.f32 %v768_v32, %v3756_v59 }
 0x305   :  { %v756_v40 = vmul.f32 %v751_v26, %v3773_v1  ;;  %v750_v34 = vsel %vm315_vm4, %v747_v36, %v749_v38  ;;  %v753_v19 = vsel %vm315_vm4, %v749_v38, %v743_v49 }
 0x306   :  { %v754_v52 = vmul.f32 %v753_v19, %v3791_v8  ;;  %v757_v2 = vmul.f32 %v750_v34, %v3783_v5  ;;  %v3149_v42 = vpack.c.bf16 %v787_v13, %v771_v50  ;;  %v792_v19 = vmul.f32 %v4096_v63, %v3748_v57 }
 0x307   :  { %v763_v60 = vpop.permute.xlu0 %762  ;;  %v3169_v36 = vpack.c.bf16 %v756_v40, %v740_v24 }
 0x308   :  { %v3147_v26 = vpack.c.bf16 %v754_v52, %v738_v30  ;;  %v765_v1 = vpop.permute.xlu1 %764  ;;  %v3167_v20 = vpack.c.bf16 %v757_v2, %v741_v14  ;;  %v767_v28 = vsel %vm348_vm6, %v761_v22, %v763_v60  ;;  %v790_v22 = vmul.f32 %v4064_v62, %v3742_v55 }
 0x309   :  { %v766_v51 = vsel %vm348_vm6, %v763_v60, %v765_v1  ;;  %v769_v38 = vsel %vm348_vm6, %v765_v1, %v759_v46 }
 0x30a   :  { %3148 = vmatpush1.bf16.msra.mxu0 %v3147_v26  ;;  %3168 = vmatprep.subr.bf16.mxu1 %v3167_v20  ;;  %v804_v20 = vsel %vm434_vm8, %v4142_v17, %v797_v29  ;;  %v773_v60 = vmul.f32 %v766_v51, %v3853_v56 }
 0x30b   :  { %v779_v49 = vpop.permute.xlu0 %778  ;;  %3150 = vmatprep.subr.bf16.mxu0 %v3149_v42  ;;  %3170 = vmatpush1.bf16.msra.mxu1 %v3169_v36  ;;  %v770_v42 = vmul.f32 %v769_v38, %v3844_v15  ;;  %v806_v30 = vmul.f32 %v804_v20, %v3827_v3 }
 0x30c   :  { %v783_v34 = vsel %vm381_vm7, %v777_v41, %v779_v49  ;;  %v781_v14 = vpop.permute.xlu1 %780  ;;  %v772_v41 = vmul.f32 %v767_v28, %v3836_v10 }
 0x30d   :  { %v788_v40 = vmul.f32 %v783_v34, %v3848_v53  ;;  %v782_v13 = vsel %vm381_vm7, %v779_v49, %v781_v14  ;;  %v785_v1 = vsel %vm381_vm7, %v781_v14, %v775_v18  ;;  %v791_v18 = vmul.f32 %v4066_v43, %v3738_v54 }
 0x30e   :  { %v786_v32 = vmul.f32 %v785_v1, %v3857_v33  ;;  %v789_v46 = vmul.f32 %v782_v13, %v3861_v48  ;;  %v3155_v28 = vpack.c.bf16 %v806_v30, %v790_v22  ;;  %v836_v34 = vsel %vm500_vm9, %v4148_v21, %v4150_v7  ;;  %v5363_v30 = vld [vmem:[#allocation21_spill] sm:$0xff] }
 0x30f   :  { %v799_v45 = vpop.permute.xlu0 %798  ;;  %v3173_v26 = vpack.c.bf16 %v788_v40, %v772_v41  ;;  %v820_v40 = vsel %vm467_vm10, %v4144_v23, %v4146_v16  ;;  %v838_v13 = vmul.f32 %v836_v34, %v3929_v61 }
 0x310   :  { %v3151_v52 = vpack.c.bf16 %v786_v32, %v770_v42  ;;  %v803_v2 = vsel %vm434_vm8, %v797_v29, %v799_v45  ;;  %v801_v50 = vpop.permute.xlu1 %800  ;;  %v3171_v24 = vpack.c.bf16 %v789_v46, %v773_v60  ;;  %v793_v29 = vmul.f32 %v4100_v44, %v3752_v58 }
 0x311   :  { %v807_v62 = vmul.f32 %v803_v2, %v3873_v4  ;;  %v802_v36 = vsel %vm434_vm8, %v799_v45, %v801_v50  ;;  %v805_v63 = vsel %vm434_vm8, %v801_v50, %v4142_v17  ;;  %v822_v32 = vmul.f32 %v820_v40, %v3923_v11  ;;  %v5364_v2 = vld [vmem:[#allocation22_spill] sm:$0xff]  ;;  %v5369_v40 = vld [vmem:[#allocation29_spill] sm:$0xff] }
 0x312   :  { %v808_v43 = vmul.f32 %v802_v36, %v3883_v47  ;;  %v809_v51 = vmul.f32 %v805_v63, %v3887_v27  ;;  %3152 = vmatpush1.bf16.msra.mxu0 %v3151_v52  ;;  %3172 = vmatprep.subr.bf16.mxu1 %v3171_v24  ;;  %v5365_v24 = vld [vmem:[#allocation23_spill] sm:$0xff]  ;;  %v5366_v63 = vld [vmem:[#allocation26_spill] sm:$0xff] }
 0x313   :  { %v815_v38 = vpop.permute.xlu0 %814  ;;  %3174 = vmatpush1.bf16.msra.mxu1 %v3173_v26  ;;  %v3153_v49 = vpack.c.bf16 %v807_v62, %v791_v18  ;;  %v3159_v26 = vpack.c.bf16 %v838_v13, %v822_v32  ;;  %v5370_v13 = vld [vmem:[#allocation25_spill] sm:$0xff] }
 0x314   :  { %v3177_v14 = vpack.c.bf16 %v808_v43, %v792_v19  ;;  %v817_v17 = vpop.permute.xlu1 %816  ;;  %v3175_v20 = vpack.c.bf16 %v809_v51, %v793_v29  ;;  %v819_v44 = vsel %vm467_vm10, %v4146_v16, %v815_v38  ;;  %v852_v16 = vsel %vm533_vm11, %v4152_v35, %v4154_v39 }
 0x315   :  { %3154 = vmatprep.subr.bf16.mxu0 %v3153_v49  ;;  %v818_v1 = vsel %vm467_vm10, %v815_v38, %v817_v17  ;;  %v821_v42 = vsel %vm467_vm10, %v817_v17, %v4144_v23  ;;  %v823_v41 = vmul.f32 %v819_v44, %v3934_v31  ;;  %v854_v43 = vmul.f32 %v5366_v63, %v852_v16  ;;  %v5367_v49 = vld [vmem:[#allocation27_spill] sm:$0xff]  ;;  %v5368_v17 = vld [vmem:[#allocation28_spill] sm:$0xff]  ;;  %v5373_v16 = vld [vmem:[#allocation30_spill] sm:$0xff] }
 0x316   :  { %3156 = vmatpush1.bf16.msra.mxu0 %v3155_v28  ;;  %3176 = vmatprep.subr.bf16.mxu1 %v3175_v20  ;;  %v824_v18 = vmul.f32 %v818_v1, %v3949_v12  ;;  %v825_v52 = vmul.f32 %v821_v42, %v5363_v30  ;;  %v5371_v1 = vld [vmem:[#allocation24_spill] sm:$0xff] }
 0x317   :  { %v831_v60 = vpop.permute.xlu0 %830  ;;  %3178 = vmatpush1.bf16.msra.mxu1 %v3177_v14  ;;  %v3164_v42 = vpack.c.bf16 %v5371_v1, %v854_v43  ;;  %v5378_v43 = vld [vmem:[#allocation7_spill] sm:$0xff] }
 0x318   :  { %v835_v46 = vsel %vm500_vm9, %v4150_v7, %v831_v60  ;;  %v833_v22 = vpop.permute.xlu1 %832 }
 0x319   :  { %v839_v45 = vmul.f32 %v835_v46, %v3957_v25  ;;  %v834_v23 = vsel %vm500_vm9, %v831_v60, %v833_v22  ;;  %v837_v19 = vsel %vm500_vm9, %v833_v22, %v4148_v21  ;;  %v5372_v60 = vld [vmem:[#allocation31_spill] sm:$0xff] }
 0x31a   :  { %v840_v50 = vmul.f32 %v834_v23, %v5364_v2  ;;  %v841_v7 = vmul.f32 %v837_v19, %v5365_v24  ;;  %v5376_v23 = vld [vmem:[#allocation5_spill] sm:$0xff] }
 0x31b   :  { %v847_v62 = vpop.permute.xlu0 %846  ;;  %v3157_v36 = vpack.c.bf16 %v839_v45, %v823_v41  ;;  %v5375_v41 = vmov 0.0  }
 0x31c   :  { %v3181_v51 = vpack.c.bf16 %v840_v50, %v824_v18  ;;  %v851_v29 = vsel %vm533_vm11, %v4154_v39, %v847_v62  ;;  %v849_v38 = vpop.permute.xlu1 %848  ;;  %v3179_v21 = vpack.c.bf16 %v841_v7, %v825_v52  ;;  %v5377_v50 = vld [vmem:[#allocation6_spill] sm:$0xff] }
 0x31d   :  { %v855_v28 = vmul.f32 %v5367_v49, %v851_v29  ;;  %v850_v34 = vsel %vm533_vm11, %v847_v62, %v849_v38  ;;  %v853_v14 = vsel %vm533_vm11, %v849_v38, %v4152_v35  ;;  %3158 = vmatprep.subr.bf16.mxu0 %v3157_v36  ;;  %v725_v35 = vld [vmem:[%s5271_s1 + $0x20] sm:$0xff] }
 0x31e   :  { %v856_v20 = vmul.f32 %v5368_v17, %v850_v34  ;;  %v857_v44 = vmul.f32 %v5369_v40, %v853_v14  ;;  %3160 = vmatpush1.bf16.msra.mxu0 %v3159_v26  ;;  %3180 = vmatprep.subr.bf16.mxu1 %v3179_v21  ;;  %v5379_v29 = vld [vmem:[#allocation8_spill] sm:$0xff]  ;;  %v5383_v17 = vld [vmem:[#allocation18_spill] sm:$0xff] }
 0x31f   :  { %v3161_v39 = vpack.c.bf16 %v5370_v13, %v855_v28  ;;  %3182 = vmatpush1.bf16.msra.mxu1 %v3181_v51  ;;  %v5382_v13 = vld [vmem:[#allocation16_spill] sm:$0xff] }
 0x320   :  { %v3183_v32 = vpack.c.bf16 %v5372_v60, %v857_v44  ;;  %v3186_v46 = vpack.c.bf16 %v5373_v16, %v856_v20 }
 0x321   :  { %3163 = vmatprep.subr.msk.bf16.mxu0 %vm4039_vm13, %v3161_v39 }
 0x322   :  { %3166 = vmatpush1.bf16.msk.msra.mxu0 %vm4039_vm13, %v3164_v42  ;;  %3185 = vmatprep.subr.msk.bf16.mxu1 %vm4039_vm13, %v3183_v32  ;;  %v5380_v32 = vld [vmem:[#allocation14_spill] sm:$0xff] }
 0x323   :  { %3188 = vmatpush1.bf16.msk.msra.mxu1 %vm4039_vm13, %v3186_v46 }
 0x325   :  { %2845 = vmatmul.mubr.msk.f32.vlgmr.msra.gmra.mrb[2].mxu0 %vm566_vm14, %v725_v35 }
 0x326   :  { %2848 = vmatmul.mubr.msk.f32.vlgmr.msra.gmra.mrb[6].mxu1 %vm566_vm14, %v725_v35  ;;  %1219 = vmatprep.mubr.f32.mxu0 %v5375_v41  ;;  %v5381_v35 = vld [vmem:[#allocation15_spill] sm:$0xff] }
 0x327   :  { %1308 = vmatprep.mubr.f32.mxu1 %v5375_v41 }
 0x3f8   :  { %v927_v45 = vpop.f32.mrb[2].mxu0 }
 0x3f9   :  { %v928_v19 = vadd.f32 %v927_v45, %v5376_v23  ;;  %v929_v18 = vpop.f32.mrb[3].mxu0  ;;  %v998_v52 = vpop.f32.mrb[6].mxu1 }
 0x3fa   :  { %v930_v7 = vadd.f32 %v929_v18, %v5377_v50  ;;  %v1000_v26 = vpop.f32.mrb[7].mxu1  ;;  %v999_v51 = vadd.f32 %v998_v52, %v5378_v43 }
 0x3fb   :  { %v4289_v62 = vmax.f32 %v928_v19, 0.0  ;;  %v1001_v38 = vadd.f32 %v1000_v26, %v5379_v29 }
 0x3fc   :  { %v4291_v36 = vmax.f32 %v930_v7, 0.0  ;;  %v4327_v21 = vmax.f32 %v999_v51, 0.0 }
 0x3fd   :  { %1011 = vrot.lane.b32.xlu0 %v4289_v62, %s3487_s0  ;;  %v4329_v28 = vmax.f32 %v1001_v38, 0.0 }
 0x3fe   :  { %1013 = vrot.lane.b32.xlu1 %v4291_v36, %s3487_s0 }
 0x401   :  { %1027 = vrot.lane.b32.xlu0 %v4289_v62, %s3488_s15 }
 0x402   :  { %1029 = vrot.lane.b32.xlu1 %v4291_v36, %s3488_s15 }
 0x405   :  { %1043 = vrot.lane.b32.xlu0 %v4289_v62, %s3489_s16 }
 0x406   :  { %1045 = vrot.lane.b32.xlu1 %v4291_v36, %s3489_s16 }
 0x409   :  { %1059 = vrot.lane.b32.xlu0 %v4289_v62, %s3490_s17 }
 0x40a   :  { %1061 = vrot.lane.b32.xlu1 %v4291_v36, %s3490_s17 }
 0x40d   :  { %1079 = vrot.lane.b32.xlu0 %v4289_v62, %s3491_s18 }
 0x40e   :  { %1081 = vrot.lane.b32.xlu1 %v4291_v36, %s3491_s18 }
 0x411   :  { %1095 = vrot.lane.b32.xlu0 %v4289_v62, %s3492_s19 }
 0x412   :  { %1097 = vrot.lane.b32.xlu1 %v4291_v36, %s3492_s19 }
 0x415   :  { %1111 = vrot.lane.b32.xlu0 %v4289_v62, %s3493_s20 }
 0x416   :  { %1113 = vrot.lane.b32.xlu1 %v4291_v36, %s3493_s20 }
 0x419   :  { %1127 = vrot.lane.b32.xlu0 %v4289_v62, %s3494_s21 }
 0x41a   :  { %1129 = vrot.lane.b32.xlu1 %v4291_v36, %s3494_s21 }
 0x41d   :  { %1015 = vrot.lane.b32.xlu0 %v4327_v21, %s3487_s0 }
 0x41e   :  { %1017 = vrot.lane.b32.xlu1 %v4329_v28, %s3487_s0 }
 0x421   :  { %1031 = vrot.lane.b32.xlu0 %v4327_v21, %s3488_s15 }
 0x422   :  { %1033 = vrot.lane.b32.xlu1 %v4329_v28, %s3488_s15 }
 0x425   :  { %1047 = vrot.lane.b32.xlu0 %v4327_v21, %s3489_s16 }
 0x426   :  { %1049 = vrot.lane.b32.xlu1 %v4329_v28, %s3489_s16 }
 0x429   :  { %1063 = vrot.lane.b32.xlu0 %v4327_v21, %s3490_s17 }
 0x42a   :  { %1065 = vrot.lane.b32.xlu1 %v4329_v28, %s3490_s17 }
 0x42d   :  { %1083 = vrot.lane.b32.xlu0 %v4327_v21, %s3491_s18 }
 0x42e   :  { %1085 = vrot.lane.b32.xlu1 %v4329_v28, %s3491_s18 }
 0x431   :  { %1099 = vrot.lane.b32.xlu0 %v4327_v21, %s3492_s19 }
 0x432   :  { %1101 = vrot.lane.b32.xlu1 %v4329_v28, %s3492_s19 }
 0x435   :  { %1115 = vrot.lane.b32.xlu0 %v4327_v21, %s3493_s20 }
 0x436   :  { %1117 = vrot.lane.b32.xlu1 %v4329_v28, %s3493_s20 }
 0x439   :  { %1131 = vrot.lane.b32.xlu0 %v4327_v21, %s3494_s21 }
 0x43a   :  { %1133 = vrot.lane.b32.xlu1 %v4329_v28, %s3494_s21 }
 0x46f   :  { %v1012_v34 = vpop.permute.xlu0 %1011 }
 0x470   :  { %v1014_v14 = vpop.permute.xlu1 %1013 }
 0x471   :  { %v1021_v20 = vsel %vm282_vm5, %v1012_v34, %v1014_v14 }
 0x472   :  { %v1024_v46 = vmul.f32 %v1021_v20, %v5380_v32 }
 0x473   :  { %v1028_v44 = vpop.permute.xlu0 %1027 }
 0x474   :  { %v1030_v39 = vpop.permute.xlu1 %1029 }
 0x475   :  { %v1037_v42 = vsel %vm315_vm4, %v1028_v44, %v1030_v39 }
 0x476   :  { %v1040_v45 = vmul.f32 %v1037_v42, %v5381_v35 }
 0x477   :  { %v1044_v23 = vpop.permute.xlu0 %1043 }
 0x478   :  { %v1046_v19 = vpop.permute.xlu1 %1045  ;;  %v3189_v18 = vpack.c.bf16 %v1040_v45, %v1024_v46 }
 0x479   :  { %v1053_v22 = vsel %vm348_vm6, %v1044_v23, %v1046_v19 }
 0x47a   :  { %3190 = vmatprep.subr.bf16.mxu0 %v3189_v18 }
 0x47b   :  { %v1060_v52 = vpop.permute.xlu0 %1059 }
 0x47c   :  { %v1062_v50 = vpop.permute.xlu1 %1061 }
 0x47d   :  { %v1069_v35 = vsel %vm381_vm7, %v1060_v52, %v1062_v50 }
 0x47e   :  { %v1072_v40 = vmul.f32 %v1069_v35, %v5382_v13 }
 0x47f   :  { %v4369_v7 = vpop.permute.xlu0 %1079 }
 0x480   :  { %v1082_v26 = vpop.permute.xlu1 %1081 }
 0x483   :  { %v4371_v43 = vpop.permute.xlu0 %1095 }
 0x484   :  { %v4373_v51 = vpop.permute.xlu1 %1097 }
 0x487   :  { %v4375_v29 = vpop.permute.xlu0 %1111 }
 0x488   :  { %v4377_v38 = vpop.permute.xlu1 %1113 }
 0x48b   :  { %v4379_v20 = vpop.permute.xlu0 %1127 }
 0x48c   :  { %v4381_v42 = vpop.permute.xlu1 %1129 }
 0x48f   :  { %v1016_v32 = vpop.permute.xlu0 %1015 }
 0x490   :  { %v1018_v46 = vpop.permute.xlu1 %1017  ;;  %v1020_v16 = vsel %vm282_vm5, %v1014_v14, %v1016_v32 }
 0x491   :  { %v1019_v45 = vsel %vm282_vm5, %v1016_v32, %v1018_v46  ;;  %v1022_v18 = vsel %vm282_vm5, %v1018_v46, %v1012_v34  ;;  %v1025_v13 = vmul.f32 %v1020_v16, %v3795_v9  ;;  %vm2729_vm5 = vcmask 1042432  }
 0x492   :  { %v1023_v46 = vmul.f32 %v1022_v18, %v3787_v6  ;;  %v1026_v24 = vmul.f32 %v1019_v45, %v3769_v0 }
 0x493   :  { %v1032_v41 = vpop.permute.xlu0 %1031 }
 0x494   :  { %v1036_v60 = vsel %vm315_vm4, %v1030_v39, %v1032_v41  ;;  %v1034_v1 = vpop.permute.xlu1 %1033  ;;  %v1056_v39 = vmul.f32 %v1053_v22, %v3756_v59  ;;  %v1075_v22 = vmul.f32 %v4289_v62, %v3742_v55  ;;  %v1078_v62 = vmul.f32 %v4329_v28, %v3752_v58 }
 0x495   :  { %v1041_v49 = vmul.f32 %v1036_v60, %v5383_v17  ;;  %v1035_v63 = vsel %vm315_vm4, %v1032_v41, %v1034_v1  ;;  %v1038_v34 = vsel %vm315_vm4, %v1034_v1, %v1028_v44  ;;  %vm2361_vm4 = vcmask 31744  }
 0x496   :  { %v1039_v14 = vmul.f32 %v1038_v34, %v3791_v8  ;;  %v1042_v32 = vmul.f32 %v1035_v63, %v3783_v5  ;;  %v3193_v30 = vpack.c.bf16 %v1072_v40, %v1056_v39 }
 0x497   :  { %v1048_v35 = vpop.permute.xlu0 %1047  ;;  %v3213_v41 = vpack.c.bf16 %v1041_v49, %v1025_v13 }
 0x498   :  { %v3191_v17 = vpack.c.bf16 %v1039_v14, %v1023_v46  ;;  %v1050_v60 = vpop.permute.xlu1 %1049  ;;  %v3211_v2 = vpack.c.bf16 %v1042_v32, %v1026_v24  ;;  %v1052_v59 = vsel %vm348_vm6, %v1046_v19, %v1048_v35  ;;  %v1076_v19 = vmul.f32 %v4291_v36, %v3738_v54 }
 0x499   :  { %v1051_v6 = vsel %vm348_vm6, %v1048_v35, %v1050_v60  ;;  %v1054_v0 = vsel %vm348_vm6, %v1050_v60, %v1044_v23  ;;  %v1057_v44 = vmul.f32 %v1052_v59, %v3836_v10  ;;  %v1077_v23 = vmul.f32 %v4327_v21, %v3748_v57 }
 0x49a   :  { %3192 = vmatpush1.bf16.msra.mxu0 %v3191_v17  ;;  %3212 = vmatprep.subr.bf16.mxu1 %v3211_v2  ;;  %v1089_v2 = vsel %vm434_vm8, %v4369_v7, %v1082_v26  ;;  %v1055_v49 = vmul.f32 %v1054_v0, %v3844_v15  ;;  %v1058_v40 = vmul.f32 %v1051_v6, %v3853_v56  ;;  %v5384_v17 = vld [vmem:[#allocation21_spill] sm:$0xff]  ;;  %v5386_v0 = vld [vmem:[#allocation23_spill] sm:$0xff]  ;;  %vm2733_vm6 = vcmask 261120  }
 0x49b   :  { %3194 = vmatprep.subr.bf16.mxu0 %v3193_v30  ;;  %3214 = vmatpush1.bf16.msra.mxu1 %v3213_v41  ;;  %v1064_v5 = vpop.permute.xlu0 %1063  ;;  %v1091_v15 = vmul.f32 %v1089_v2, %v3827_v3  ;;  %v5385_v41 = vld [vmem:[#allocation22_spill] sm:$0xff] }
 0x49c   :  { %v1068_v8 = vsel %vm381_vm7, %v1062_v50, %v1064_v5  ;;  %v1066_v9 = vpop.permute.xlu1 %1065 }
 0x49d   :  { %v1073_v24 = vmul.f32 %v1068_v8, %v3848_v53  ;;  %v1067_v63 = vsel %vm381_vm7, %v1064_v5, %v1066_v9  ;;  %v1070_v30 = vsel %vm381_vm7, %v1066_v9, %v1060_v52  ;;  %v5387_v8 = vld [vmem:[#allocation26_spill] sm:$0xff]  ;;  %vm3429_vm7 = vmpackc.low %vm2733_vm6, %vm2733_vm6 }
 0x49e   :  { %v1071_v1 = vmul.f32 %v1070_v30, %v3857_v33  ;;  %v1074_v16 = vmul.f32 %v1067_v63, %v3861_v48  ;;  %v52_v63 = vld [vmem:[%s5274_s4 + $0x88] sm:$0xff]  ;;  %v5388_v30 = vld [vmem:[#allocation27_spill] sm:$0xff] }
 0x49f   :  { %v1084_v53 = vpop.permute.xlu0 %1083  ;;  %v3217_v50 = vpack.c.bf16 %v1073_v24, %v1057_v44 }
 0x4a0   :  { %v3195_v52 = vpack.c.bf16 %v1071_v1, %v1055_v49  ;;  %v1088_v56 = vsel %vm434_vm8, %v1082_v26, %v1084_v53  ;;  %v1086_v33 = vpop.permute.xlu1 %1085  ;;  %v3215_v48 = vpack.c.bf16 %v1074_v16, %v1058_v40  ;;  %v1121_v26 = vsel %vm500_vm9, %v4375_v29, %v4377_v38  ;;  %v84_v16 = vld [vmem:[%s5274_s4 + $0x188] sm:$0xff] }
 0x4a1   :  { %v1092_v55 = vmul.f32 %v1088_v56, %v3873_v4  ;;  %v1087_v10 = vsel %vm434_vm8, %v1084_v53, %v1086_v33  ;;  %v1090_v57 = vsel %vm434_vm8, %v1086_v33, %v4369_v7  ;;  %v3199_v4 = vpack.c.bf16 %v1091_v15, %v1075_v22  ;;  %v5389_v22 = vld [vmem:[#allocation28_spill] sm:$0xff]  ;;  %v5390_v53 = vld [vmem:[#allocation29_spill] sm:$0xff]  ;;  %v5393_v56 = vld [vmem:[#allocation31_spill] sm:$0xff] }
 0x4a2   :  { %v1093_v54 = vmul.f32 %v1087_v10, %v3883_v47  ;;  %v1094_v3 = vmul.f32 %v1090_v57, %v3887_v27  ;;  %3196 = vmatpush1.bf16.msra.mxu0 %v3195_v52  ;;  %3216 = vmatprep.subr.bf16.mxu1 %v3215_v48  ;;  %v1105_v47 = vsel %vm467_vm10, %v4371_v43, %v4373_v51  ;;  %v5394_v48 = vld [vmem:[#allocation30_spill] sm:$0xff]  ;;  %vm2811_vm8 = vcmask 74752  }
 0x4a3   :  { %3218 = vmatpush1.bf16.msra.mxu1 %v3217_v50  ;;  %v1100_v36 = vpop.permute.xlu0 %1099  ;;  %v3197_v21 = vpack.c.bf16 %v1092_v55, %v1076_v19  ;;  %v1123_v27 = vmul.f32 %v1121_v26, %v3929_v61  ;;  %v1107_v14 = vmul.f32 %v1105_v47, %v3923_v11  ;;  %v5391_v19 = vld [vmem:[#allocation25_spill] sm:$0xff]  ;;  %v85_v26 = vld [vmem:[%s5274_s4 + $0x190] sm:$0xff] }
 0x4a4   :  { %v3221_v45 = vpack.c.bf16 %v1093_v54, %v1077_v23  ;;  %v1102_v7 = vpop.permute.xlu1 %1101  ;;  %v3219_v18 = vpack.c.bf16 %v1094_v3, %v1078_v62  ;;  %v1104_v58 = vsel %vm467_vm10, %v4373_v51, %v1100_v36  ;;  %v1137_v51 = vsel %vm533_vm11, %v4379_v20, %v4381_v42  ;;  %v35_v55 = vld [vmem:[%s5274_s4] sm:$0xff]  ;;  %v36_v10 = vld [vmem:[%s5274_s4 + $0x8] sm:$0xff] }
 0x4a5   :  { %3198 = vmatprep.subr.bf16.mxu0 %v3197_v21  ;;  %v1103_v28 = vsel %vm467_vm10, %v1100_v36, %v1102_v7  ;;  %v1106_v34 = vsel %vm467_vm10, %v1102_v7, %v4371_v43  ;;  %v1108_v39 = vmul.f32 %v1104_v58, %v3934_v31  ;;  %v3203_v5 = vpack.c.bf16 %v1123_v27, %v1107_v14  ;;  %v67_v54 = vld [vmem:[%s5274_s4 + $0x100] sm:$0xff]  ;;  %v68_v62 = vld [vmem:[%s5274_s4 + $0x108] sm:$0xff]  ;;  %v53_v36 = vld [vmem:[%s5274_s4 + $0x90] sm:$0xff] }
 0x4a6   :  { %3200 = vmatpush1.bf16.msra.mxu0 %v3199_v4  ;;  %3220 = vmatprep.subr.bf16.mxu1 %v3219_v18  ;;  %v1109_v35 = vmul.f32 %v1103_v28, %v3949_v12  ;;  %v1110_v60 = vmul.f32 %v1106_v34, %v5384_v17  ;;  %v51_v12 = vld [vmem:[%s5274_s4 + $0x80] sm:$0xff]  ;;  %v54_v21 = vld [vmem:[%s5274_s4 + $0x98] sm:$0xff]  ;;  %v1007_v4 = vld [vmem:[%s5271_s1 + $0x30] sm:$0xff]  ;;  %v3235_v7 = vpack.c.bf16 %v36_v10, %v35_v55 }
 0x4a7   :  { %3222 = vmatpush1.bf16.msra.mxu1 %v3221_v45  ;;  %v1116_v46 = vpop.permute.xlu0 %1115  ;;  %v3233_v37 = vpack.c.bf16 %v52_v63, %v51_v12  ;;  %v86_v45 = vld [vmem:[%s5274_s4 + $0x198] sm:$0xff]  ;;  %v3267_v18 = vpack.c.bf16 %v68_v62, %v67_v54  ;;  %v3237_v47 = vpack.c.bf16 %v54_v21, %v53_v36  ;;  %v37_v58 = vld [vmem:[%s5274_s4 + $0x10] sm:$0xff]  ;;  %v55_v14 = vld [vmem:[%s5274_s4 + $0xa0] sm:$0xff] }
 0x4a8   :  { %v1120_v61 = vsel %vm500_vm9, %v4377_v38, %v1116_v46  ;;  %v1118_v32 = vpop.permute.xlu1 %1117  ;;  %v38_v27 = vld [vmem:[%s5274_s4 + $0x18] sm:$0xff]  ;;  %v69_v28 = vld [vmem:[%s5274_s4 + $0x110] sm:$0xff]  ;;  %v3269_v34 = vpack.c.bf16 %v86_v45, %v85_v26  ;;  %v39_v17 = vld [vmem:[%s5274_s4 + $0x20] sm:$0xff] }
 0x4a9   :  { %v1124_v13 = vmul.f32 %v1120_v61, %v3957_v25  ;;  %v1119_v43 = vsel %vm500_vm9, %v1116_v46, %v1118_v32  ;;  %v1122_v11 = vsel %vm500_vm9, %v1118_v32, %v4375_v29  ;;  %v1139_v25 = vmul.f32 %v5387_v8, %v1137_v51  ;;  %v70_v46 = vld [vmem:[%s5274_s4 + $0x118] sm:$0xff]  ;;  %v56_v51 = vld [vmem:[%s5274_s4 + $0xa8] sm:$0xff]  ;;  %v1008_v32 = vld [vmem:[%s5271_s1 + $0x40] sm:$0xff] }
 0x4aa   :  { %v1125_v6 = vmul.f32 %v1119_v43, %v5385_v41  ;;  %v1126_v38 = vmul.f32 %v1122_v11, %v5386_v0  ;;  %v5396_v61 = vmov 0.0   ;;  %v3239_v43 = vpack.c.bf16 %v38_v27, %v37_v58  ;;  %v71_v41 = vld [vmem:[%s5274_s4 + $0x120] sm:$0xff]  ;;  %v72_v0 = vld [vmem:[%s5274_s4 + $0x128] sm:$0xff]  ;;  %v1009_v8 = vld [vmem:[%s5271_s1 + $0x50] sm:$0xff] }
 0x4ab   :  { %v1132_v59 = vpop.permute.xlu0 %1131  ;;  %v3201_v31 = vpack.c.bf16 %v1124_v13, %v1108_v39  ;;  %v87_v39 = vld [vmem:[%s5274_s4 + $0x1a0] sm:$0xff]  ;;  %v88_v13 = vld [vmem:[%s5274_s4 + $0x1a8] sm:$0xff]  ;;  %v3271_v11 = vpack.c.bf16 %v70_v46, %v69_v28  ;;  %v73_v12 = vld [vmem:[%s5274_s4 + $0x130] sm:$0xff] }
 0x4ac   :  { %v3225_v9 = vpack.c.bf16 %v1125_v6, %v1109_v35  ;;  %v1136_v2 = vsel %vm533_vm11, %v4381_v42, %v1132_v59  ;;  %v1134_v24 = vpop.permute.xlu1 %1133  ;;  %v3223_v29 = vpack.c.bf16 %v1126_v38, %v1110_v60  ;;  %v83_v42 = vld [vmem:[%s5274_s4 + $0x180] sm:$0xff]  ;;  %v3241_v35 = vpack.c.bf16 %v56_v51, %v55_v14  ;;  %v40_v60 = vld [vmem:[%s5274_s4 + $0x28] sm:$0xff]  ;;  %v57_v38 = vld [vmem:[%s5274_s4 + $0xb0] sm:$0xff] }
 0x4ad   :  { %v1140_v49 = vmul.f32 %v5388_v30, %v1136_v2  ;;  %v1135_v40 = vsel %vm533_vm11, %v1132_v59, %v1134_v24  ;;  %v1138_v1 = vsel %vm533_vm11, %v1134_v24, %v4379_v20  ;;  %3202 = vmatprep.subr.bf16.mxu0 %v3201_v31  ;;  %v5392_v20 = vld [vmem:[#allocation24_spill] sm:$0xff]  ;;  %v3265_v57 = vpack.c.bf16 %v84_v16, %v83_v42  ;;  %v89_v59 = vld [vmem:[%s5274_s4 + $0x1b0] sm:$0xff]  ;;  %v92_v42 = vld [vmem:[%s5274_s4 + $0x1c8] sm:$0xff] }
 0x4ae   :  { %v1141_v44 = vmul.f32 %v5389_v22, %v1135_v40  ;;  %v1142_v23 = vmul.f32 %v5390_v53, %v1138_v1  ;;  %3204 = vmatpush1.bf16.msra.mxu0 %v3203_v5  ;;  %3224 = vmatprep.subr.bf16.mxu1 %v3223_v29  ;;  %v3208_v52 = vpack.c.bf16 %v5392_v20, %v1139_v25  ;;  %v58_v5 = vld [vmem:[%s5274_s4 + $0xb8] sm:$0xff]  ;;  %v41_v24 = vld [vmem:[%s5274_s4 + $0x30] sm:$0xff]  ;;  %v60_v40 = vld [vmem:[%s5274_s4 + $0xc8] sm:$0xff] }
 0x4af   :  { %v3205_v15 = vpack.c.bf16 %v5391_v19, %v1140_v49  ;;  %3226 = vmatpush1.bf16.msra.mxu1 %v3225_v9  ;;  %v3273_v6 = vpack.c.bf16 %v88_v13, %v87_v39  ;;  %v90_v31 = vld [vmem:[%s5274_s4 + $0x1b8] sm:$0xff]  ;;  %v3243_v25 = vpack.c.bf16 %v40_v60, %v39_v17  ;;  %v3275_v9 = vpack.c.bf16 %v72_v0, %v71_v41  ;;  %v59_v49 = vld [vmem:[%s5274_s4 + $0xc0] sm:$0xff]  ;;  %v44_v19 = vld [vmem:[%s5274_s4 + $0x48] sm:$0xff] }
 0x4b0   :  { %v3227_v33 = vpack.c.bf16 %v5393_v56, %v1142_v23  ;;  %v3230_v50 = vpack.c.bf16 %v5394_v48, %v1141_v44  ;;  %v3245_v2 = vpack.c.bf16 %v58_v5, %v57_v38  ;;  %v42_v29 = vld [vmem:[%s5274_s4 + $0x38] sm:$0xff]  ;;  %v3277_v63 = vpack.c.bf16 %v90_v31, %v89_v59  ;;  %v91_v1 = vld [vmem:[%s5274_s4 + $0x1c0] sm:$0xff]  ;;  %v76_v20 = vld [vmem:[%s5274_s4 + $0x148] sm:$0xff] }
 0x4b1   :  { %3207 = vmatprep.subr.msk.bf16.mxu0 %vm4039_vm13, %v3205_v15  ;;  %v74_v30 = vld [vmem:[%s5274_s4 + $0x138] sm:$0xff]  ;;  %v1010_v16 = vld [vmem:[%s5271_s1 + $0x60] sm:$0xff]  ;;  %v3247_v22 = vpack.c.bf16 %v42_v29, %v41_v24  ;;  %v3249_v53 = vpack.c.bf16 %v60_v40, %v59_v49  ;;  %v77_v62 = vld [vmem:[%s5274_s4 + $0x150] sm:$0xff] }
 0x4b2   :  { %3210 = vmatpush1.bf16.msk.msra.mxu0 %vm4039_vm13, %v3208_v52  ;;  %3229 = vmatprep.subr.msk.bf16.mxu1 %vm4039_vm13, %v3227_v33  ;;  %v3279_v44 = vpack.c.bf16 %v74_v30, %v73_v12  ;;  %v43_v23 = vld [vmem:[%s5274_s4 + $0x40] sm:$0xff]  ;;  %v61_v52 = vld [vmem:[%s5274_s4 + $0xd0] sm:$0xff]  ;;  %v62_v56 = vld [vmem:[%s5274_s4 + $0xd8] sm:$0xff] }
 0x4b3   :  { %3232 = vmatpush1.bf16.msk.msra.mxu1 %vm4039_vm13, %v3230_v50  ;;  %3234 = vmatprep.subr.bf16.mxu0 %v3233_v37  ;;  %v75_v15 = vld [vmem:[%s5274_s4 + $0x140] sm:$0xff]  ;;  %v3281_v37 = vpack.c.bf16 %v92_v42, %v91_v1  ;;  %v93_v33 = vld [vmem:[%s5274_s4 + $0x1d0] sm:$0xff]  ;;  %v94_v48 = vld [vmem:[%s5274_s4 + $0x1d8] sm:$0xff]  ;;  %v3251_v50 = vpack.c.bf16 %v44_v19, %v43_v23  ;;  %v3253_v10 = vpack.c.bf16 %v62_v56, %v61_v52 }
 0x4b4   :  { %3266 = vmatprep.subr.bf16.mxu1 %v3265_v57  ;;  %v3283_v55 = vpack.c.bf16 %v76_v20, %v75_v15  ;;  %v45_v57 = vld [vmem:[%s5274_s4 + $0x50] sm:$0xff]  ;;  %v46_v54 = vld [vmem:[%s5274_s4 + $0x58] sm:$0xff]  ;;  %v3285_v36 = vpack.c.bf16 %v94_v48, %v93_v33  ;;  %v64_v26 = vld [vmem:[%s5274_s4 + $0xe8] sm:$0xff] }
 0x4b5   :  { %2851 = vmatmul.mubr.msk.f32.vlgmr.msra.gmra.mrb[4].mxu0 %vm566_vm14, %v1007_v4  ;;  %v78_v21 = vld [vmem:[%s5274_s4 + $0x158] sm:$0xff]  ;;  %v95_v45 = vld [vmem:[%s5274_s4 + $0x1e0] sm:$0xff]  ;;  %v48_v28 = vld [vmem:[%s5274_s4 + $0x68] sm:$0xff] }
 0x4b6   :  { %2857 = vmatmul.mubr.msk.f32.vlgmr.msra.gmra.mrb[8].mxu1 %vm566_vm14, %v1007_v4  ;;  %1225 = vmatprep.mubr.f32.mxu0 %v5396_v61  ;;  %v63_v4 = vld [vmem:[%s5274_s4 + $0xe0] sm:$0xff]  ;;  %v80_v14 = vld [vmem:[%s5274_s4 + $0x168] sm:$0xff]  ;;  %v65_v51 = vld [vmem:[%s5274_s4 + $0xf0] sm:$0xff] }
 0x4b7   :  { %1314 = vmatprep.mubr.f32.mxu1 %v5396_v61  ;;  %3236 = vmatpush3.bf16.msra.mxu0 %v3235_v7  ;;  %v96_v7 = vld [vmem:[%s5274_s4 + $0x1e8] sm:$0xff]  ;;  %v3257_v58 = vpack.c.bf16 %v64_v26, %v63_v4  ;;  %v47_v27 = vld [vmem:[%s5274_s4 + $0x60] sm:$0xff]  ;;  %v97_v17 = vld [vmem:[%s5274_s4 + $0x1f0] sm:$0xff] }
 0x4b8   :  { %3268 = vmatpush3.bf16.msra.mxu1 %v3267_v18  ;;  %3238 = vmatprep.subr.bf16.mxu0 %v3237_v47  ;;  %v3255_v18 = vpack.c.bf16 %v46_v54, %v45_v57  ;;  %v3287_v47 = vpack.c.bf16 %v78_v21, %v77_v62  ;;  %v3289_v46 = vpack.c.bf16 %v96_v7, %v95_v45  ;;  %v98_v41 = vld [vmem:[%s5274_s4 + $0x1f8] sm:$0xff]  ;;  %v4730_v48 = vld [vmem:[%s5273_s3] sm:$0xff] }
 0x4b9   :  { %2852 = vmatmul.mubr.msk.f32.gmra.mrb[6].mxu0 %vm566_vm14, %v1008_v32  ;;  %3270 = vmatprep.subr.bf16.mxu1 %v3269_v34  ;;  %v79_v34 = vld [vmem:[%s5274_s4 + $0x160] sm:$0xff]  ;;  %v3259_v39 = vpack.c.bf16 %v48_v28, %v47_v27  ;;  %v82_v0 = vld [vmem:[%s5274_s4 + $0x178] sm:$0xff]  ;;  %v3293_v38 = vpack.c.bf16 %v98_v41, %v97_v17 }
 0x4ba   :  { %2858 = vmatmul.mubr.msk.f32.gmra.mrb[10].mxu1 %vm566_vm14, %v1008_v32  ;;  %1231 = vmatprep.mubr.f32.mxu0 %v5396_v61  ;;  %v66_v32 = vld [vmem:[%s5274_s4 + $0xf8] sm:$0xff]  ;;  %v3291_v13 = vpack.c.bf16 %v80_v14, %v79_v34  ;;  %v5398_v17 = vld [vmem:[#allocation9_spill] sm:$0xff] }
 0x4bb   :  { %3240 = vmatpush3.bf16.msra.mxu0 %v3239_v43  ;;  %1320 = vmatprep.mubr.f32.mxu1 %v5396_v61  ;;  %v3261_v43 = vpack.c.bf16 %v66_v32, %v65_v51  ;;  %v5397_v54 = vld [vmem:[#allocation11_spill] sm:$0xff]  ;;  %v2263_v3 = vld [vmem:[%s5271_s1 + $0x100] sm:$0xf] }
 0x4bc   :  { %3272 = vmatpush3.bf16.msra.mxu1 %v3271_v11  ;;  %3242 = vmatprep.subr.bf16.mxu0 %v3241_v35  ;;  %v49_v11 = vld [vmem:[%s5274_s4 + $0x70] sm:$0xff]  ;;  %v50_v35 = vld [vmem:[%s5274_s4 + $0x78] sm:$0xff]  ;;  %v4734_v62 = vrot.slane %v4730_v48, %v5397_v54 }
 0x4bd   :  { %3274 = vmatprep.subr.bf16.mxu1 %v3273_v6  ;;  %2853 = vmatmul.mubr.msk.f32.gmra.mrb[8].mxu0 %vm566_vm14, %v1009_v8  ;;  %v3263_v60 = vpack.c.bf16 %v50_v35, %v49_v11  ;;  %v81_v6 = vld [vmem:[%s5274_s4 + $0x170] sm:$0xff]  ;;  %v1506_v7 = vld [vmem:[%s5271_s1 + $0x78] sm:$0xff] }
 0x4be   :  { %2859 = vmatmul.mubr.msk.f32.gmra.mrb[12].mxu1 %vm566_vm14, %v1009_v8  ;;  %1237 = vmatprep.mubr.f32.mxu0 %v5396_v61  ;;  %v3295_v5 = vpack.c.bf16 %v82_v0, %v81_v6 }
 0x4bf   :  { %3244 = vmatpush3.bf16.msra.mxu0 %v3243_v25  ;;  %1326 = vmatprep.mubr.f32.mxu1 %v5396_v61 }
 0x4c0   :  { %3276 = vmatpush3.bf16.msra.mxu1 %v3275_v9  ;;  %3246 = vmatprep.subr.bf16.mxu0 %v3245_v2 }
 0x4c1   :  { %3278 = vmatprep.subr.bf16.mxu1 %v3277_v63  ;;  %2854 = vmatmul.mubr.msk.f32.gmra.mrb[10].mxu0 %vm566_vm14, %v1010_v16 }
 0x4c2   :  { %2860 = vmatmul.mubr.msk.f32.gmra.mrb[14].mxu1 %vm566_vm14, %v1010_v16 }
 0x4c3   :  { %3248 = vmatpush3.bf16.msra.mxu0 %v3247_v22 }
 0x4c4   :  { %3280 = vmatpush3.bf16.msra.mxu1 %v3279_v44  ;;  %3250 = vmatprep.subr.bf16.mxu0 %v3249_v53 }
 0x4c5   :  { %3282 = vmatprep.subr.bf16.mxu1 %v3281_v37  ;;  %v3495_v37 = vmov 0.0|0.0  }
 0x4c7   :  { %3252 = vmatpush3.bf16.msra.mxu0 %v3251_v50 }
 0x4c8   :  { %3284 = vmatpush3.bf16.msra.mxu1 %v3283_v55  ;;  %3254 = vmatprep.subr.bf16.mxu0 %v3253_v10 }
 0x4c9   :  { %3286 = vmatprep.subr.bf16.mxu1 %v3285_v36 }
 0x4cb   :  { %3256 = vmatpush3.bf16.msra.mxu0 %v3255_v18 }
 0x4cc   :  { %3288 = vmatpush3.bf16.msra.mxu1 %v3287_v47  ;;  %3258 = vmatprep.subr.bf16.mxu0 %v3257_v58 }
 0x4cd   :  { %3290 = vmatprep.subr.bf16.mxu1 %v3289_v46 }
 0x4cf   :  { %3260 = vmatpush3.bf16.msra.mxu0 %v3259_v39 }
 0x4d0   :  { %3292 = vmatpush3.bf16.msra.mxu1 %v3291_v13  ;;  %3262 = vmatprep.subr.bf16.mxu0 %v3261_v43 }
 0x4d1   :  { %3294 = vmatprep.subr.bf16.mxu1 %v3293_v38 }
 0x4d3   :  { %3264 = vmatpush3.bf16.msra.mxu0 %v3263_v60  ;;  %v4770_v60 = vrot.slane %v4730_v48, %v5398_v17 }
 0x4d4   :  { %3296 = vmatpush3.bf16.msra.mxu1 %v3295_v5  ;;  %3297 = vmatprep.subr.bf16.mxu0 %v3495_v37  ;;  %v5399_v5 = vld [vmem:[#allocation10_spill] sm:$0xff] }
 0x4d5   :  { %3324 = vmatprep.subr.bf16.mxu1 %v3495_v37 }
 0x588   :  { %v1221_v59 = vpop.f32.mrb[4].mxu0 }
 0x589   :  { %v1223_v31 = vpop.f32.mrb[5].mxu0  ;;  %v1310_v8 = vpop.f32.mrb[8].mxu1 }
 0x58a   :  { %v1312_v25 = vpop.f32.mrb[9].mxu1  ;;  %1397 = vmatprep.mubr.f32.mxu0 %v1223_v31 }
 0x58b   :  { %1398 = vmatmul.mubr.f32.vlgmr.msra.gmra.mrb[12].mxu0 %v1221_v59  ;;  %1482 = vmatprep.mubr.f32.mxu1 %v1312_v25  ;;  %v4776_v59 = vrot.slane %v4730_v48, %v5399_v5 }
 0x58c   :  { %v1227_v9 = vpop.f32.mrb[6].mxu0  ;;  %1483 = vmatmul.mubr.f32.vlgmr.msra.gmra.mrb[16].mxu1 %v1310_v8 }
 0x58d   :  { %v1229_v2 = vpop.f32.mrb[7].mxu0  ;;  %v1316_v24 = vpop.f32.mrb[10].mxu1 }
 0x58e   :  { %v1318_v29 = vpop.f32.mrb[11].mxu1  ;;  %1402 = vmatprep.mubr.f32.mxu0 %v1229_v2 }
 0x58f   :  { %1403 = vmatmul.mubr.f32.gmra.mrb[14].mxu0 %v1227_v9  ;;  %1487 = vmatprep.mubr.f32.mxu1 %v1318_v29 }
 0x590   :  { %1488 = vmatmul.mubr.f32.gmra.mrb[18].mxu1 %v1316_v24  ;;  %v1233_v12 = vpop.f32.mrb[8].mxu0  ;;  %v5400_v24 = vld [vmem:[#allocation12_spill] sm:$0xff] }
 0x591   :  { %v1322_v63 = vpop.f32.mrb[12].mxu1  ;;  %v1235_v30 = vpop.f32.mrb[9].mxu0  ;;  %v4782_v29 = vrot.slane %v4730_v48, %v5400_v24 }
 0x592   :  { %v1324_v49 = vpop.f32.mrb[13].mxu1  ;;  %1407 = vmatprep.mubr.f32.mxu0 %v1235_v30 }
 0x593   :  { %1492 = vmatprep.mubr.f32.mxu1 %v1324_v49  ;;  %1408 = vmatmul.mubr.f32.gmra.mrb[16].mxu0 %v1233_v12 }
 0x594   :  { %1493 = vmatmul.mubr.f32.gmra.mrb[20].mxu1 %v1322_v63  ;;  %v1239_v40 = vpop.f32.mrb[10].mxu0 }
 0x595   :  { %v1328_v1 = vpop.f32.mrb[14].mxu1  ;;  %v1241_v42 = vpop.f32.mrb[11].mxu0 }
 0x596   :  { %v1330_v16 = vpop.f32.mrb[15].mxu1  ;;  %1412 = vmatprep.mubr.f32.mxu0 %v1241_v42 }
 0x597   :  { %1497 = vmatprep.mubr.f32.mxu1 %v1330_v16  ;;  %1413 = vmatmul.mubr.f32.gmra.mrb[18].mxu0 %v1239_v40 }
 0x598   :  { %1498 = vmatmul.mubr.f32.gmra.mrb[22].mxu1 %v1328_v1  ;;  %2863 = vmatprep.mubr.msk.f32.mxu0 %vm1597_vm15, %v1506_v7  ;;  %v5401_v1 = vld [vmem:[#allocation13_spill] sm:$0xff] }
 0x599   :  { %v4789_v42 = vrot.slane %v4730_v48, %v5401_v1 }
 0x65e   :  { %v2945_v22 = vpop.f32.mrb[12].mxu0 }
 0x65f   :  { %v2946_v44 = vpop.f32.mrb[13].mxu0  ;;  %v2989_v53 = vpop.f32.mrb[16].mxu1 }
 0x660   :  { %v2947_v23 = vadd.f32 %v2946_v44, %v2945_v22  ;;  %v2990_v19 = vpop.f32.mrb[17].mxu1 }
 0x661   :  { %v2991_v15 = vadd.f32 %v2990_v19, %v2989_v53 }
 0x662   :  { %v2948_v20 = vpop.f32.mrb[14].mxu0 }
 0x663   :  { %v1485_v52 = vadd.f32 %v2991_v15, %v2947_v23  ;;  %v2949_v56 = vpop.f32.mrb[15].mxu0  ;;  %v2992_v33 = vpop.f32.mrb[18].mxu1 }
 0x664   :  { %v2950_v50 = vadd.f32 %v2949_v56, %v2948_v20  ;;  %v2993_v55 = vpop.f32.mrb[19].mxu1  ;;  %v5402_v20 = vld [vmem:[#allocation17_spill] sm:$0xff] }
 0x665   :  { %v1503_v10 = vmax.f32 %v1485_v52, 0.0  ;;  %v2994_v57 = vadd.f32 %v2993_v55, %v2992_v33  ;;  %v4797_v52 = vrot.slane %v4730_v48, %v5402_v20 }
 0x666   :  { %v2951_v18 = vpop.f32.mrb[16].mxu0 }
 0x667   :  { %v1490_v36 = vadd.f32 %v2994_v57, %v2950_v50  ;;  %1509 = vrot.lane.b32.xlu0 %v1503_v10, %s3496_s11  ;;  %v4740_v4 = vmul.f32 %v4734_v62, %v1503_v10  ;;  %v2995_v47 = vpop.f32.mrb[20].mxu1  ;;  %v2952_v58 = vpop.f32.mrb[17].mxu0 }
 0x668   :  { %v2996_v27 = vpop.f32.mrb[21].mxu1  ;;  %v2953_v28 = vadd.f32 %v2952_v58, %v2951_v18  ;;  %v5404_v58 = vld [vmem:[#allocation20_spill] sm:$0xff] }
 0x669   :  { %v1504_v21 = vmax.f32 %v1490_v36, 0.0  ;;  %v2997_v34 = vadd.f32 %v2996_v27, %v2995_v47  ;;  %v4814_v27 = vrot.slane %v4730_v48, %v5404_v58 }
 0x66a   :  { %v2954_v46 = vpop.f32.mrb[18].mxu0 }
 0x66b   :  { %1511 = vrot.lane.b32.xlu1 %v1504_v21, %s3496_s11  ;;  %1519 = vrot.lane.b32.xlu0 %v1503_v10, %s3497_s12  ;;  %v4743_v26 = vmul.f32 %v4734_v62, %v1504_v21  ;;  %v2998_v14 = vpop.f32.mrb[22].mxu1  ;;  %v2955_v51 = vpop.f32.mrb[19].mxu0  ;;  %v4764_v43 = vadd.f32 %v2997_v34, %v2953_v28  ;;  %v4822_v34 = vld [vmem:[%s5273_s3 + $0x8] ss:$0 sm:$0xff] }
 0x66c   :  { %v2999_v32 = vpop.f32.mrb[23].mxu1  ;;  %v2956_v39 = vadd.f32 %v2955_v51, %v2954_v46 }
 0x66d   :  { %v3310_v45 = vpack.c.bf16 %v4743_v26, %v4740_v4  ;;  %v3000_v13 = vadd.f32 %v2999_v32, %v2998_v14 }
 0x66f   :  { %1521 = vrot.lane.b32.xlu1 %v1504_v21, %s3497_s12  ;;  %1529 = vrot.lane.b32.xlu0 %v1503_v10, %s3498_s13  ;;  %v4766_v11 = vadd.f32 %v3000_v13, %v2956_v39  ;;  %v4829_v13 = vrot.slane %v4730_v48, 4 }
 0x673   :  { %1531 = vrot.lane.b32.xlu1 %v1504_v21, %s3498_s13  ;;  %1539 = vrot.lane.b32.xlu0 %v1503_v10, %s3490_s17 }
 0x677   :  { %1541 = vrot.lane.b32.xlu1 %v1504_v21, %s3490_s17  ;;  %1555 = vrot.lane.b32.xlu0 %v1503_v10, %s3491_s18 }
 0x67b   :  { %1557 = vrot.lane.b32.xlu1 %v1504_v21, %s3491_s18  ;;  %1565 = vrot.lane.b32.xlu0 %v1503_v10, %s3499_s2 }
 0x67f   :  { %1567 = vrot.lane.b32.xlu1 %v1504_v21, %s3499_s2  ;;  %1575 = vrot.lane.b32.xlu0 %v1503_v10, %s3500_s14 }
 0x683   :  { %1577 = vrot.lane.b32.xlu1 %v1504_v21, %s3500_s14  ;;  %1585 = vrot.lane.b32.xlu0 %v1503_v10, %s3501_s22  ;;  %v5403_v10 = vld [vmem:[#allocation19_spill] sm:$0xff] }
 0x684   :  { %v4804_v57 = vrot.slane %v4730_v48, %v5403_v10  ;;  %v1507_v48 = vld [vmem:[%s5271_s1 + $0x80] sm:$0xff] }
 0x687   :  { %1587 = vrot.lane.b32.xlu1 %v1504_v21, %s3501_s22 }
 0x6d9   :  { %v1510_v35 = vpop.permute.xlu0 %1509 }
 0x6da   :  { %v1517_v0 = vmul.f32 %v4770_v60, %v1510_v35  ;;  %v1505_v35 = vld [vmem:[%s5271_s1 + $0x70] sm:$0xff] }
 0x6dd   :  { %v1512_v41 = vpop.permute.xlu1 %1511  ;;  %v1520_v6 = vpop.permute.xlu0 %1519 }
 0x6de   :  { %v1518_v38 = vmul.f32 %v4770_v60, %v1512_v41  ;;  %v1527_v9 = vmul.f32 %v4776_v59, %v1520_v6  ;;  %v1508_v41 = vld [vmem:[%s5271_s1 + $0x88] sm:$0xff] }
 0x6e0   :  { %v3298_v31 = vpack.c.bf16 %v1518_v38, %v1517_v0 }
 0x6e1   :  { %v1522_v8 = vpop.permute.xlu1 %1521  ;;  %v1530_v25 = vpop.permute.xlu0 %1529 }
 0x6e2   :  { %v1528_v2 = vmul.f32 %v4776_v59, %v1522_v8  ;;  %3299 = vmatpush1.bf16.msra.mxu0 %v3298_v31  ;;  %v1537_v49 = vmul.f32 %v4782_v29, %v1530_v25 }
 0x6e3   :  { %3300 = vmatprep.subr.bf16.mxu0 %v3495_v37 }
 0x6e4   :  { %v3301_v12 = vpack.c.bf16 %v1528_v2, %v1527_v9 }
 0x6e5   :  { %v1532_v63 = vpop.permute.xlu1 %1531  ;;  %v1540_v30 = vpop.permute.xlu0 %1539 }
 0x6e6   :  { %v1538_v40 = vmul.f32 %v4782_v29, %v1532_v63  ;;  %3302 = vmatpush1.bf16.msra.mxu0 %v3301_v12  ;;  %v1547_v53 = vmul.f32 %v4789_v42, %v1540_v30 }
 0x6e7   :  { %3303 = vmatprep.subr.bf16.mxu0 %v3495_v37 }
 0x6e8   :  { %v3304_v16 = vpack.c.bf16 %v1538_v40, %v1537_v49 }
 0x6e9   :  { %v1542_v22 = vpop.permute.xlu1 %1541  ;;  %v1556_v44 = vpop.permute.xlu0 %1555 }
 0x6ea   :  { %v1548_v23 = vmul.f32 %v4789_v42, %v1542_v22  ;;  %3305 = vmatpush1.bf16.msra.mxu0 %v3304_v16  ;;  %v1563_v55 = vmul.f32 %v4797_v52, %v1556_v44 }
 0x6eb   :  { %3306 = vmatprep.subr.bf16.mxu0 %v3495_v37 }
 0x6ec   :  { %v3307_v19 = vpack.c.bf16 %v1548_v23, %v1547_v53 }
 0x6ed   :  { %v1558_v15 = vpop.permute.xlu1 %1557  ;;  %v1566_v56 = vpop.permute.xlu0 %1565 }
 0x6ee   :  { %3308 = vmatpush1.bf16.msra.mxu0 %v3307_v19  ;;  %v1564_v33 = vmul.f32 %v4797_v52, %v1558_v15  ;;  %v1573_v47 = vmul.f32 %v4804_v57, %v1566_v56 }
 0x6ef   :  { %3309 = vmatprep.subr.bf16.mxu0 %v3495_v37 }
 0x6f0   :  { %v3313_v36 = vpack.c.bf16 %v1564_v33, %v1563_v55 }
 0x6f1   :  { %v1568_v50 = vpop.permute.xlu1 %1567  ;;  %v1576_v7 = vpop.permute.xlu0 %1575 }
 0x6f2   :  { %3311 = vmatpush1.bf16.msra.mxu0 %v3310_v45  ;;  %v1574_v21 = vmul.f32 %v4804_v57, %v1568_v50  ;;  %v1583_v45 = vmul.f32 %v4814_v27, %v1576_v7 }
 0x6f3   :  { %3312 = vmatprep.subr.bf16.mxu0 %v3495_v37 }
 0x6f4   :  { %v3316_v28 = vpack.c.bf16 %v1574_v21, %v1573_v47 }
 0x6f5   :  { %v1578_v18 = vpop.permute.xlu1 %1577  ;;  %v1586_v46 = vpop.permute.xlu0 %1585 }
 0x6f6   :  { %3314 = vmatpush1.bf16.msra.mxu0 %v3313_v36  ;;  %v1584_v4 = vmul.f32 %v4814_v27, %v1578_v18  ;;  %v1593_v32 = vmul.f32 %v4822_v34, %v1586_v46 }
 0x6f7   :  { %3315 = vmatprep.subr.bf16.mxu0 %v3495_v37 }
 0x6f8   :  { %v3319_v14 = vpack.c.bf16 %v1584_v4, %v1583_v45 }
 0x6f9   :  { %v1588_v26 = vpop.permute.xlu1 %1587 }
 0x6fa   :  { %3317 = vmatpush1.bf16.msra.mxu0 %v3316_v28  ;;  %v1594_v51 = vmul.f32 %v4822_v34, %v1588_v26 }
 0x6fb   :  { %3318 = vmatprep.subr.bf16.mxu0 %v3495_v37 }
 0x6fc   :  { %v3322_v39 = vpack.c.bf16 %v1594_v51, %v1593_v32 }
 0x6fe   :  { %3320 = vmatpush1.bf16.msra.mxu0 %v3319_v14 }
 0x6ff   :  { %3321 = vmatprep.subr.bf16.mxu0 %v3495_v37 }
 0x702   :  { %3323 = vmatpush1.bf16.msra.mxu0 %v3322_v39 }
 0x703   :  { %1642 = vmatprep.subr.mxu0 %v5396_v61 }
 0x706   :  { %2862 = vmatpush1.msk.msra.mxu0 %vm570_vm12, %v4829_v13 }
 0x707   :  { %1671 = vmatmul.mubr.f32.vlgmr.msra.gmra.mrb[20].mxu0 %v1505_v35  ;;  %3351 = vmatprep.subr.bf16.mxu0 %v3495_v37 }
 0x708   :  { %2864 = vmatprep.mubr.msk.f32.mxu0 %vm1597_vm15, %v1508_v41 }
 0x70b   :  { %1676 = vmatmul.mubr.f32.gmra.mrb[22].mxu0 %v1507_v48 }
 0x7da   :  { %v1672_v6 = vpop.f32.mrb[20].mxu0 }
 0x7db   :  { %v1673_v0 = vadd.f32 %v1672_v6, %v4764_v43  ;;  %v1674_v38 = vpop.f32.mrb[21].mxu0  ;;  %v1684_v43 = vld [vmem:[%s5271_s1 + $0x98] sm:$0xff] }
 0x7dc   :  { %2866 = vmatprep.mubr.msk.f32.mxu1 %vm1597_vm15, %v1684_v43 }
 0x7dd   :  { %v4846_v31 = vmax.f32 %v1673_v0, 0.0 }
 0x7de   :  { %v1677_v8 = vpop.f32.mrb[22].mxu0 }
 0x7df   :  { %v1678_v25 = vadd.f32 %v1677_v8, %v4766_v11  ;;  %v1679_v9 = vpop.f32.mrb[23].mxu0  ;;  %1687 = vrot.lane.b32.xlu0 %v4846_v31, %s3496_s11  ;;  %v1711_v4 = vmul.f32 %v4846_v31, %v4734_v62 }
 0x7e1   :  { %v4851_v2 = vmax.f32 %v1678_v25, 0.0 }
 0x7e3   :  { %1689 = vrot.lane.b32.xlu1 %v4851_v2, %s3496_s11  ;;  %1693 = vrot.lane.b32.xlu0 %v4846_v31, %s3497_s12  ;;  %v1712_v47 = vmul.f32 %v4851_v2, %v4734_v62 }
 0x7e5   :  { %v3337_v46 = vpack.c.bf16 %v1712_v47, %v1711_v4 }
 0x7e7   :  { %1695 = vrot.lane.b32.xlu1 %v4851_v2, %s3497_s12  ;;  %1699 = vrot.lane.b32.xlu0 %v4846_v31, %s3498_s13 }
 0x7eb   :  { %1701 = vrot.lane.b32.xlu1 %v4851_v2, %s3498_s13  ;;  %1705 = vrot.lane.b32.xlu0 %v4846_v31, %s3490_s17 }
 0x7ef   :  { %1707 = vrot.lane.b32.xlu1 %v4851_v2, %s3490_s17  ;;  %1713 = vrot.lane.b32.xlu0 %v4846_v31, %s3491_s18 }
 0x7f3   :  { %1715 = vrot.lane.b32.xlu1 %v4851_v2, %s3491_s18  ;;  %1719 = vrot.lane.b32.xlu0 %v4846_v31, %s3499_s2 }
 0x7f7   :  { %1721 = vrot.lane.b32.xlu1 %v4851_v2, %s3499_s2  ;;  %1725 = vrot.lane.b32.xlu0 %v4846_v31, %s3500_s14 }
 0x7fb   :  { %1727 = vrot.lane.b32.xlu1 %v4851_v2, %s3500_s14  ;;  %1731 = vrot.lane.b32.xlu0 %v4846_v31, %s3501_s22 }
 0x7ff   :  { %1733 = vrot.lane.b32.xlu1 %v4851_v2, %s3501_s22 }
 0x851   :  { %v1688_v11 = vpop.permute.xlu0 %1687 }
 0x852   :  { %v1691_v30 = vmul.f32 %v1688_v11, %v4770_v60 }
 0x855   :  { %v1690_v12 = vpop.permute.xlu1 %1689  ;;  %v1694_v63 = vpop.permute.xlu0 %1693 }
 0x856   :  { %v1692_v49 = vmul.f32 %v1690_v12, %v4770_v60  ;;  %v1697_v44 = vmul.f32 %v1694_v63, %v4776_v59  ;;  %v1683_v63 = vld [vmem:[%s5271_s1 + $0x90] sm:$0xff] }
 0x858   :  { %v3325_v40 = vpack.c.bf16 %v1692_v49, %v1691_v30  ;;  %v1686_v30 = vld [vmem:[%s5271_s1 + $0xa8] sm:$0xff]  ;;  %v1685_v49 = vld [vmem:[%s5271_s1 + $0xa0] sm:$0xff] }
 0x859   :  { %v1696_v16 = vpop.permute.xlu1 %1695  ;;  %v1700_v22 = vpop.permute.xlu0 %1699 }
 0x85a   :  { %v1698_v53 = vmul.f32 %v1696_v16, %v4776_v59  ;;  %3326 = vmatpush1.bf16.msra.mxu1 %v3325_v40  ;;  %v1703_v56 = vmul.f32 %v1700_v22, %v4782_v29 }
 0x85b   :  { %3327 = vmatprep.subr.bf16.mxu1 %v3495_v37 }
 0x85c   :  { %v3328_v23 = vpack.c.bf16 %v1698_v53, %v1697_v44 }
 0x85d   :  { %v1702_v19 = vpop.permute.xlu1 %1701  ;;  %v1706_v15 = vpop.permute.xlu0 %1705 }
 0x85e   :  { %v1704_v33 = vmul.f32 %v1702_v19, %v4782_v29  ;;  %3329 = vmatpush1.bf16.msra.mxu1 %v3328_v23  ;;  %v1709_v21 = vmul.f32 %v1706_v15, %v4789_v42 }
 0x85f   :  { %3330 = vmatprep.subr.bf16.mxu1 %v3495_v37 }
 0x860   :  { %v3331_v50 = vpack.c.bf16 %v1704_v33, %v1703_v56  ;;  %v1821_v33 = vld [vmem:[%s5271_s1 + $0xb8] sm:$0xff] }
 0x861   :  { %v1708_v55 = vpop.permute.xlu1 %1707  ;;  %v1714_v36 = vpop.permute.xlu0 %1713  ;;  %2869 = vmatprep.mubr.msk.f32.mxu0 %vm1597_vm15, %v1821_v33  ;;  %v1820_v33 = vld [vmem:[%s5271_s1 + $0xb0] sm:$0xff] }
 0x862   :  { %v1710_v7 = vmul.f32 %v1708_v55, %v4789_v42  ;;  %3332 = vmatpush1.bf16.msra.mxu1 %v3331_v50  ;;  %v1717_v51 = vmul.f32 %v1714_v36, %v4797_v52 }
 0x863   :  { %3333 = vmatprep.subr.bf16.mxu1 %v3495_v37 }
 0x864   :  { %v3334_v18 = vpack.c.bf16 %v1710_v7, %v1709_v21 }
 0x865   :  { %v1716_v28 = vpop.permute.xlu1 %1715  ;;  %v1720_v26 = vpop.permute.xlu0 %1719 }
 0x866   :  { %3335 = vmatpush1.bf16.msra.mxu1 %v3334_v18  ;;  %v1718_v45 = vmul.f32 %v1716_v28, %v4797_v52  ;;  %v1723_v48 = vmul.f32 %v1720_v26, %v4804_v57 }
 0x867   :  { %3336 = vmatprep.subr.bf16.mxu1 %v3495_v37 }
 0x868   :  { %v3340_v32 = vpack.c.bf16 %v1718_v45, %v1717_v51 }
 0x869   :  { %v1722_v14 = vpop.permute.xlu1 %1721  ;;  %v1726_v35 = vpop.permute.xlu0 %1725 }
 0x86a   :  { %3338 = vmatpush1.bf16.msra.mxu1 %v3337_v46  ;;  %v1724_v39 = vmul.f32 %v1722_v14, %v4804_v57  ;;  %v1729_v8 = vmul.f32 %v1726_v35, %v4814_v27 }
 0x86b   :  { %3339 = vmatprep.subr.bf16.mxu1 %v3495_v37 }
 0x86c   :  { %v3343_v6 = vpack.c.bf16 %v1724_v39, %v1723_v48 }
 0x86d   :  { %v1728_v41 = vpop.permute.xlu1 %1727  ;;  %v1732_v25 = vpop.permute.xlu0 %1731 }
 0x86e   :  { %3341 = vmatpush1.bf16.msra.mxu1 %v3340_v32  ;;  %v1730_v0 = vmul.f32 %v1728_v41, %v4814_v27  ;;  %v1735_v11 = vmul.f32 %v4822_v34, %v1732_v25 }
 0x86f   :  { %3342 = vmatprep.subr.bf16.mxu1 %v3495_v37 }
 0x870   :  { %v3346_v9 = vpack.c.bf16 %v1730_v0, %v1729_v8 }
 0x871   :  { %v1734_v38 = vpop.permute.xlu1 %1733 }
 0x872   :  { %3344 = vmatpush1.bf16.msra.mxu1 %v3343_v6  ;;  %v1736_v43 = vmul.f32 %v4822_v34, %v1734_v38 }
 0x873   :  { %3345 = vmatprep.subr.bf16.mxu1 %v3495_v37 }
 0x874   :  { %v3349_v12 = vpack.c.bf16 %v1736_v43, %v1735_v11 }
 0x876   :  { %3347 = vmatpush1.bf16.msra.mxu1 %v3346_v9 }
 0x877   :  { %3348 = vmatprep.subr.bf16.mxu1 %v3495_v37 }
 0x87a   :  { %3350 = vmatpush1.bf16.msra.mxu1 %v3349_v12 }
 0x87b   :  { %1779 = vmatprep.subr.mxu1 %v5396_v61 }
 0x87e   :  { %2865 = vmatpush1.msk.msra.mxu1 %vm570_vm12, %v4829_v13 }
 0x87f   :  { %1808 = vmatmul.mubr.f32.vlgmr.msra.gmra.mrb[24].mxu1 %v1683_v63  ;;  %3378 = vmatprep.subr.bf16.mxu1 %v3495_v37 }
 0x880   :  { %2867 = vmatprep.mubr.msk.f32.mxu1 %vm1597_vm15, %v1686_v30 }
 0x883   :  { %1813 = vmatmul.mubr.f32.gmra.mrb[26].mxu1 %v1685_v49 }
 0x952   :  { %v1809_v40 = vpop.f32.mrb[24].mxu1 }
 0x953   :  { %v1818_v16 = vmax.f32 %v1809_v40, 0.0  ;;  %v1811_v22 = vpop.f32.mrb[25].mxu1 }
 0x955   :  { %1824 = vrot.lane.b32.xlu0 %v1818_v16, %s3496_s11  ;;  %v1848_v19 = vmul.f32 %v1818_v16, %v4734_v62 }
 0x956   :  { %v1814_v44 = vpop.f32.mrb[26].mxu1 }
 0x957   :  { %v1819_v53 = vmax.f32 %v1814_v44, 0.0  ;;  %v1816_v23 = vpop.f32.mrb[27].mxu1 }
 0x959   :  { %1830 = vrot.lane.b32.xlu0 %v1818_v16, %s3497_s12  ;;  %1826 = vrot.lane.b32.xlu1 %v1819_v53, %s3496_s11  ;;  %v1849_v15 = vmul.f32 %v1819_v53, %v4734_v62 }
 0x95b   :  { %v3364_v56 = vpack.c.bf16 %v1849_v15, %v1848_v19 }
 0x95d   :  { %1836 = vrot.lane.b32.xlu0 %v1818_v16, %s3498_s13  ;;  %1832 = vrot.lane.b32.xlu1 %v1819_v53, %s3497_s12 }
 0x961   :  { %1842 = vrot.lane.b32.xlu0 %v1818_v16, %s3490_s17  ;;  %1838 = vrot.lane.b32.xlu1 %v1819_v53, %s3498_s13 }
 0x965   :  { %1850 = vrot.lane.b32.xlu0 %v1818_v16, %s3491_s18  ;;  %1844 = vrot.lane.b32.xlu1 %v1819_v53, %s3490_s17 }
 0x969   :  { %1856 = vrot.lane.b32.xlu0 %v1818_v16, %s3499_s2  ;;  %1852 = vrot.lane.b32.xlu1 %v1819_v53, %s3491_s18 }
 0x96d   :  { %1862 = vrot.lane.b32.xlu0 %v1818_v16, %s3500_s14  ;;  %1858 = vrot.lane.b32.xlu1 %v1819_v53, %s3499_s2 }
 0x971   :  { %1868 = vrot.lane.b32.xlu0 %v1818_v16, %s3501_s22  ;;  %1864 = vrot.lane.b32.xlu1 %v1819_v53, %s3500_s14 }
 0x975   :  { %1870 = vrot.lane.b32.xlu1 %v1819_v53, %s3501_s22 }
 0x9c7   :  { %v1825_v50 = vpop.permute.xlu0 %1824 }
 0x9c8   :  { %v1828_v21 = vmul.f32 %v1825_v50, %v4770_v60  ;;  %v1823_v50 = vld [vmem:[%s5271_s1 + $0xc8] sm:$0xff] }
 0x9cb   :  { %v1831_v55 = vpop.permute.xlu0 %1830  ;;  %v1827_v36 = vpop.permute.xlu1 %1826 }
 0x9cc   :  { %v1829_v7 = vmul.f32 %v1827_v36, %v4770_v60  ;;  %v1834_v4 = vmul.f32 %v1831_v55, %v4776_v59  ;;  %v1822_v55 = vld [vmem:[%s5271_s1 + $0xc0] sm:$0xff] }
 0x9ce   :  { %v3352_v18 = vpack.c.bf16 %v1829_v7, %v1828_v21 }
 0x9cf   :  { %v1837_v47 = vpop.permute.xlu0 %1836  ;;  %v1833_v28 = vpop.permute.xlu1 %1832 }
 0x9d0   :  { %v1835_v26 = vmul.f32 %v1833_v28, %v4776_v59  ;;  %3353 = vmatpush1.bf16.msra.mxu0 %v3352_v18  ;;  %v1840_v51 = vmul.f32 %v1837_v47, %v4782_v29 }
 0x9d1   :  { %3354 = vmatprep.subr.bf16.mxu0 %v3495_v37 }
 0x9d2   :  { %v3355_v45 = vpack.c.bf16 %v1835_v26, %v1834_v4 }
 0x9d3   :  { %v1843_v46 = vpop.permute.xlu0 %1842  ;;  %v1839_v14 = vpop.permute.xlu1 %1838 }
 0x9d4   :  { %v1841_v32 = vmul.f32 %v1839_v14, %v4782_v29  ;;  %3356 = vmatpush1.bf16.msra.mxu0 %v3355_v45  ;;  %v1846_v48 = vmul.f32 %v1843_v46, %v4789_v42 }
 0x9d5   :  { %3357 = vmatprep.subr.bf16.mxu0 %v3495_v37 }
 0x9d6   :  { %v3358_v39 = vpack.c.bf16 %v1841_v32, %v1840_v51 }
 0x9d7   :  { %v1851_v35 = vpop.permute.xlu0 %1850  ;;  %v1845_v41 = vpop.permute.xlu1 %1844 }
 0x9d8   :  { %v1847_v6 = vmul.f32 %v1845_v41, %v4789_v42  ;;  %3359 = vmatpush1.bf16.msra.mxu0 %v3358_v39  ;;  %v1854_v43 = vmul.f32 %v1851_v35, %v4797_v52 }
 0x9d9   :  { %3360 = vmatprep.subr.bf16.mxu0 %v3495_v37 }
 0x9da   :  { %v3361_v0 = vpack.c.bf16 %v1847_v6, %v1846_v48 }
 0x9db   :  { %v1853_v38 = vpop.permute.xlu1 %1852  ;;  %v1857_v8 = vpop.permute.xlu0 %1856 }
 0x9dc   :  { %3362 = vmatpush1.bf16.msra.mxu0 %v3361_v0  ;;  %v1855_v25 = vmul.f32 %v1853_v38, %v4797_v52  ;;  %v1860_v49 = vmul.f32 %v1857_v8, %v4804_v57 }
 0x9dd   :  { %3363 = vmatprep.subr.bf16.mxu0 %v3495_v37 }
 0x9de   :  { %v3367_v11 = vpack.c.bf16 %v1855_v25, %v1854_v43 }
 0x9df   :  { %v1859_v9 = vpop.permute.xlu1 %1858  ;;  %v1863_v63 = vpop.permute.xlu0 %1862 }
 0x9e0   :  { %3365 = vmatpush1.bf16.msra.mxu0 %v3364_v56  ;;  %v1861_v12 = vmul.f32 %v1859_v9, %v4804_v57  ;;  %v1866_v44 = vmul.f32 %v1863_v63, %v4814_v27 }
 0x9e1   :  { %3366 = vmatprep.subr.bf16.mxu0 %v3495_v37 }
 0x9e2   :  { %v3370_v40 = vpack.c.bf16 %v1861_v12, %v1860_v49 }
 0x9e3   :  { %v1865_v30 = vpop.permute.xlu1 %1864  ;;  %v1869_v53 = vpop.permute.xlu0 %1868 }
 0x9e4   :  { %3368 = vmatpush1.bf16.msra.mxu0 %v3367_v11  ;;  %v1867_v16 = vmul.f32 %v1865_v30, %v4814_v27  ;;  %v1872_v15 = vmul.f32 %v4822_v34, %v1869_v53 }
 0x9e5   :  { %3369 = vmatprep.subr.bf16.mxu0 %v3495_v37 }
 0x9e6   :  { %v3373_v23 = vpack.c.bf16 %v1867_v16, %v1866_v44 }
 0x9e7   :  { %v1871_v22 = vpop.permute.xlu1 %1870 }
 0x9e8   :  { %3371 = vmatpush1.bf16.msra.mxu0 %v3370_v40  ;;  %v1873_v19 = vmul.f32 %v4822_v34, %v1871_v22 }
 0x9e9   :  { %3372 = vmatprep.subr.bf16.mxu0 %v3495_v37 }
 0x9ea   :  { %v3376_v56 = vpack.c.bf16 %v1873_v19, %v1872_v15 }
 0x9ec   :  { %3374 = vmatpush1.bf16.msra.mxu0 %v3373_v23 }
 0x9ed   :  { %3375 = vmatprep.subr.bf16.mxu0 %v3495_v37 }
 0x9f0   :  { %3377 = vmatpush1.bf16.msra.mxu0 %v3376_v56 }
 0x9f1   :  { %1916 = vmatprep.subr.mxu0 %v5396_v61 }
 0x9f4   :  { %2868 = vmatpush1.msk.msra.mxu0 %vm570_vm12, %v4829_v13 }
 0x9f5   :  { %1945 = vmatmul.mubr.f32.vlgmr.msra.gmra.mrb[24].mxu0 %v1820_v33  ;;  %3051 = vmatprep.subr.mxu0 %v5396_v61 }
 0x9f6   :  { %2870 = vmatprep.mubr.msk.f32.mxu0 %vm1597_vm15, %v1823_v50 }
 0x9f9   :  { %1950 = vmatmul.mubr.f32.gmra.mrb[26].mxu0 %v1822_v55 }
 0x9fa   :  { %3053 = vmatprep.mubr.msk.f32.mxu0 %vm3502_vm1, %v5396_v61 }
 0xac8   :  { %v1946_v36 = vpop.f32.mrb[24].mxu0 }
 0xac9   :  { %v1947_v21 = vadd.f32 %v1946_v36, %v4846_v31  ;;  %v1948_v7 = vpop.f32.mrb[25].mxu0  ;;  %v1958_v31 = vld [vmem:[%s5271_s1 + $0xd8] sm:$0xff] }
 0xaca   :  { %2872 = vmatprep.mubr.msk.f32.mxu1 %vm1597_vm15, %v1958_v31 }
 0xacb   :  { %v1955_v18 = vmax.f32 %v1947_v21, 0.0 }
 0xacc   :  { %v1951_v47 = vpop.f32.mrb[26].mxu0 }
 0xacd   :  { %v1952_v28 = vadd.f32 %v1951_v47, %v4851_v2  ;;  %v1953_v4 = vpop.f32.mrb[27].mxu0  ;;  %1961 = vrot.lane.b32.xlu0 %v1955_v18, %s3496_s11  ;;  %v1985_v45 = vmul.f32 %v1955_v18, %v4734_v62 }
 0xacf   :  { %v1956_v26 = vmax.f32 %v1952_v28, 0.0 }
 0xad1   :  { %1963 = vrot.lane.b32.xlu1 %v1956_v26, %s3496_s11  ;;  %1967 = vrot.lane.b32.xlu0 %v1955_v18, %s3497_s12  ;;  %v1986_v46 = vmul.f32 %v1956_v26, %v4734_v62 }
 0xad3   :  { %v3391_v14 = vpack.c.bf16 %v1986_v46, %v1985_v45  ;;  %v1957_v46 = vld [vmem:[%s5271_s1 + $0xd0] sm:$0xff] }
 0xad5   :  { %1969 = vrot.lane.b32.xlu1 %v1956_v26, %s3497_s12  ;;  %1973 = vrot.lane.b32.xlu0 %v1955_v18, %s3498_s13 }
 0xad9   :  { %1975 = vrot.lane.b32.xlu1 %v1956_v26, %s3498_s13  ;;  %1979 = vrot.lane.b32.xlu0 %v1955_v18, %s3490_s17 }
 0xadd   :  { %1981 = vrot.lane.b32.xlu1 %v1956_v26, %s3490_s17  ;;  %1987 = vrot.lane.b32.xlu0 %v1955_v18, %s3491_s18 }
 0xae1   :  { %1989 = vrot.lane.b32.xlu1 %v1956_v26, %s3491_s18  ;;  %1993 = vrot.lane.b32.xlu0 %v1955_v18, %s3499_s2 }
 0xae5   :  { %1995 = vrot.lane.b32.xlu1 %v1956_v26, %s3499_s2  ;;  %1999 = vrot.lane.b32.xlu0 %v1955_v18, %s3500_s14 }
 0xae9   :  { %2001 = vrot.lane.b32.xlu1 %v1956_v26, %s3500_s14  ;;  %2005 = vrot.lane.b32.xlu0 %v1955_v18, %s3501_s22 }
 0xaed   :  { %2007 = vrot.lane.b32.xlu1 %v1956_v26, %s3501_s22 }
 0xb3f   :  { %v1962_v2 = vpop.permute.xlu0 %1961 }
 0xb40   :  { %v1965_v39 = vmul.f32 %v1962_v2, %v4770_v60 }
 0xb43   :  { %v1964_v51 = vpop.permute.xlu1 %1963  ;;  %v1968_v32 = vpop.permute.xlu0 %1967 }
 0xb44   :  { %v1966_v35 = vmul.f32 %v1964_v51, %v4770_v60  ;;  %v1971_v0 = vmul.f32 %v1968_v32, %v4776_v59  ;;  %v1960_v51 = vld [vmem:[%s5271_s1 + $0xe8] sm:$0xff]  ;;  %v1959_v32 = vld [vmem:[%s5271_s1 + $0xe0] sm:$0xff] }
 0xb46   :  { %v3379_v41 = vpack.c.bf16 %v1966_v35, %v1965_v39  ;;  %v5064_v39 = vld [vmem:[%s5273_s3 + $0x9] sm:$0x3] }
 0xb47   :  { %v1970_v48 = vpop.permute.xlu1 %1969  ;;  %v1974_v6 = vpop.permute.xlu0 %1973  ;;  %3052 = vmatpush3.xpose.msra.mxu0 %v5064_v39 }
 0xb48   :  { %v1972_v38 = vmul.f32 %v1970_v48, %v4776_v59  ;;  %3380 = vmatpush1.bf16.msra.mxu1 %v3379_v41  ;;  %v1977_v43 = vmul.f32 %v1974_v6, %v4782_v29  ;;  %3056 = vmatprep.subr.mxu0 %v5396_v61 }
 0xb49   :  { %3381 = vmatprep.subr.bf16.mxu1 %v3495_v37 }
 0xb4a   :  { %v3382_v8 = vpack.c.bf16 %v1972_v38, %v1971_v0 }
 0xb4b   :  { %v1976_v25 = vpop.permute.xlu1 %1975  ;;  %v1980_v9 = vpop.permute.xlu0 %1979 }
 0xb4c   :  { %v1978_v11 = vmul.f32 %v1976_v25, %v4782_v29  ;;  %3383 = vmatpush1.bf16.msra.mxu1 %v3382_v8  ;;  %v1983_v49 = vmul.f32 %v1980_v9, %v4789_v42 }
 0xb4d   :  { %3384 = vmatprep.subr.bf16.mxu1 %v3495_v37 }
 0xb4e   :  { %v3385_v12 = vpack.c.bf16 %v1978_v11, %v1977_v43 }
 0xb4f   :  { %v1982_v63 = vpop.permute.xlu1 %1981  ;;  %v1988_v30 = vpop.permute.xlu0 %1987 }
 0xb50   :  { %v1984_v40 = vmul.f32 %v1982_v63, %v4789_v42  ;;  %3386 = vmatpush1.bf16.msra.mxu1 %v3385_v12  ;;  %v1991_v19 = vmul.f32 %v1988_v30, %v4797_v52 }
 0xb51   :  { %3387 = vmatprep.subr.bf16.mxu1 %v3495_v37 }
 0xb52   :  { %v3388_v16 = vpack.c.bf16 %v1984_v40, %v1983_v49 }
 0xb53   :  { %v1990_v22 = vpop.permute.xlu1 %1989  ;;  %v1994_v44 = vpop.permute.xlu0 %1993 }
 0xb54   :  { %3389 = vmatpush1.bf16.msra.mxu1 %v3388_v16  ;;  %v1992_v53 = vmul.f32 %v1990_v22, %v4797_v52  ;;  %v1997_v55 = vmul.f32 %v1994_v44, %v4804_v57 }
 0xb55   :  { %3390 = vmatprep.subr.bf16.mxu1 %v3495_v37 }
 0xb56   :  { %v3394_v15 = vpack.c.bf16 %v1992_v53, %v1991_v19  ;;  %v2264_v53 = vld [vmem:[%s5271_s1 + $0x100] sm:$0xf0] }
 0xb57   :  { %v1996_v23 = vpop.permute.xlu1 %1995  ;;  %v2000_v33 = vpop.permute.xlu0 %1999  ;;  %v2354_v19 = vrot.slane %v2264_v53, 4 }
 0xb58   :  { %3392 = vmatpush1.bf16.msra.mxu1 %v3391_v14  ;;  %v1998_v56 = vmul.f32 %v1996_v23, %v4804_v57  ;;  %v2003_v18 = vmul.f32 %v2000_v33, %v4814_v27  ;;  %v2265_v23 = vld [vmem:[%s5271_s1 + $0x110] sm:$0xf]  ;;  %v3504_v33 = vmov 4  }
 0xb59   :  { %3393 = vmatprep.subr.bf16.mxu1 %v3495_v37  ;;  %3455 = vset.pattern.permute.xlu1 %v3504_v33 }
 0xb5a   :  { %v3397_v36 = vpack.c.bf16 %v1998_v56, %v1997_v55 }
 0xb5b   :  { %v2002_v50 = vpop.permute.xlu1 %2001  ;;  %v2006_v47 = vpop.permute.xlu0 %2005 }
 0xb5c   :  { %3395 = vmatpush1.bf16.msra.mxu1 %v3394_v15  ;;  %v2004_v21 = vmul.f32 %v2002_v50, %v4814_v27  ;;  %v2009_v26 = vmul.f32 %v4822_v34, %v2006_v47  ;;  %v2355_v15 = vrot.slane %v2265_v23, 4 }
 0xb5d   :  { %3396 = vmatprep.subr.bf16.mxu1 %v3495_v37 }
 0xb5e   :  { %v3400_v28 = vpack.c.bf16 %v2004_v21, %v2003_v18  ;;  %v2356_v56 = vsel %vm2353_vm3, %v2354_v19, %v2355_v15 }
 0xb5f   :  { %v2008_v7 = vpop.permute.xlu1 %2007 }
 0xb60   :  { %3398 = vmatpush1.bf16.msra.mxu1 %v3397_v36  ;;  %v2010_v4 = vmul.f32 %v4822_v34, %v2008_v7 }
 0xb61   :  { %3399 = vmatprep.subr.bf16.mxu1 %v3495_v37 }
 0xb62   :  { %v3403_v45 = vpack.c.bf16 %v2010_v4, %v2009_v26 }
 0xb64   :  { %3401 = vmatpush1.bf16.msra.mxu1 %v3400_v28 }
 0xb65   :  { %3402 = vmatprep.subr.bf16.mxu1 %v3495_v37 }
 0xb68   :  { %3404 = vmatpush1.bf16.msra.mxu1 %v3403_v45 }
 0xb69   :  { %2053 = vmatprep.subr.mxu1 %v5396_v61 }
 0xb6c   :  { %2871 = vmatpush1.msk.msra.mxu1 %vm570_vm12, %v4829_v13 }
 0xb6d   :  { %2082 = vmatmul.mubr.f32.vlgmr.msra.gmra.mrb[28].mxu1 %v1957_v46  ;;  %3405 = vmatprep.subr.bf16.mxu1 %v3495_v37 }
 0xb6e   :  { %2873 = vmatprep.mubr.msk.f32.mxu1 %vm1597_vm15, %v1960_v51 }
 0xb71   :  { %2087 = vmatmul.mubr.f32.gmra.mrb[30].mxu1 %v1959_v32 }
 0xb72   :  { %3048 = vmatprep.mubr.msk.f32.mxu1 %vm3502_vm1, %v5396_v61 }
 0xc40   :  { %v2083_v14 = vpop.f32.mrb[28].mxu1 }
 0xc41   :  { %v2092_v31 = vmax.f32 %v2083_v14, 0.0  ;;  %v2085_v2 = vpop.f32.mrb[29].mxu1 }
 0xc43   :  { %2097 = vrot.lane.b32.xlu1 %v2092_v31, %s3497_s12  ;;  %2094 = vrot.lane.b32.xlu0 %v2092_v31, %s3496_s11  ;;  %v2106_v63 = vmul.f32 %v2092_v31, %v4734_v62 }
 0xc47   :  { %2103 = vrot.lane.b32.xlu1 %v2092_v31, %s3490_s17  ;;  %2100 = vrot.lane.b32.xlu0 %v2092_v31, %s3498_s13 }
 0xc4b   :  { %2110 = vrot.lane.b32.xlu1 %v2092_v31, %s3499_s2  ;;  %2107 = vrot.lane.b32.xlu0 %v2092_v31, %s3491_s18 }
 0xc4f   :  { %2116 = vrot.lane.b32.xlu1 %v2092_v31, %s3501_s22  ;;  %2113 = vrot.lane.b32.xlu0 %v2092_v31, %s3500_s14 }
 0xc53   :  { %2347 = vperm.xlu1 %3455, %v2264_v53  }
 0xc57   :  { %2351 = vperm.xlu1 %3455, %v2265_v23  }
 0xcb5   :  { %v2098_v35 = vpop.permute.xlu1 %2097  ;;  %v2095_v41 = vpop.permute.xlu0 %2094 }
 0xcb6   :  { %v2099_v48 = vmul.f32 %v2098_v35, %v4776_v59  ;;  %v2096_v6 = vmul.f32 %v2095_v41, %v4770_v60  ;;  %v2724_v35 = vld [vmem:[%s5271_s1 + $0x110] sm:$0xe0]  ;;  %v2725_v41 = vld [vmem:[%s5271_s1 + $0x120] sm:$0x7f] }
 0xcb8   :  { %v3406_v0 = vpack.c.bf16 %v2099_v48, %v2096_v6  ;;  %v2730_v48 = vrot.slane %v2724_v35, 5  ;;  %v2731_v6 = vrot.slane %v2725_v41, 5 }
 0xcb9   :  { %v2104_v38 = vpop.permute.xlu1 %2103  ;;  %v2101_v8 = vpop.permute.xlu0 %2100 }
 0xcba   :  { %v2105_v25 = vmul.f32 %v2104_v38, %v4789_v42  ;;  %v2102_v9 = vmul.f32 %v2101_v8, %v4782_v29  ;;  %3407 = vmatpush3.bf16.msra.mxu1 %v3406_v0  ;;  %v2732_v0 = vsel %vm2729_vm5, %v2730_v48, %v2731_v6 }
 0xcbb   :  { %3408 = vmatprep.subr.bf16.mxu1 %v3495_v37  ;;  %v3428_v38 = vpack.c.bf16 %v2731_v6, %v2732_v0 }
 0xcbc   :  { %v3409_v43 = vpack.c.bf16 %v2105_v25, %v2102_v9  ;;  %v2521_v9 = vld [vmem:[%s5275_s5] sm:$0xff] }
 0xcbd   :  { %v2111_v11 = vpop.permute.xlu1 %2110  ;;  %v2108_v12 = vpop.permute.xlu0 %2107 }
 0xcbe   :  { %v2109_v30 = vmul.f32 %v2108_v12, %v4797_v52  ;;  %3410 = vmatpush3.bf16.msra.mxu1 %v3409_v43  ;;  %v2112_v42 = vmul.f32 %v2111_v11, %v4804_v57  ;;  %v2093_v52 = vld [vmem:[%s5271_s1 + $0xf0] sm:$0xff]  ;;  %v2522_v43 = vld [vmem:[%s5275_s5 + $0x8] sm:$0xff]  ;;  %v2882_v11 = vld [vmem:[%s5275_s5 + $0x20] sm:$0xff] }
 0xcbf   :  { %3411 = vmatprep.subr.bf16.mxu1 %v3495_v37  ;;  %v2883_v12 = vld [vmem:[%s5275_s5 + $0x28] sm:$0xff] }
 0xcc0   :  { %v3412_v60 = vpack.c.bf16 %v2109_v30, %v2106_v63 }
 0xcc1   :  { %v2117_v59 = vpop.permute.xlu1 %2116  ;;  %v2114_v49 = vpop.permute.xlu0 %2113 }
 0xcc2   :  { %v2115_v29 = vmul.f32 %v2114_v49, %v4814_v27  ;;  %3413 = vmatpush3.bf16.msra.mxu1 %v3412_v60  ;;  %v2118_v40 = vmul.f32 %v4822_v34, %v2117_v59  ;;  %v2886_v59 = vld [vmem:[%s5275_s5 + $0x40] sm:$0xff]  ;;  %v2887_v49 = vld [vmem:[%s5275_s5 + $0x48] sm:$0xff] }
 0xcc3   :  { %3414 = vmatprep.subr.bf16.mxu1 %v3495_v37 }
 0xcc4   :  { %v3415_v16 = vpack.c.bf16 %v2115_v29, %v2112_v42  ;;  %v3418_v62 = vpack.c.bf16 %v4829_v13, %v2118_v40  ;;  %v3503_v13 = vmov 8  }
 0xcc5   :  { %3454 = vset.pattern.permute.xlu0 %v3503_v13  ;;  %v2884_v13 = vld [vmem:[%s5275_s5 + $0x30] sm:$0xff] }
 0xcc6   :  { %3416 = vmatpush3.bf16.msra.mxu1 %v3415_v16  ;;  %2268 = vperm.xlu0 %3454, %v2263_v3  }
 0xcc7   :  { %3417 = vmatprep.subr.bf16.mxu1 %v3495_v37 }
 0xcca   :  { %3420 = vmatpush3.bf16.msk.msra.mxu1 %vm4039_vm13, %v3418_v62  ;;  %3456 = vset.pattern.permute.xlu0 %v3504_v33 }
 0xccb   :  { %3427 = vmatprep.subr.bf16.mxu1 %v3495_v37 }
 0xccd   :  { %3049 = vmatmul.mubr.msk.f32.vlgmr.msra.gmra.mrb[30].mxu1 %vm566_vm14, %v2093_v52  ;;  %v2523_v52 = vld [vmem:[%s5275_s5 + $0x10] sm:$0xff] }
 0xcce   :  { %3086 = vmatprep.mubr.msk.f32.mxu1 %vm3502_vm1, %v5396_v61 }
 0xcd2   :  { %v2348_v18 = vpop.permute.xlu1 %2347 }
 0xcd3   :  { %v2357_v28 = vrot.slane %v2348_v18, 4  ;;  %3430 = vmatpush3.bf16.xpose.msk.msra.mxu1 %vm3429_vm7, %v3428_v38  ;;  %v2896_v38 = vld [vmem:[%s5275_s5 + $0x90] sm:$0xff] }
 0xcd6   :  { %v2352_v47 = vpop.permute.xlu1 %2351 }
 0xcd7   :  { %v2358_v4 = vrot.slane %v2352_v47, 4 }
 0xcd9   :  { %v2359_v26 = vsel %vm2353_vm3, %v2357_v28, %v2358_v4 }
 0xd45   :  { %v2269_v50 = vpop.permute.xlu0 %2268 }
 0xda0   :  { %v5093_v57 = vpop.f32.mrb[30].mxu1 }
 0xda1   :  { %v2192_v27 = vmax.f32 %v5093_v57, 0.0  ;;  %v3050_v34 = vpop.f32.mrb[31].mxu1 }
 0xda3   :  { %3054 = vmatmul.mubr.f32.vlgmr.msra.gmra.mrb[28].mxu0 %v2192_v27 }
 0xda4   :  { %3058 = vmatprep.mubr.msk.f32.mxu0 %vm3502_vm1, %v5396_v61 }
 0xe76   :  { %v2259_v22 = vpop.f32.mrb[28].mxu0 }
 0xe77   :  { %v3055_v44 = vpop.f32.mrb[29].mxu0  ;;  %3057 = vmatpush3.msra.mxu0 %v2259_v22  ;;  %v2894_v22 = vld [vmem:[%s5275_s5 + $0x80] sm:$0xff] }
 0xe78   :  { %3059 = vmatmul.mubr.msk.f32.vlgmr.msra.gmra.mrb[30].mxu0 %vm2271_vm2, %v2263_v3  ;;  %3061 = vmatprep.subr.mxu0 %v5396_v61  ;;  %v2524_v3 = vld [vmem:[%s5275_s5 + $0x18] sm:$0xff]  ;;  %v2895_v44 = vld [vmem:[%s5275_s5 + $0x88] sm:$0xff] }
 0xe79   :  { %3063 = vmatprep.mubr.msk.f32.mxu0 %vm3502_vm1, %v5396_v61 }
 0xf4b   :  { %v2340_v55 = vpop.f32.mrb[30].mxu0 }
 0xf4c   :  { %v2341_v36 = vadd.f32 %v2340_v55, %v2269_v50  ;;  %v3060_v21 = vpop.f32.mrb[31].mxu0  ;;  %v2888_v55 = vld [vmem:[%s5275_s5 + $0x50] sm:$0xff] }
 0xf4e   :  { %v2344_v7 = vmax.f32 %v2341_v36, 0.0  ;;  %v2889_v36 = vld [vmem:[%s5275_s5 + $0x58] sm:$0xff] }
 0xf50   :  { %3062 = vmatpush3.msk.msra.mxu0 %vm2353_vm3, %v2344_v7 }
 0xf51   :  { %3064 = vmatmul.mubr.msk.f32.vlgmr.msra.gmra.mrb[32].mxu0 %vm2361_vm4, %v2356_v56  ;;  %3066 = vmatprep.subr.mxu0 %v5396_v61 }
 0xf52   :  { %3067 = vmatpush3.msk.msra.mxu0 %vm112_vm0, %v5064_v39  ;;  %3068 = vmatprep.mubr.msk.f32.mxu0 %vm3502_vm1, %v5396_v61  ;;  %vm2443_vm0 = vcmask 15360  }
 0xf53   :  { %3421 = vmatprep.subr.bf16.mxu0 %v3495_v37 }
0x1024   :  { %v2433_v45 = vpop.f32.mrb[32].mxu0 }
0x1025   :  { %v2434_v46 = vadd.f32 %v2433_v45, %v2359_v26  ;;  %v3065_v14 = vpop.f32.mrb[33].mxu0  ;;  %v2892_v45 = vld [vmem:[%s5275_s5 + $0x70] sm:$0xff] }
0x1026   :  { %v2902_v14 = vld [vmem:[%s5275_s5 + $0xc0] sm:$0xff] }
0x1027   :  { %v2879_v31 = vmul.f32 -1.442695, %v2434_v46  ;;  %v2893_v46 = vld [vmem:[%s5275_s5 + $0x78] sm:$0xff] }
0x1029   :  { %3457 = vpow2.f32 %v2879_v31  ;;  %v2903_v31 = vld [vmem:[%s5275_s5 + $0xc8] sm:$0xff] }
0x1033   :  { %v3458_v2 = vpop.eup %3457 }
0x1034   :  { %v2440_v51 = vadd.f32 1.0, %v3458_v2 }
0x1036   :  { %3459 = vrcp.f32 %v2440_v51 }
0x1040   :  { %v3460_v32 = vpop.eup %3459 }
0x1041   :  { %3069 = vmatmul.mubr.msk.f32.vlgmr.msra.gmra.mrb[34].mxu0 %vm2443_vm0, %v3460_v32 }
0x1042   :  { %3079 = vmatprep.mubr.msk.f32.mxu0 %vm3502_vm1, %v5396_v61 }
0x1114   :  { %v2516_v8 = vpop.f32.mrb[34].mxu0 }
0x1115   :  { %v2520_v61 = vmul.f32 %v2516_v8, %v2192_v27  ;;  %v3070_v25 = vpop.f32.mrb[35].mxu0  ;;  %v2897_v8 = vld [vmem:[%s5275_s5 + $0x98] sm:$0xff] }
0x1116   :  { %v2907_v25 = vld [vmem:[%s5275_s5 + $0xe8] sm:$0xff] }
0x1117   :  { %v2528_v63 = vrot.slane %v2520_v61, %v5398_v17  ;;  %v2541_v30 = vrot.slane %v2520_v61, %v5399_v5  ;;  %v2558_v60 = vrot.slane %v2520_v61, %v5400_v24  ;;  %v2575_v42 = vrot.slane %v2520_v61, %v5401_v1  ;;  %v2890_v17 = vld [vmem:[%s5275_s5 + $0x60] sm:$0xff]  ;;  %v2891_v5 = vld [vmem:[%s5275_s5 + $0x68] sm:$0xff] }
0x1118   :  { %v2592_v24 = vrot.slane %v2520_v61, %v5397_v54  ;;  %v2885_v54 = vld [vmem:[%s5275_s5 + $0x38] sm:$0xff]  ;;  %v2609_v53 = vrot.slane %v2520_v61, %v5402_v20  ;;  %v5182_v23 = vrot.slane %v2520_v61, %v5403_v10  ;;  %v5185_v19 = vrot.slane %v2520_v61, %v5404_v58  ;;  %v2898_v20 = vld [vmem:[%s5275_s5 + $0xa0] sm:$0xff]  ;;  %v2899_v10 = vld [vmem:[%s5275_s5 + $0xa8] sm:$0xff] }
0x1119   :  { %v2529_v29 = vmul.f32 %v2528_v63, %v2521_v9  ;;  %v2530_v40 = vmul.f32 %v2528_v63, %v2522_v43  ;;  %v2542_v16 = vmul.f32 %v2882_v11, %v2541_v30  ;;  %v2543_v62 = vmul.f32 %v2883_v12, %v2541_v30  ;;  %v2906_v61 = vld [vmem:[%s5275_s5 + $0xe0] sm:$0xff] }
0x111a   :  { %v2559_v27 = vmul.f32 %v2886_v59, %v2558_v60  ;;  %v2560_v34 = vmul.f32 %v2887_v49, %v2558_v60  ;;  %v2576_v33 = vmul.f32 %v2890_v17, %v2575_v42  ;;  %v2577_v50 = vmul.f32 %v2891_v5, %v2575_v42  ;;  %v2900_v49 = vld [vmem:[%s5275_s5 + $0xb0] sm:$0xff] }
0x111b   :  { %v2546_v57 = vadd.f32 %v2542_v16, %v2529_v29  ;;  %v2547_v1 = vadd.f32 %v2543_v62, %v2530_v40  ;;  %v2531_v58 = vmul.f32 %v2528_v63, %v2523_v52  ;;  %v2532_v21 = vmul.f32 %v2528_v63, %v2524_v3  ;;  %v2901_v29 = vld [vmem:[%s5275_s5 + $0xb8] sm:$0xff] }
0x111c   :  { %v2544_v7 = vmul.f32 %v2884_v13, %v2541_v30  ;;  %v2545_v18 = vmul.f32 %v2885_v54, %v2541_v30  ;;  %v2593_v4 = vmul.f32 %v2894_v22, %v2592_v24  ;;  %v2594_v26 = vmul.f32 %v2895_v44, %v2592_v24 }
0x111d   :  { %v2563_v15 = vadd.f32 %v2559_v27, %v2546_v57  ;;  %v2564_v56 = vadd.f32 %v2560_v34, %v2547_v1  ;;  %v2561_v32 = vmul.f32 %v2888_v55, %v2558_v60  ;;  %v2562_v35 = vmul.f32 %v2889_v36, %v2558_v60  ;;  %v2904_v1 = vld [vmem:[%s5275_s5 + $0xd0] sm:$0xff]  ;;  %v2905_v27 = vld [vmem:[%s5275_s5 + $0xd8] sm:$0xff] }
0x111e   :  { %v2548_v2 = vadd.f32 %v2544_v7, %v2531_v58  ;;  %v2549_v51 = vadd.f32 %v2545_v18, %v2532_v21  ;;  %v2610_v6 = vmul.f32 %v2898_v20, %v2609_v53  ;;  %v2611_v0 = vmul.f32 %v2899_v10, %v2609_v53  ;;  %v2909_v55 = vld [vmem:[%s5275_s5 + $0xf8] sm:$0xff]  ;;  %v2652_v18 = vld [vmem:[%s5271_s1 + $0x114] ss:$0 sm:$0xff] }
0x111f   :  { %v2580_v47 = vadd.f32 %v2576_v33, %v2563_v15  ;;  %v2581_v28 = vadd.f32 %v2577_v50, %v2564_v56  ;;  %v2578_v11 = vmul.f32 %v2892_v45, %v2575_v42  ;;  %v2579_v12 = vmul.f32 %v2893_v46, %v2575_v42  ;;  %v2908_v50 = vld [vmem:[%s5275_s5 + $0xf0] sm:$0xff] }
0x1120   :  { %v2565_v9 = vadd.f32 %v2561_v32, %v2548_v2  ;;  %v2566_v43 = vadd.f32 %v2562_v35, %v2549_v51  ;;  %v2627_v60 = vmul.f32 %v2902_v14, %v5182_v23  ;;  %v2628_v59 = vmul.f32 %v2903_v31, %v5182_v23 }
0x1121   :  { %v2597_v41 = vadd.f32 %v2593_v4, %v2580_v47  ;;  %v2598_v48 = vadd.f32 %v2594_v26, %v2581_v28  ;;  %v2595_v62 = vmul.f32 %v2896_v38, %v2592_v24  ;;  %v2596_v17 = vmul.f32 %v2897_v8, %v2592_v24 }
0x1122   :  { %v2582_v40 = vadd.f32 %v2578_v11, %v2565_v9  ;;  %v2583_v16 = vadd.f32 %v2579_v12, %v2566_v43  ;;  %v2644_v52 = vmul.f32 %v2906_v61, %v5185_v19  ;;  %v2645_v57 = vmul.f32 %v2907_v25, %v5185_v19 }
0x1123   :  { %v2614_v63 = vadd.f32 %v2610_v6, %v2597_v41  ;;  %v2615_v30 = vadd.f32 %v2611_v0, %v2598_v48  ;;  %v2612_v13 = vmul.f32 %v2900_v49, %v2609_v53  ;;  %v2613_v54 = vmul.f32 %v2901_v29, %v2609_v53 }
0x1124   :  { %v2599_v34 = vadd.f32 %v2595_v62, %v2582_v40  ;;  %v2600_v3 = vadd.f32 %v2596_v17, %v2583_v16  ;;  %v2629_v56 = vmul.f32 %v2904_v1, %v5182_v23  ;;  %v2630_v33 = vmul.f32 %v2905_v27, %v5182_v23 }
0x1125   :  { %v2631_v5 = vadd.f32 %v2627_v60, %v2614_v63  ;;  %v2632_v42 = vadd.f32 %v2628_v59, %v2615_v30  ;;  %v2646_v53 = vmul.f32 %v2908_v50, %v5185_v19  ;;  %v2647_v58 = vmul.f32 %v2909_v55, %v5185_v19 }
0x1126   :  { %v2616_v44 = vadd.f32 %v2612_v13, %v2599_v34  ;;  %v2617_v15 = vadd.f32 %v2613_v54, %v2600_v3 }
0x1127   :  { %v2648_v22 = vadd.f32 %v2644_v52, %v2631_v5  ;;  %v2649_v24 = vadd.f32 %v2645_v57, %v2632_v42 }
0x1128   :  { %v2633_v20 = vadd.f32 %v2629_v56, %v2616_v44  ;;  %v2634_v10 = vadd.f32 %v2630_v33, %v2617_v15 }
0x1129   :  { %v3422_v36 = vpack.c.bf16 %v2649_v24, %v2648_v22 }
0x112a   :  { %v2650_v21 = vadd.f32 %v2646_v53, %v2633_v20  ;;  %v2651_v23 = vadd.f32 %v2647_v58, %v2634_v10 }
0x112b   :  { %3423 = vmatpush3.bf16.xpose.msra.mxu0 %v3422_v36 }
0x112c   :  { %3424 = vmatprep.subr.bf16.mxu0 %v3495_v37  ;;  %v3425_v7 = vpack.c.bf16 %v2651_v23, %v2650_v21  ;;  %v2726_v37 = vld [vmem:[%s5271_s1 + $0x127] ss:$0 sm:$0xff] }
0x1133   :  { %3426 = vmatpush3.bf16.xpose.msra.mxu0 %v3425_v7 }
0x113a   :  { %3080 = vmatmul.mubr.f32.vlgmr.msra.gmra.mrb[36].mxu0 %v5064_v39 }
0x120d   :  { %v2719_v47 = vpop.f32.mrb[36].mxu0 }
0x120e   :  { %v2720_v28 = vadd.f32 %v2719_v47, %v2652_v18  ;;  %v3081_v4 = vpop.f32.mrb[37].mxu0 }
0x1210   :  { %v2723_v26 = vmax.f32 %v2720_v28, 0.0 }
0x1212   :  { %3087 = vmatmul.mubr.msk.f32.vlgmr.msra.gmra.mrb[32].mxu1 %vm2733_vm6, %v2723_v26 }
0x12e5   :  { %v2807_v19 = vpop.f32.mrb[32].mxu1 }
0x12e6   :  { %v2808_v45 = vadd.f32 %v2807_v19, %v2726_v37  ;;  %v3088_v39 = vpop.f32.mrb[33].mxu1 }
0x12e8   :  { %2812 = vst.msk [vmem:[#allocation2] sm:$0x3] %vm2811_vm8, %v2808_v45 }
0x12e9   :  { %3472 = shalt.err (!%p3469_p4)
}
0x12ea   :  { %s3473_s3 = scalar_lea.hbm %s5276_s6, 32 }
0x12eb   :  { %p3474_p5 = scmp.ne.s32.totalorder %s5276_s6, %s3473_s3  ;;  %p3477_p6 = scmp.lt.u32.totalorder %s3473_s3, %s5276_s6 }
0x12ed   :  { %p3479_p7 = pnand %p3477_p6, %p3474_p5 }
0x12ef   :  { %3482 = shalt.err (!%p3479_p7)
}
0x12f0   :  { %2822 = dma.vmem_to_hbm [thread:$0]  %s2820_s30, 32, %s5276_s6, [#allocation3]  }
0x12f1   :  { %3483 = dma.done.wait [#allocation3], 32  }
0x12f2   :  { %3484 = vsyncadd [#allocation3], 4294967264 }
0x12f3   :  { %2826 = vsyncpa [#allocation3], 1 }

</bundles_post_ra>
